<compile_context>
chip_gen: v6e
topology: v6e:2x2x1
jax: 0.10.0
libtpu: 0.0.40
codegen_flags: <defaults>
</compile_context>

<pallas_src>
import functools

import jax
import jax.numpy as jnp
from jax.experimental import pallas as pl
from jax.experimental.pallas import tpu as pltpu


def _cca_kernel(mask_ref, xfull_ref, xtile_ref, w_ref, b_ref, gamma_ref,
                o_ref, q_s, k_s, v_s, qT_s, kT_s, vT_s,
                *, tq, compute_dtype, approx_recip):
    H, W, c8 = q_s.shape
    C = v_s.shape[2]
    cd = compute_dtype
    t = pl.program_id(1)

    # ---- once per batch element: fused QKV projection into VMEM scratch ----
    @pl.when(t == 0)
    def _():
        # x block is (C, H*W); one 2-D transpose gives (H*W, C).
        xf = jnp.transpose(xfull_ref[...]).astype(cd)                # (H*W, C)
        qkv = jnp.dot(xf, w_ref[...],
                      preferred_element_type=jnp.float32) + b_ref[...]
        q = qkv[:, :c8].reshape(H, W, c8)
        k = qkv[:, c8:2 * c8].reshape(H, W, c8)
        v = qkv[:, 2 * c8:].reshape(H, W, C)
        q_s[...] = q.astype(cd)
        k_s[...] = k.astype(cd)
        v_s[...] = v.astype(cd)
        qT_s[...] = jnp.transpose(q, (1, 0, 2)).astype(cd)           # (W, H, c8)
        kT_s[...] = jnp.transpose(k, (1, 0, 2)).astype(cd)
        vT_s[...] = jnp.transpose(v, (1, 0, 2)).astype(cd)           # (W, H, C)

    # ---- this query-row tile -----------------------------------------------
    r0 = pl.multiple_of(t * tq, tq)
    q_t = q_s[pl.ds(r0, tq), :, :]                                   # (tq, W, c8)
    k_t = k_s[pl.ds(r0, tq), :, :]                                   # (tq, W, c8)
    v_t = v_s[pl.ds(r0, tq), :, :]                                   # (tq, W, C)
    qT_t = qT_s[:, pl.ds(r0, tq), :]                                 # (W, tq, c8)

    # Column ("H") energies: batch axis w leading -> clean batched matmul.
    e_h = jnp.einsum('wic,wjc->wij', qT_t, kT_s[...],
                     preferred_element_type=jnp.float32)             # (W, tq, H)
    e_h = e_h + mask_ref[pl.ds(r0, tq), :][None, :, :]               # -BIG on i==j

    # Row ("W") energies: batch axis i (query row) leading.
    e_w = jnp.einsum('iwc,ijc->iwj', q_t, k_t,
                     preferred_element_type=jnp.float32)             # (tq, W, W)

    # Joint softmax over the concatenated (H + W) axis, stats in f32.
    m = jnp.maximum(jnp.transpose(jnp.max(e_h, axis=2)),
                    jnp.max(e_w, axis=2))                            # (tq, W)
    m_T = jnp.transpose(m)                                           # (W, tq)
    p_h = jnp.exp(e_h - m_T[:, :, None])                             # (W, tq, H)
    p_w = jnp.exp(e_w - m[:, :, None])                               # (tq, W, W)
    s = jnp.transpose(jnp.sum(p_h, axis=2)) + jnp.sum(p_w, axis=2)   # (tq, W)
    inv = pl.reciprocal(s, approx=approx_recip)                      # (tq, W)
    a_h = (p_h * jnp.transpose(inv)[:, :, None]).astype(cd)
    a_w = (p_w * inv[:, :, None]).astype(cd)

    # Value aggregation, batch-leading matmuls on the MXU (f32 accumulation).
    out_hT = jnp.einsum('wij,wjc->wic', a_h, vT_s[...],
                        preferred_element_type=jnp.float32)          # (W, tq, C)
    out_w = jnp.einsum('iwj,ijc->iwc', a_w, v_t,
                       preferred_element_type=jnp.float32)           # (tq, W, C)
    out = jnp.transpose(out_hT, (1, 0, 2)) + out_w                   # (tq, W, C)

    # gamma * out + x, stored back in C x (tq*W) layout (lane-dense stores).
    out2 = jnp.transpose(out.reshape(tq * W, C))                     # (C, tq*W)
    o_ref[...] = (gamma_ref[0] * out2 + xtile_ref[...]).astype(o_ref.dtype)


def criss_cross_attention(x_nchw, wq, bq, wk, bk, wv, bv, gamma,
                          *, tq=None, compute_dtype=jnp.bfloat16):
    """x_nchw: (B, C, H, W); wq/wk: (C//8, C); wv: (C, C); gamma: scalar."""
    B, C, H, W = x_nchw.shape
    c8 = wq.shape[0]
    if tq is None:
        tq = 8 if (H % 8 == 0 and H > 8) else H
    assert H % tq == 0 and (tq % 8 == 0 or tq == H), (H, tq)
    n_tiles = H // tq
    ctot = 2 * c8 + C

    # Free (contiguous) reshape -- no HBM transpose traffic.
    x_flat = x_nchw.reshape(B, C, H * W)

    # Fused projection weights: xf @ [Wq^T | Wk^T | Wv^T] -> one wide matmul.
    w_fused = jnp.concatenate(
        [jnp.transpose(wq), jnp.transpose(wk), jnp.transpose(wv)],
        axis=1).astype(compute_dtype)                                # (C, ctot)
    b_fused = jnp.concatenate([bq, bk, bv]).reshape(1, ctot).astype(jnp.float32)

    # Additive diagonal mask for the column ("H") attention path (finite
    # surrogate for -inf keeps the online softmax NaN-free).
    diag_mask = jnp.where(jnp.eye(H, dtype=bool), -1e30, 0.0).astype(jnp.float32)

    kernel = functools.partial(
        _cca_kernel, tq=tq, compute_dtype=compute_dtype,
        approx_recip=(compute_dtype != jnp.float32))

    out_flat = pl.pallas_call(
        kernel,
        out_shape=jax.ShapeDtypeStruct((B, C, H * W), x_nchw.dtype),
        grid=(B, n_tiles),
        in_specs=[
            pl.BlockSpec((H, H), lambda b, t: (0, 0)),                # diag mask
            pl.BlockSpec((None, C, H * W), lambda b, t: (b, 0, 0)),   # x (full, per batch)
            pl.BlockSpec((None, C, tq * W), lambda b, t: (b, 0, t)),  # x row tile (residual)
            pl.BlockSpec((C, ctot), lambda b, t: (0, 0)),             # fused [Wq|Wk|Wv]^T
            pl.BlockSpec((1, ctot), lambda b, t: (0, 0)),             # fused bias
            pl.BlockSpec(memory_space=pltpu.MemorySpace.SMEM),        # gamma
        ],
        out_specs=pl.BlockSpec((None, C, tq * W), lambda b, t: (b, 0, t)),
        scratch_shapes=[
            pltpu.VMEM((H, W, c8), compute_dtype),   # q   (row layout)
            pltpu.VMEM((H, W, c8), compute_dtype),   # k   (row layout)
            pltpu.VMEM((H, W, C), compute_dtype),    # v   (row layout)
            pltpu.VMEM((W, H, c8), compute_dtype),   # q^T (column layout)
            pltpu.VMEM((W, H, c8), compute_dtype),   # k^T (column layout)
            pltpu.VMEM((W, H, C), compute_dtype),    # v^T (column layout)
        ],
        compiler_params=pltpu.CompilerParams(
            dimension_semantics=("parallel", "arbitrary")),
    )(diag_mask, x_flat, x_flat, w_fused, b_fused,
      jnp.reshape(gamma, (1,)).astype(jnp.float32))

    return out_flat.reshape(B, C, H, W)


def reference(x, wq, bq, wk, bk, wv, bv, gamma):
    """Pure-JAX reference mirroring the PyTorch forward step by step (NCHW)."""
    B, C, H, W = x.shape
    hp = jax.lax.Precision.HIGHEST

    def conv1x1(x, w, b):
        return jnp.einsum('bchw,oc->bohw', x, w, precision=hp) + b[None, :, None, None]

    pq = conv1x1(x, wq, bq)
    pk = conv1x1(x, wk, bk)
    pv = conv1x1(x, wv, bv)
    C8 = pq.shape[1]

    pq_H = jnp.transpose(pq, (0, 3, 1, 2)).reshape(B * W, C8, H).transpose(0, 2, 1)
    pk_H = jnp.transpose(pk, (0, 3, 1, 2)).reshape(B * W, C8, H)
    pv_H = jnp.transpose(pv, (0, 3, 1, 2)).reshape(B * W, C, H)
    pq_W = jnp.transpose(pq, (0, 2, 1, 3)).reshape(B * H, C8, W).transpose(0, 2, 1)
    pk_W = jnp.transpose(pk, (0, 2, 1, 3)).reshape(B * H, C8, W)
    pv_W = jnp.transpose(pv, (0, 2, 1, 3)).reshape(B * H, C, W)

    inf_h = jnp.where(jnp.eye(H, dtype=bool), -jnp.inf, 0.0)[None]
    energy_H = (jnp.matmul(pq_H, pk_H, precision=hp) + inf_h
                ).reshape(B, W, H, H).transpose(0, 2, 1, 3)
    energy_W = jnp.matmul(pq_W, pk_W, precision=hp).reshape(B, H, W, W)
    concate = jax.nn.softmax(jnp.concatenate([energy_H, energy_W], axis=3), axis=3)

    att_H = jnp.transpose(concate[..., :H], (0, 2, 1, 3)).reshape(B * W, H, H)
    att_W = concate[..., H:].reshape(B * H, W, W)
    out_H = jnp.matmul(pv_H, jnp.transpose(att_H, (0, 2, 1)), precision=hp
                       ).reshape(B, W, C, H).transpose(0, 2, 3, 1)
    out_W = jnp.matmul(pv_W, jnp.transpose(att_W, (0, 2, 1)), precision=hp
                       ).reshape(B, H, C, W).transpose(0, 2, 1, 3)
    return gamma * (out_H + out_W) + x


if __name__ == "__main__":
    B, C, H, W = 2, 16, 16, 16
    C8 = C // 8

    key = jax.random.PRNGKey(0)
    kx, kq, kbq, kk, kbk, kv, kbv = jax.random.split(key, 7)
    x = jax.random.normal(kx, (B, C, H, W), jnp.float32)
    # Conv2d 1x1 weights stored as (Cout, Cin) (kernel spatial dims squeezed).
    wq = 0.2 * jax.random.normal(kq, (C8, C), jnp.float32)
    bq = 0.1 * jax.random.normal(kbq, (C8,), jnp.float32)
    wk = 0.2 * jax.random.normal(kk, (C8, C), jnp.float32)
    bk = 0.1 * jax.random.normal(kbk, (C8,), jnp.float32)
    wv = 0.2 * jax.random.normal(kv, (C, C), jnp.float32)
    bv = 0.1 * jax.random.normal(kbv, (C,), jnp.float32)
    # Module __init__ sets gamma = 0 (output would trivially equal x);
    # use a deterministic non-zero gamma so the attention path is exercised.
    gamma = jnp.float32(0.5)

    ref = reference(x, wq, bq, wk, bk, wv, bv, gamma)

    # f32 path (f32 MXU matmuls, exact reciprocal): tight check.
    out_f32 = criss_cross_attention(x, wq, bq, wk, bk, wv, bv, gamma,
                                    tq=8, compute_dtype=jnp.float32)
    out_f32 = jax.block_until_ready(out_f32)
    err_f32 = float(jnp.max(jnp.abs(out_f32 - ref)))
    assert err_f32 < 2e-2, f"f32 path max abs error {err_f32}"

    # Fast path (bf16 MXU operands, f32 softmax/accum): dtype-limited tolerance.
    out_bf16 = criss_cross_attention(x, wq, bq, wk, bk, wv, bv, gamma,
                                     tq=8, compute_dtype=jnp.bfloat16)
    out_bf16 = jax.block_until_ready(out_bf16)
    err_bf16 = float(jnp.max(jnp.abs(out_bf16 - ref)))
    assert err_bf16 < 3e-1, f"bf16 path max abs error {err_bf16}"

    print("KERNEL_OK")
</pallas_src>

<mosaic_0001>
module attributes {stable_mosaic.version = 11 : i64} {
  func.func @_cca_kernel(%arg0: i32, %arg1: i32, %arg2: memref<16x16xf32, #tpu.memory_space<vmem>>, %arg3: memref<1x16x256xf32, #tpu.memory_space<vmem>>, %arg4: memref<1x16x128xf32, #tpu.memory_space<vmem>>, %arg5: memref<16x20xf32, #tpu.memory_space<vmem>>, %arg6: memref<1x20xf32, #tpu.memory_space<vmem>>, %arg7: memref<1xf32, #tpu.memory_space<smem>>, %arg8: memref<1x16x128xf32, #tpu.memory_space<vmem>>, %arg9: memref<16x16x2xf32, #tpu.memory_space<vmem>>, %arg10: memref<16x16x2xf32, #tpu.memory_space<vmem>>, %arg11: memref<16x16x16xf32, #tpu.memory_space<vmem>>, %arg12: memref<16x16x2xf32, #tpu.memory_space<vmem>>, %arg13: memref<16x16x2xf32, #tpu.memory_space<vmem>>, %arg14: memref<16x16x16xf32, #tpu.memory_space<vmem>>) attributes {dimension_semantics = [#tpu.dimension_semantics<parallel>, #tpu.dimension_semantics<arbitrary>], iteration_bounds = array<i64: 2, 2>, scalar_prefetch = 0 : i64, scratch_operands = 6 : i64, tpu.core_type = #tpu.core_type<tc>, window_params = [{pipeline_mode = #tpu.pipeline_mode<synchronous>, transform_indices = @transform_0, window_bounds = array<i64: 16, 16>}, {transform_indices = @transform_1, window_bounds = array<i64: 1, 16, 256>}, {transform_indices = @transform_2, window_bounds = array<i64: 1, 16, 128>}, {pipeline_mode = #tpu.pipeline_mode<synchronous>, transform_indices = @transform_3, window_bounds = array<i64: 16, 20>}, {pipeline_mode = #tpu.pipeline_mode<synchronous>, transform_indices = @transform_4, window_bounds = array<i64: 1, 20>}, {transform_indices = @transform_5, window_bounds = array<i64: 1>}, {transform_indices = @transform_6, window_bounds = array<i64: 1, 16, 128>}]} {
    %c0_i32 = arith.constant 0 : i32
    %0 = arith.cmpi eq, %arg1, %c0_i32 : i32
    %1 = arith.extui %0 : i1 to i32
    %c0_i32_0 = arith.constant 0 : i32
    %2 = arith.cmpi ne, %1, %c0_i32_0 : i32
    scf.if %2 {
      %c0_29 = arith.constant 0 : index
      %c0_30 = arith.constant 0 : index
      %c0_31 = arith.constant 0 : index
      %62 = vector.load %arg3[%c0_29, %c0_30, %c0_31] : memref<1x16x256xf32, #tpu.memory_space<vmem>>, vector<1x16x256xf32>
      %63 = vector.shape_cast %62 : vector<1x16x256xf32> to vector<16x256xf32>
      %64 = tpu.transpose %63, [1, 0] : vector<16x256xf32> -> vector<256x16xf32>
      %c0_32 = arith.constant 0 : index
      %c0_33 = arith.constant 0 : index
      %65 = vector.load %arg5[%c0_32, %c0_33] : memref<16x20xf32, #tpu.memory_space<vmem>>, vector<16x20xf32>
      %cst_34 = arith.constant dense<0.000000e+00> : vector<256x20xf32>
      %66 = tpu.matmul %64, %65, %cst_34 {dimension_numbers = #tpu.dot_dimension_numbers<[1], [0], [0], [1], [0, 0, 1, 1], [], []>} : vector<256x16xf32>, vector<16x20xf32>, vector<256x20xf32> -> vector<256x20xf32>
      %c0_35 = arith.constant 0 : index
      %c0_36 = arith.constant 0 : index
      %67 = vector.load %arg6[%c0_35, %c0_36] : memref<1x20xf32, #tpu.memory_space<vmem>>, vector<1x20xf32>
      %68 = vector.broadcast %67 : vector<1x20xf32> to vector<256x20xf32>
      %69 = arith.addf %66, %68 : vector<256x20xf32>
      %70 = vector.extract_strided_slice %69 {offsets = [0, 0], sizes = [256, 2], strides = [1, 1]} : vector<256x20xf32> to vector<256x2xf32>
      %71 = vector.shape_cast %70 : vector<256x2xf32> to vector<16x16x2xf32>
      %72 = vector.extract_strided_slice %69 {offsets = [0, 2], sizes = [256, 2], strides = [1, 1]} : vector<256x20xf32> to vector<256x2xf32>
      %73 = vector.shape_cast %72 : vector<256x2xf32> to vector<16x16x2xf32>
      %74 = vector.extract_strided_slice %69 {offsets = [0, 4], sizes = [256, 16], strides = [1, 1]} : vector<256x20xf32> to vector<256x16xf32>
      %75 = vector.shape_cast %74 : vector<256x16xf32> to vector<16x16x16xf32>
      %c0_37 = arith.constant 0 : index
      %c0_38 = arith.constant 0 : index
      %c0_39 = arith.constant 0 : index
      %76 = vector.load %arg9[%c0_37, %c0_38, %c0_39] : memref<16x16x2xf32, #tpu.memory_space<vmem>>, vector<16x16x2xf32>
      tpu.vector_store %arg9[%c0_37, %c0_38, %c0_39], %71 {strides = array<i32>} : memref<16x16x2xf32, #tpu.memory_space<vmem>>, vector<16x16x2xf32>,
      %c0_40 = arith.constant 0 : index
      %c0_41 = arith.constant 0 : index
      %c0_42 = arith.constant 0 : index
      %77 = vector.load %arg10[%c0_40, %c0_41, %c0_42] : memref<16x16x2xf32, #tpu.memory_space<vmem>>, vector<16x16x2xf32>
      tpu.vector_store %arg10[%c0_40, %c0_41, %c0_42], %73 {strides = array<i32>} : memref<16x16x2xf32, #tpu.memory_space<vmem>>, vector<16x16x2xf32>,
      %c0_43 = arith.constant 0 : index
      %c0_44 = arith.constant 0 : index
      %c0_45 = arith.constant 0 : index
      %78 = vector.load %arg11[%c0_43, %c0_44, %c0_45] : memref<16x16x16xf32, #tpu.memory_space<vmem>>, vector<16x16x16xf32>
      tpu.vector_store %arg11[%c0_43, %c0_44, %c0_45], %75 {strides = array<i32>} : memref<16x16x16xf32, #tpu.memory_space<vmem>>, vector<16x16x16xf32>,
      %79 = tpu.transpose %71, [1, 0, 2] : vector<16x16x2xf32> -> vector<16x16x2xf32>
      %c0_46 = arith.constant 0 : index
      %c0_47 = arith.constant 0 : index
      %c0_48 = arith.constant 0 : index
      %80 = vector.load %arg12[%c0_46, %c0_47, %c0_48] : memref<16x16x2xf32, #tpu.memory_space<vmem>>, vector<16x16x2xf32>
      tpu.vector_store %arg12[%c0_46, %c0_47, %c0_48], %79 {strides = array<i32>} : memref<16x16x2xf32, #tpu.memory_space<vmem>>, vector<16x16x2xf32>,
      %81 = tpu.transpose %73, [1, 0, 2] : vector<16x16x2xf32> -> vector<16x16x2xf32>
      %c0_49 = arith.constant 0 : index
      %c0_50 = arith.constant 0 : index
      %c0_51 = arith.constant 0 : index
      %82 = vector.load %arg13[%c0_49, %c0_50, %c0_51] : memref<16x16x2xf32, #tpu.memory_space<vmem>>, vector<16x16x2xf32>
      tpu.vector_store %arg13[%c0_49, %c0_50, %c0_51], %81 {strides = array<i32>} : memref<16x16x2xf32, #tpu.memory_space<vmem>>, vector<16x16x2xf32>,
      %83 = tpu.transpose %75, [1, 0, 2] : vector<16x16x16xf32> -> vector<16x16x16xf32>
      %c0_52 = arith.constant 0 : index
      %c0_53 = arith.constant 0 : index
      %c0_54 = arith.constant 0 : index
      %84 = vector.load %arg14[%c0_52, %c0_53, %c0_54] : memref<16x16x16xf32, #tpu.memory_space<vmem>>, vector<16x16x16xf32>
      tpu.vector_store %arg14[%c0_52, %c0_53, %c0_54], %83 {strides = array<i32>} : memref<16x16x16xf32, #tpu.memory_space<vmem>>, vector<16x16x16xf32>,
    } else {
    }
    %c8_i32 = arith.constant 8 : i32
    %3 = arith.muli %arg1, %c8_i32 : i32
    %4 = tpu.assume_multiple %3, 8 : i32
    %5 = arith.index_cast %4 : i32 to index
    %c0 = arith.constant 0 : index
    %c0_1 = arith.constant 0 : index
    %6 = vector.load %arg9[%5, %c0, %c0_1] : memref<16x16x2xf32, #tpu.memory_space<vmem>>, vector<8x16x2xf32>
    %7 = arith.index_cast %4 : i32 to index
    %c0_2 = arith.constant 0 : index
    %c0_3 = arith.constant 0 : index
    %8 = vector.load %arg10[%7, %c0_2, %c0_3] : memref<16x16x2xf32, #tpu.memory_space<vmem>>, vector<8x16x2xf32>
    %9 = arith.index_cast %4 : i32 to index
    %c0_4 = arith.constant 0 : index
    %c0_5 = arith.constant 0 : index
    %10 = vector.load %arg11[%9, %c0_4, %c0_5] : memref<16x16x16xf32, #tpu.memory_space<vmem>>, vector<8x16x16xf32>
    %c0_6 = arith.constant 0 : index
    %11 = arith.index_cast %4 : i32 to index
    %c0_7 = arith.constant 0 : index
    %12 = vector.load %arg12[%c0_6, %11, %c0_7] : memref<16x16x2xf32, #tpu.memory_space<vmem>>, vector<16x8x2xf32>
    %c0_8 = arith.constant 0 : index
    %c0_9 = arith.constant 0 : index
    %c0_10 = arith.constant 0 : index
    %13 = vector.load %arg13[%c0_8, %c0_9, %c0_10] : memref<16x16x2xf32, #tpu.memory_space<vmem>>, vector<16x16x2xf32>
    "tpu.trace_start"() <{level = 10 : i32, message = "wic,wjc->wij"}> : () -> ()
    %cst = arith.constant dense<0.000000e+00> : vector<16x8x16xf32>
    %14 = tpu.matmul %12, %13, %cst {dimension_numbers = #tpu.dot_dimension_numbers<[2], [2], [1], [1], [0, 0, 0, 1, 1, 1], [0], [0]>} : vector<16x8x2xf32>, vector<16x16x2xf32>, vector<16x8x16xf32> -> vector<16x8x16xf32>
    "tpu.trace_stop"() : () -> ()
    %15 = arith.index_cast %4 : i32 to index
    %c0_11 = arith.constant 0 : index
    %16 = vector.load %arg2[%15, %c0_11] : memref<16x16xf32, #tpu.memory_space<vmem>>, vector<8x16xf32>
    %17 = vector.shape_cast %16 : vector<8x16xf32> to vector<1x8x16xf32>
    %18 = vector.broadcast %17 : vector<1x8x16xf32> to vector<16x8x16xf32>
    %19 = arith.addf %14, %18 : vector<16x8x16xf32>
    "tpu.trace_start"() <{level = 10 : i32, message = "iwc,ijc->iwj"}> : () -> ()
    %cst_12 = arith.constant dense<0.000000e+00> : vector<8x16x16xf32>
    %20 = tpu.matmul %6, %8, %cst_12 {dimension_numbers = #tpu.dot_dimension_numbers<[2], [2], [1], [1], [0, 0, 0, 1, 1, 1], [0], [0]>} : vector<8x16x2xf32>, vector<8x16x2xf32>, vector<8x16x16xf32> -> vector<8x16x16xf32>
    "tpu.trace_stop"() : () -> ()
    %cst_13 = arith.constant dense<0xFF800000> : vector<16x8xf32>
    %21 = vector.multi_reduction <maximumf>, %19, %cst_13 [2] : vector<16x8x16xf32> to vector<16x8xf32>
    %22 = tpu.transpose %21, [1, 0] : vector<16x8xf32> -> vector<8x16xf32>
    %cst_14 = arith.constant dense<0xFF800000> : vector<8x16xf32>
    %23 = vector.multi_reduction <maximumf>, %20, %cst_14 [2] : vector<8x16x16xf32> to vector<8x16xf32>
    %24 = arith.maximumf %22, %23 : vector<8x16xf32>
    %25 = tpu.transpose %24, [1, 0] : vector<8x16xf32> -> vector<16x8xf32>
    %26 = vector.shape_cast %25 : vector<16x8xf32> to vector<16x8x1xf32>
    %27 = vector.broadcast %26 : vector<16x8x1xf32> to vector<16x8x16xf32>
    %28 = arith.subf %19, %27 : vector<16x8x16xf32>
    %29 = math.exp %28 : vector<16x8x16xf32>
    %30 = vector.shape_cast %24 : vector<8x16xf32> to vector<8x16x1xf32>
    %31 = vector.broadcast %30 : vector<8x16x1xf32> to vector<8x16x16xf32>
    %32 = arith.subf %20, %31 : vector<8x16x16xf32>
    %33 = math.exp %32 : vector<8x16x16xf32>
    %cst_15 = arith.constant dense<0.000000e+00> : vector<16x8xf32>
    %34 = vector.multi_reduction <add>, %29, %cst_15 [2] : vector<16x8x16xf32> to vector<16x8xf32>
    %35 = tpu.transpose %34, [1, 0] : vector<16x8xf32> -> vector<8x16xf32>
    %cst_16 = arith.constant dense<0.000000e+00> : vector<8x16xf32>
    %36 = vector.multi_reduction <add>, %33, %cst_16 [2] : vector<8x16x16xf32> to vector<8x16xf32>
    %37 = arith.addf %35, %36 : vector<8x16xf32>
    %38 = tpu.reciprocal %37 : vector<8x16xf32> -> vector<8x16xf32>
    %39 = tpu.transpose %38, [1, 0] : vector<8x16xf32> -> vector<16x8xf32>
    %40 = vector.shape_cast %39 : vector<16x8xf32> to vector<16x8x1xf32>
    %41 = vector.broadcast %40 : vector<16x8x1xf32> to vector<16x8x16xf32>
    %42 = arith.mulf %29, %41 : vector<16x8x16xf32>
    %43 = vector.shape_cast %38 : vector<8x16xf32> to vector<8x16x1xf32>
    %44 = vector.broadcast %43 : vector<8x16x1xf32> to vector<8x16x16xf32>
    %45 = arith.mulf %33, %44 : vector<8x16x16xf32>
    %c0_17 = arith.constant 0 : index
    %c0_18 = arith.constant 0 : index
    %c0_19 = arith.constant 0 : index
    %46 = vector.load %arg14[%c0_17, %c0_18, %c0_19] : memref<16x16x16xf32, #tpu.memory_space<vmem>>, vector<16x16x16xf32>
    "tpu.trace_start"() <{level = 10 : i32, message = "wij,wjc->wic"}> : () -> ()
    %cst_20 = arith.constant dense<0.000000e+00> : vector<16x8x16xf32>
    %47 = tpu.matmul %42, %46, %cst_20 {dimension_numbers = #tpu.dot_dimension_numbers<[2], [1], [1], [2], [0, 0, 0, 1, 1, 2], [0], [0]>} : vector<16x8x16xf32>, vector<16x16x16xf32>, vector<16x8x16xf32> -> vector<16x8x16xf32>
    "tpu.trace_stop"() : () -> ()
    "tpu.trace_start"() <{level = 10 : i32, message = "iwj,ijc->iwc"}> : () -> ()
    %cst_21 = arith.constant dense<0.000000e+00> : vector<8x16x16xf32>
    %48 = tpu.matmul %45, %10, %cst_21 {dimension_numbers = #tpu.dot_dimension_numbers<[2], [1], [1], [2], [0, 0, 0, 1, 1, 2], [0], [0]>} : vector<8x16x16xf32>, vector<8x16x16xf32>, vector<8x16x16xf32> -> vector<8x16x16xf32>
    "tpu.trace_stop"() : () -> ()
    %49 = tpu.transpose %47, [1, 0, 2] : vector<16x8x16xf32> -> vector<8x16x16xf32>
    %50 = arith.addf %49, %48 : vector<8x16x16xf32>
    %51 = vector.shape_cast %50 : vector<8x16x16xf32> to vector<128x16xf32>
    %52 = tpu.transpose %51, [1, 0] : vector<128x16xf32> -> vector<16x128xf32>
    %c0_22 = arith.constant 0 : index
    %53 = memref.load %arg7[%c0_22] : memref<1xf32, #tpu.memory_space<smem>>
    %54 = vector.broadcast %53 : f32 to vector<16x128xf32>
    %55 = arith.mulf %54, %52 : vector<16x128xf32>
    %c0_23 = arith.constant 0 : index
    %c0_24 = arith.constant 0 : index
    %c0_25 = arith.constant 0 : index
    %56 = vector.load %arg4[%c0_23, %c0_24, %c0_25] : memref<1x16x128xf32, #tpu.memory_space<vmem>>, vector<1x16x128xf32>
    %57 = vector.shape_cast %56 : vector<1x16x128xf32> to vector<16x128xf32>
    %58 = arith.addf %55, %57 : vector<16x128xf32>
    %c0_26 = arith.constant 0 : index
    %c0_27 = arith.constant 0 : index
    %c0_28 = arith.constant 0 : index
    %59 = vector.load %arg8[%c0_26, %c0_27, %c0_28] : memref<1x16x128xf32, #tpu.memory_space<vmem>>, vector<1x16x128xf32>
    %60 = vector.shape_cast %59 : vector<1x16x128xf32> to vector<16x128xf32>
    %61 = vector.shape_cast %58 : vector<16x128xf32> to vector<1x16x128xf32>
    tpu.vector_store %arg8[%c0_26, %c0_27, %c0_28], %61 {strides = array<i32>} : memref<1x16x128xf32, #tpu.memory_space<vmem>>, vector<1x16x128xf32>,
    return
  }
  func.func @transform_0(%arg0: i32, %arg1: i32) -> (i32, i32) {
    %c0_i32 = arith.constant 0 : i32
    %c0_i32_0 = arith.constant 0 : i32
    %c0_i32_1 = arith.constant 0 : i32
    return %c0_i32, %c0_i32_0 : i32, i32
  }
  func.func @transform_1(%arg0: i32, %arg1: i32) -> (i32, i32, i32) {
    %c0_i32 = arith.constant 0 : i32
    %c0_i32_0 = arith.constant 0 : i32
    %c0_i32_1 = arith.constant 0 : i32
    return %arg0, %c0_i32, %c0_i32_0 : i32, i32, i32
  }
  func.func @transform_2(%arg0: i32, %arg1: i32) -> (i32, i32, i32) {
    %c0_i32 = arith.constant 0 : i32
    %c0_i32_0 = arith.constant 0 : i32
    return %arg0, %c0_i32, %arg1 : i32, i32, i32
  }
  func.func @transform_3(%arg0: i32, %arg1: i32) -> (i32, i32) {
    %c0_i32 = arith.constant 0 : i32
    %c0_i32_0 = arith.constant 0 : i32
    %c0_i32_1 = arith.constant 0 : i32
    return %c0_i32, %c0_i32_0 : i32, i32
  }
  func.func @transform_4(%arg0: i32, %arg1: i32) -> (i32, i32) {
    %c0_i32 = arith.constant 0 : i32
    %c0_i32_0 = arith.constant 0 : i32
    %c0_i32_1 = arith.constant 0 : i32
    return %c0_i32, %c0_i32_0 : i32, i32
  }
  func.func @transform_5(%arg0: i32, %arg1: i32) -> i32 {
    %c0_i32 = arith.constant 0 : i32
    %c0_i32_0 = arith.constant 0 : i32
    return %c0_i32 : i32
  }
  func.func @transform_6(%arg0: i32, %arg1: i32) -> (i32, i32, i32) {
    %c0_i32 = arith.constant 0 : i32
    %c0_i32_0 = arith.constant 0 : i32
    return %arg0, %c0_i32, %arg1 : i32, i32, i32
  }
}

</mosaic_0001>

<bundles_post_ra>
// kernel: tpu_custom_call.1
= control target key start
LH: loop header
LB: loop body
LE: loop exit
PB: predicated region body
PF: predicated region fallthrough
CT: control target
= control target key end

     0   :  { %s12499_s0 = inlined_call_operand.hbm [shape: f32[16,16], index: 0, kind: input, shape index: {}]   ;;  %s12500_s1 = inlined_call_operand.hbm [shape: f32[2,16,256], index: 1, kind: input, shape index: {}]   ;;  %s12501_s2 = inlined_call_operand.hbm [shape: f32[2,16,256], index: 2, kind: input, shape index: {}]   ;;  %s12502_s3 = inlined_call_operand.hbm [shape: f32[16,20], index: 3, kind: input, shape index: {}]   ;;  %s12503_s4 = inlined_call_operand.vmem [shape: f32[1,20], index: 4, kind: input, shape index: {}]   ;;  %s12504_s5 = inlined_call_operand.<no memory space> [shape: f32[1], index: 5, kind: input, shape index: {}]   ;;  %s12505_s6 = inlined_call_operand.hbm [shape: f32[2,16,256], index: 6, kind: output, shape index: {}]  }
   0x1   :  { %12533 = sst [smem:[#allocation44_spill]] %s12499_s0 }
   0x2   :  { %12534 = sst [smem:[#allocation45_spill]] %s12500_s1 }
   0x3   :  { %12535 = sst [smem:[#allocation46_spill]] %s12505_s6 }
   0x4   :  { %11 = sst [smem:[#allocation8]] %s12504_s5 }
   0x5   :  { %12 = vsyncpa [#allocation10], 0 }
   0x6   :  { %13 = vsyncpa [#allocation13], 0 }
   0x7   :  { %15 = vsyncpa [#allocation13 + $0x1], 0 }
   0x8   :  { %16 = vsyncpa [#allocation16], 0 }
   0x9   :  { %17 = vsyncpa [#allocation11], 0 }
   0xa   :  { %19 = vsyncpa [#allocation11 + $0x1], 0  ;;  %s9721_s23 = smov 0   ;;  %s9723_s24 = smov 0  }
   0xb   :  { %s9725_s25 = smov 0   ;;  %s9727_s26 = smov 0  }
   0xc   :  { %s9729_s27 = smov 0   ;;  %s9731_s28 = smov 0  }
   0xd   :  { %s9733_s29 = smov 0   ;;  %s9735_s5 = smov 0  }
   0xe   :  { %s9737_s30 = smov 0   ;;  %s9739_s7 = smov 0  }
   0xf   :  { %s9741_s8 = smov 0  }
  0x10 LB: > { %12536 = sst [smem:[#allocation23_spill]] %s9621_s23  ;;  %s34_s9 = sadd.s32 1, %s9653_s30  ;;  %s9661_s8 = sphi %s9741_s8, %s25_s8   ;;  %s9657_s7 = sphi %s9739_s7, %s12634_s7   ;;  %s9653_s30 = sphi %s9737_s30, %s12633_s30   ;;  %s9649_s5 = sphi %s9735_s5, %s12632_s5   ;;  %s9645_s29 = sphi %s9733_s29, %s12631_s29   ;;  %s9641_s28 = sphi %s9731_s28, %s12624_s28   ;;  %s9637_s27 = sphi %s9729_s27, %s12630_s27   ;;  %s9633_s26 = sphi %s9727_s26, %s12629_s26   ;;  %s9629_s25 = sphi %s9725_s25, %s12622_s25   ;;  %s9625_s24 = sphi %s9723_s24, %s12628_s24   ;;  %s9621_s23 = sphi %s9721_s23, %s12627_s23  }
  0x11   : > { %12537 = sst [smem:[#allocation24_spill]] %s9629_s25  ;;  %s37_s10 = sadd.s32 1, %s9657_s7 }
  0x12   : > { %12538 = sst [smem:[#allocation25_spill]] %s9641_s28  ;;  %p35_p0 = scmp.ge.s32.totalorder %s34_s9, 2 }
  0x13   : > { %12539 = sst [smem:[#allocation26_spill]] %s9649_s5  ;;  %s65_s11 = sadd.s32 1, %s9641_s28 }
  0x14   : > { %p72_p1 = scmp.ne.s32.totalorder %s9641_s28, %s9637_s27  ;;  %p73_p2 = scmp.eq.s32.totalorder %s9661_s8, 0 }
  0x15   : > { %s12636_s9 = smov (%p35_p0, %s34_s9), 0  ;;  %s12638_s10 = smov (!%p35_p0, %s37_s10), %s9657_s7 }
  0x16   : > { %12540 = sst [smem:[#allocation27_spill]] %s12636_s9  ;;  %p9787_p3 = por %p73_p2, %p72_p1 }
  0x17   : > { %s89_s13 = ssub.s32 %s9653_s30, %s12636_s9  ;;  %p39_p4 = scmp.ge.s32.totalorder %s12638_s10, 2 }
  0x18   : > { %p12509_p5 = scmp.lt.s32.totalorder %s9661_s8, 4  ;;  %s253_s14 = sand.u32 1, %s9661_s8  }
  0x19   : > { %s12640_s10 = smov (%p39_p4, %s12638_s10), 0  ;;  %s255_s15 = sand.u32 1, %s9641_s28  }
  0x1a   : > { %12542 = sst [smem:[#allocation28_spill]] %s12640_s10  ;;  %s62_s16 = ssub.s32 %s9657_s7, %s12640_s10 }
  0x1b   : > { %s8458_s17 = sshll.u32 %s255_s15, 5  ;;  %p63_p6 = scmp.eq.s32.totalorder %s62_s16, 0 }
  0x1c   : > { %s9800_s18 = sor.u32 %s89_s13, %s62_s16  ;;  %s8623_s20 = sshll.u32 %s9657_s7, 9 }
  0x1d   : > { %p91_p7 = scmp.eq.s32.totalorder %s9800_s18, 0  ;;  %s257_s21 = scalar_lea.vmem [#allocation12], %s8458_s17 }
  0x1e   : > { %s9804_s19 = scalar_select %p63_p6, %s9641_s28, %s65_s11  }
  0x1f   : > { %s264_s22 = sshll.u32 %s257_s21, 4  ;;  %s12544_s1 = sld [smem:[#allocation45_spill]]  ;;  %s265_s22 = int_to_ptr.vmem [resolvable:$true] %s264_s22 }
  0x20   : > { %12543 = sst [smem:[#allocation29_spill]] %s9804_s19  ;;  %p9814_p8 = pnand %p12509_p5, %p9787_p3 }
  0x21   : > { %s9818_s13 = scalar_lea.sflag [#allocation13], %s253_s14  ;;  %s9434_s11 = scalar_lea.vmem %s265_s22, 512 }
  0x22   : > { %p9423_p9 = pneg %p9814_p8  ;;  %p9435_p10 = scmp.ne.s32.totalorder %s265_s22, %s9434_s11 }
  0x23   : > { %s9663_s15 = smov [#allocation12]  }
  0x24   : > { %p9437_p11 = pnand %p9435_p10, %p9423_p9  ;;  %s9439_s16 = sshll.u32 %s9663_s15, 4  ;;  %s9440_s16 = int_to_ptr.vmem [resolvable:$false] %s9439_s16 }
  0x25   : > { %s263_s5 = scalar_lea.hbm %s12544_s1, %s8623_s20  ;;  %s9441_s6 = scalar_lea.vmem %s9440_s16, 1024 }
  0x26   : > { %p9438_p12 = pneg %p9437_p11  ;;  %p9442_p13 = scmp.lt.s32.totalorder %s265_s22, %s9440_s16 }
  0x27   : > { %p9443_p0 = scmp.lt.s32.totalorder %s9441_s6, %s9434_s11 }
  0x29   : > { %p9444_p1 = por %p9443_p0, %p9442_p13 }
  0x2b   : > { %p9445_p3 = pnand %p9444_p1, %p9438_p12 }
  0x2d   : > { %9448 = shalt.err (!%p9445_p3)
}
  0x2e   : > { %s12513_s9 = smov 256   ;;  %s9665_s12 = smov 16  }
  0x2f   : > { %9235 = dma.hbm_to_vmem [thread:$0]  (!%p9814_p8), %s263_s5, 512, %s265_s22, %s9818_s13, %s12513_s9, %s12513_s9, %s9665_s12  }
  0x30   : > { %s9828_s14 = sadd.s32 4294967295, %s9661_s8   ;;  %s8453_s17 = sadd.s32 4294967294, %s9661_s8  }
  0x31   : > { %p78_p4 = scmp.ne.s32.totalorder %s9637_s27, %s9633_s26  ;;  %p12511_p6 = scmp.eq.s32.totalorder %s9828_s14, 0 }
  0x32   : > { %s93_s20 = sadd.s32 1, %s9629_s25  ;;  %p100_p9 = scmp.ne.s32.totalorder %s9629_s25, %s9625_s24 }
  0x33   : > { %p9839_p10 = por %p12511_p6, %p78_p4  ;;  %p106_p11 = scmp.ne.s32.totalorder %s9625_s24, %s9621_s23 }
  0x34   : > { %s9848_s5 = scalar_select %p91_p7, %s9629_s25, %s93_s20  }
  0x35   : > { %p9852_p8 = por %p100_p9, %p73_p2  ;;  %p9858_p12 = por %p106_p11, %p12511_p6 }
  0x36   : > { %12547 = sst [smem:[#allocation30_spill]] %s9848_s5  ;;  %p195_p13 = scmp.eq.s32.totalorder %s9828_s14, 3 }
  0x37   : > { %s12549_s26 = scalar_select %p9858_p12, 1, 0 }
  0x38   : > { %p201_p0 = scmp.eq.s32.totalorder %s8453_s17, 3  ;;  %p8454_p1 = scmp.ge.s32.totalorder %s9661_s8, 1 }
  0x39   : > { %p208_p3 = scmp.lt.s32.totalorder %s9661_s8, 5  ;;  %p9865_p4 = por %p195_p13, %p100_p9 }
  0x3a   : > { %p9869_p7 = por %p201_p0, %p106_p11  ;;  %s9666_s15 = smov [#allocation9]  }
  0x3b   : > { %s12550_s18 = scalar_select %p9865_p4, 1, 0 }
  0x3c   : > { %s12551_s22 = scalar_select %p9869_p7, 1, 0 }
  0x3d   : > { %p9873_p2 = pnand %p8454_p1, %p208_p3  ;;  %s220_s16 = sshll.u32 %s9666_s15, 4  ;;  %s221_s16 = int_to_ptr.vmem [resolvable:$true] %s220_s16 }
  0x3e   : > { %12552 = sst [smem:[#allocation31_spill]] %s12551_s22  ;;  %p12555_p9 = scmp.lt.s32.totalorder %s9661_s8, 4 }
  0x3f   : > { %p9225_p5 = pneg %p9873_p2  ;;  %s276_s17 = sand.u32 1, %s9629_s25  }
  0x40   : > { %p9889_p11 = pnand %p12555_p9, %p9852_p8  ;;  %s9460_s20 = scalar_lea.vmem %s221_s16, 256 }
  0x41   : > { %p9881_p12 = pnand %p9225_p5, %p12511_p6  ;;  %p9461_p0 = scmp.ne.s32.totalorder %s221_s16, %s9460_s20 }
  0x42   : > { %p9468_p3 = scmp.lt.s32.totalorder %s221_s16, %s221_s16  ;;  %p9469_p6 = scmp.lt.s32.totalorder %s9460_s20, %s9460_s20 }
  0x43   : > { %p9451_p13 = pneg %p9881_p12 }
  0x44   : > { %p9470_p7 = por %p9469_p6, %p9468_p3 }
  0x45   : > { %p9463_p1 = pnand %p9461_p0, %p9451_p13 }
  0x47   : > { %p9464_p5 = pneg %p9463_p1 }
  0x49   : > { %p9471_p4 = pnand %p9470_p7, %p9464_p5 }
  0x4b   : > { %9474 = shalt.err (!%p9471_p4)
}
  0x4c   : > { %s9667_s10 = smov 128   ;;  %s9668_s15 = smov 8  }
  0x4d   : > { %s12557_s0 = sld [smem:[#allocation44_spill]]  ;;  %s9669_s19 = smov [#allocation15]  }
  0x4e   : > { %s233_s28 = sshll.u32 %s9669_s19, 4  ;;  %s8461_s5 = sshll.u32 %s276_s17, 4  ;;  %s234_s28 = int_to_ptr.vmem [resolvable:$true] %s233_s28 }
  0x4f   : > { %s9486_s20 = scalar_lea.vmem %s234_s28, 256  ;;  %p9494_p7 = scmp.lt.s32.totalorder %s234_s28, %s234_s28 }
  0x50   : > { %p9487_p6 = scmp.ne.s32.totalorder %s234_s28, %s9486_s20  ;;  %p9495_p9 = scmp.lt.s32.totalorder %s9486_s20, %s9486_s20 }
  0x52   : > { %p9489_p8 = pnand %p9487_p6, %p9451_p13  ;;  %p9496_p0 = por %p9495_p9, %p9494_p7 }
  0x53   : > { %9228 = dma.hbm_to_vmem [thread:$0]  (!%p9881_p12), %s12557_s0, 256, %s221_s16, [#allocation10], %s9667_s10, %s9667_s10, %s9668_s15  }
  0x54   : > { %p9490_p4 = pneg %p9489_p8 }
  0x56   : > { %p9497_p1 = pnand %p9496_p0, %p9490_p4 }
  0x58   : > { %9500 = shalt.err (!%p9497_p1)
}
  0x59   : > { %9231 = dma.hbm_to_vmem [thread:$0]  (!%p9881_p12), %s12502_s3, 256, %s234_s28, [#allocation16], %s9667_s10, %s9667_s10, %s9668_s15  }
  0x5a   : > { %s8462_s9 = sshll.u32 %s9657_s7, 2  ;;  %s278_s16 = scalar_lea.vmem [#allocation14], %s8461_s5 }
  0x5b   : > { %s286_s17 = sshll.u32 %s278_s16, 4  ;;  %s283_s0 = sadd.s32 %s9653_s30, %s8462_s9  ;;  %s287_s17 = int_to_ptr.vmem [resolvable:$true] %s286_s17 }
  0x5c   : > { %s8463_s20 = sshll.u32 %s283_s0, 7  ;;  %p9503_p13 = pneg %p9889_p11 }
  0x5d   : > { %s285_s6 = scalar_lea.hbm %s12501_s2, %s8463_s20  ;;  %s9514_s23 = scalar_lea.vmem %s287_s17, 256 }
  0x5e   : > { %p9515_p5 = scmp.ne.s32.totalorder %s287_s17, %s9514_s23  ;;  %s9670_s1 = smov [#allocation14]  }
  0x5f   : > { %s9519_s19 = sshll.u32 %s9670_s1, 4  ;;  %s9520_s19 = int_to_ptr.vmem [resolvable:$false] %s9519_s19 }
  0x60   : > { %p9517_p3 = pnand %p9515_p5, %p9503_p13  ;;  %s9521_s28 = scalar_lea.vmem %s9520_s19, 512 }
  0x61   : > { %p9522_p12 = scmp.lt.s32.totalorder %s287_s17, %s9520_s19  ;;  %p9523_p8 = scmp.lt.s32.totalorder %s9521_s28, %s9514_s23 }
  0x62   : > { %p9518_p6 = pneg %p9517_p3 }
  0x63   : > { %p9524_p4 = por %p9523_p8, %p9522_p12 }
  0x65   : > { %p9525_p7 = pnand %p9524_p4, %p9518_p6 }
  0x67   : > { %9528 = shalt.err (!%p9525_p7)
}
  0x68   : > { %s12558_s0 = smov 256   ;;  %298 = sbr.rel (%p9873_p2) target bundleno = 2469 (0x9a5), region = 44 }
  0x69   : > { %9238 = dma.hbm_to_vmem [thread:$0]  (!%p9889_p11), %s285_s6, 256, %s287_s17, %s9818_s13, %s12558_s0, %s9667_s10, %s9668_s15  }
  0x6d   : > { %p12559_p9 = scmp.eq.s32.totalorder %s9828_s14, 0 }
  0x6f   : > { %9600 = dma.done.wait (%p12559_p9), [#allocation10], 256   ;;  %p12560_p0 = pmov %p12559_p9 }
  0x70   : > { %s304_s23 = sand.u32 1, %s9828_s14   ;;  %s306_s25 = sand.u32 1, %s9637_s27  }
  0x71   : > { %9602 = vsyncadd (%p12560_p0), [#allocation10], 4294967040  ;;  %s8466_s5 = sshll.u32 %s306_s25, 5  ;;  %s305_s22 = scalar_lea.sflag [#allocation13], %s304_s23 }
  0x72   : > { %s308_s12 = scalar_lea.vmem [#allocation12], %s8466_s5 }
  0x73   : > { %9604 = dma.done.wait (%p9839_p10), %s305_s22, 512  }
  0x74   : > { %9606 = vsyncadd (%p9839_p10), %s305_s22, 4294966784  ;;  %s315_s13 = sand.u32 1, %s9625_s24   ;;  %p12561_p2 = scmp.ne.s32.totalorder %s12549_s26, 0 }
  0x75   : > { %s9946_s11 = sshll.u32 %s315_s13, 4 }
  0x76   : > { %s317_s10 = scalar_lea.vmem [#allocation14], %s9946_s11 }
  0x77   : > { %9608 = dma.done.wait (%p12561_p2), %s305_s22, 256  }
  0x78   : > { %9610 = vsyncadd (%p12561_p2), %s305_s22, 4294967040  ;;  %p12562_p11 = pmov %p12560_p0 }
  0x79   : > { %p12563_p1 = pmov %p12560_p0 }
  0x7a   : > { %9612 = dma.done.wait (%p12562_p11), [#allocation16], 256  }
  0x7b   : > { %9614 = vsyncadd (%p12563_p1), [#allocation16], 4294967040  ;;  %s9958_s21 = scalar_lea.vmem [#allocation17], %s9946_s11  ;;  %p8470_p10 = scmp.ne.s32.totalorder %s9645_s29, 0 }
  0x7d   : > { %358 = sbr.rel (%p8470_p10) target bundleno = 734 (0x2de), region = 64 }
  0x82   : > { %v360_v0 = vld [vmem:[%s308_s12 + $0x8] sm:$0xff]  ;;  %v359_v1 = vld [vmem:[%s308_s12] sm:$0xff]  ;;  %v362_v4 = vld [vmem:[%s308_s12 + $0x18] sm:$0xff]  ;;  %vm436_vm0 = vcmask 130048   ;;  %vm758_vm1 = vcmask 15360   ;;  %s9671_s15 = smov 126  }
  0x83   : > { %395 = vxpose.xlu1.b32.start [1/2] (short) %v360_v0, 128  ;;  %363 = vxpose.xlu0.b32.start [1/2] (short) %v359_v1, 128  ;;  %v428_v2 = vld [vmem:[#allocation15 + $0x8] sm:$0xff]  ;;  %v427_v3 = vld [vmem:[#allocation15] sm:$0xff]  ;;  %v361_v5 = vld [vmem:[%s308_s12 + $0x10] sm:$0xff]  ;;  %s9672_s9 = smov 124  }
  0x84   : > { %8819 = vmatprep.subr.mxu0 %v428_v2  ;;  %9207 = vmatprep.subr.mxu1 %v428_v2  ;;  %v9996_v38 = vld [vmem:[%s12503_s4] ss:$0 sm:$0xff] }
  0x85   : > { %8820 = vmatpush3.msra.mxu0 %v428_v2  ;;  %9209 = vmatpush3.msra.mxu1 %v428_v2 }
  0x86   : > { %8821 = vmatprep.subr.mxu0 %v427_v3  ;;  %9208 = vmatprep.subr.mxu1 %v427_v3 }
  0x87   : > { %396 = vxpose.xlu1.b32.end [2/2] (short) %v362_v4, 128  ;;  %364 = vxpose.xlu0.b32.end [2/2] (short) %v361_v5, 128  ;;  %v1084_v5 = vlaneseq }
  0x88   : > { %8822 = vmatpush3.msra.mxu0 %v427_v3  ;;  %9210 = vmatpush3.msra.mxu1 %v427_v3  ;;  %v9673_v3 = vmov 1983009808  }
  0x89   : > { %v1082_v4 = vunpack.c.l.s4 %v9673_v3 }
  0xff   : > { %v411_v6 = vpop.trf.xlu1  ;;  %v379_v7 = vpop.trf.xlu0 }
 0x100   : > { %8823 = vmatprep.mubr.msk.f32.mxu0 %vm436_vm0, %v379_v7  ;;  %8847 = vmatprep.mubr.msk.f32.mxu1 %vm436_vm0, %v411_v6 }
 0x103   : > { %v412_v8 = vpop.trf.xlu1  ;;  %v380_v9 = vpop.trf.xlu0 }
 0x104   : > { %8824 = vmatmul.mubr.msk.f32.vlgmr.msra.gmra.mxu0 %vm436_vm0, %v380_v9  ;;  %8848 = vmatmul.mubr.msk.f32.vlgmr.msra.gmra.mxu1 %vm436_vm0, %v412_v8 }
 0x107   : > { %v413_v10 = vpop.trf.xlu1  ;;  %v381_v11 = vpop.trf.xlu0 }
 0x108   : > { %8850 = vmatprep.mubr.msk.f32.mxu1 %vm436_vm0, %v413_v10  ;;  %8826 = vmatprep.mubr.msk.f32.mxu0 %vm436_vm0, %v381_v11  ;;  %v1083_v10 = vunpack.c.0.s8 %v1082_v4  ;;  %v1085_v11 = vshrl.u32 %v1084_v5, 7 }
 0x10b   : > { %v414_v12 = vpop.trf.xlu1  ;;  %v382_v13 = vpop.trf.xlu0 }
 0x10c   : > { %8827 = vmatmul.mubr.msk.f32.gmra.mxu0 %vm436_vm0, %v382_v13  ;;  %8851 = vmatmul.mubr.msk.f32.gmra.mxu1 %vm436_vm0, %v414_v12  ;;  %v9674_v12 = vmov 1934713408  }
 0x10d   : > { %v1146_v13 = vunpack.c.l.s4 %v9674_v12 }
 0x10f   : > { %v415_v14 = vpop.trf.xlu1  ;;  %v383_v15 = vpop.trf.xlu0 }
 0x110   : > { %8853 = vmatprep.mubr.msk.f32.mxu1 %vm436_vm0, %v415_v14  ;;  %8829 = vmatprep.mubr.msk.f32.mxu0 %vm436_vm0, %v383_v15 }
 0x113   : > { %v416_v16 = vpop.trf.xlu1  ;;  %v384_v17 = vpop.trf.xlu0 }
 0x114   : > { %8830 = vmatmul.mubr.msk.f32.gmra.mxu0 %vm436_vm0, %v384_v17  ;;  %8854 = vmatmul.mubr.msk.f32.gmra.mxu1 %vm436_vm0, %v416_v16  ;;  %v10110_v16 = vsub.s32 %v1083_v10, %v1085_v11 }
 0x117   : > { %v417_v18 = vpop.trf.xlu1  ;;  %v385_v19 = vpop.trf.xlu0 }
 0x118   : > { %8856 = vmatprep.mubr.msk.f32.mxu1 %vm436_vm0, %v417_v18  ;;  %8832 = vmatprep.mubr.msk.f32.mxu0 %vm436_vm0, %v385_v19  ;;  %v1147_v19 = vunpack.c.0.s8 %v1146_v13 }
 0x11b   : > { %v418_v20 = vpop.trf.xlu1  ;;  %v386_v21 = vpop.trf.xlu0 }
 0x11c   : > { %8833 = vmatmul.mubr.msk.f32.gmra.mxu0 %vm436_vm0, %v386_v21  ;;  %8857 = vmatmul.mubr.msk.f32.gmra.mxu1 %vm436_vm0, %v418_v20 }
 0x11f   : > { %v419_v22 = vpop.trf.xlu1  ;;  %v387_v23 = vpop.trf.xlu0 }
 0x120   : > { %8859 = vmatprep.mubr.msk.f32.mxu1 %vm436_vm0, %v419_v22  ;;  %8835 = vmatprep.mubr.msk.f32.mxu0 %vm436_vm0, %v387_v23 }
 0x123   : > { %v420_v24 = vpop.trf.xlu1  ;;  %v388_v25 = vpop.trf.xlu0 }
 0x124   : > { %8836 = vmatmul.mubr.msk.f32.gmra.mxu0 %vm436_vm0, %v388_v25  ;;  %8860 = vmatmul.mubr.msk.f32.gmra.mxu1 %vm436_vm0, %v420_v24 }
 0x127   : > { %v421_v26 = vpop.trf.xlu1  ;;  %v389_v27 = vpop.trf.xlu0 }
 0x128   : > { %8862 = vmatprep.mubr.msk.f32.mxu1 %vm436_vm0, %v421_v26  ;;  %8838 = vmatprep.mubr.msk.f32.mxu0 %vm436_vm0, %v389_v27 }
 0x12b   : > { %v422_v28 = vpop.trf.xlu1  ;;  %v390_v29 = vpop.trf.xlu0 }
 0x12c   : > { %8839 = vmatmul.mubr.msk.f32.gmra.mxu0 %vm436_vm0, %v390_v29  ;;  %8863 = vmatmul.mubr.msk.f32.gmra.mxu1 %vm436_vm0, %v422_v28 }
 0x12f   : > { %v423_v30 = vpop.trf.xlu1  ;;  %v391_v31 = vpop.trf.xlu0 }
 0x130   : > { %8865 = vmatprep.mubr.msk.f32.mxu1 %vm436_vm0, %v423_v30  ;;  %8841 = vmatprep.mubr.msk.f32.mxu0 %vm436_vm0, %v391_v31 }
 0x133   : > { %v424_v32 = vpop.trf.xlu1  ;;  %v392_v33 = vpop.trf.xlu0 }
 0x134   : > { %8842 = vmatmul.mubr.msk.f32.gmra.mxu0 %vm436_vm0, %v392_v33  ;;  %8866 = vmatmul.mubr.msk.f32.gmra.mxu1 %vm436_vm0, %v424_v32  ;;  %v10152_v32 = vsub.s32 %v1147_v19, %v1085_v11 }
 0x137   : > { %v425_v34 = vpop.trf.xlu1  ;;  %v393_v35 = vpop.trf.xlu0 }
 0x138   : > { %8868 = vmatprep.mubr.msk.f32.mxu1 %vm436_vm0, %v425_v34  ;;  %8844 = vmatprep.mubr.msk.f32.mxu0 %vm436_vm0, %v393_v35 }
 0x13b   : > { %v426_v36 = vpop.trf.xlu1  ;;  %v394_v37 = vpop.trf.xlu0 }
 0x13c   : > { %8845 = vmatmul.mubr.msk.f32.gmra.mxu0 %vm436_vm0, %v394_v37  ;;  %8869 = vmatmul.mubr.msk.f32.gmra.mxu1 %vm436_vm0, %v426_v36 }
 0x1c4   : > { %v8825_v39 = vpop.f32.mrf.mxu0  ;;  %v8849_v40 = vpop.f32.mrf.mxu1 }
 0x1c5   : > { %v9999_v41 = vadd.f32 %v8825_v39, %v9996_v38  ;;  %v10002_v42 = vadd.f32 %v8849_v40, %v9996_v38 }
 0x1c6   : > { %v599_v43 = vpop.f32.mrf.mxu0  ;;  %v679_v44 = vpop.f32.mrf.mxu1 }
 0x1c7   : > { %760 = vst.msk [vmem:[#allocation2 + $0x8] sm:$0xff] %vm758_vm1, %v9999_v41  ;;  %776 = vst.msk [vmem:[#allocation2 + $0x88] sm:$0xff] %vm758_vm1, %v10002_v42  ;;  %v10009_v45 = vadd.f32 %v9996_v38, %v599_v43  ;;  %v10012_v46 = vadd.f32 %v9996_v38, %v679_v44  ;;  %857 = vrot.lane.b32.xlu0 %v10002_v42, %s9671_s15  ;;  %825 = vrot.lane.b32.xlu1 %v9999_v41, %s9671_s15 }
 0x1c9   : > { %759 = vst.msk [vmem:[#allocation2] sm:$0xff] %vm758_vm1, %v10009_v45  ;;  %775 = vst.msk [vmem:[#allocation2 + $0x80] sm:$0xff] %vm758_vm1, %v10012_v46 }
 0x1cb   : > { %953 = vrot.lane.b32.xlu0 %v9999_v41, %s9672_s9  ;;  %855 = vrot.lane.b32.xlu1 %v10012_v46, %s9671_s15 }
 0x1cc   : > { %v8828_v47 = vpop.f32.mrf.mxu0  ;;  %v8852_v48 = vpop.f32.mrf.mxu1 }
 0x1cd   : > { %v10027_v49 = vadd.f32 %v8828_v47, %v9996_v38  ;;  %v10030_v50 = vadd.f32 %v8852_v48, %v9996_v38 }
 0x1ce   : > { %v609_v51 = vpop.f32.mrf.mxu0  ;;  %v689_v52 = vpop.f32.mrf.mxu1 }
 0x1cf   : > { %985 = vrot.lane.b32.xlu0 %v10002_v42, %s9672_s9  ;;  %951 = vrot.lane.b32.xlu1 %v10009_v45, %s9672_s9  ;;  %762 = vst.msk [vmem:[#allocation2 + $0x18] sm:$0xff] %vm758_vm1, %v10027_v49  ;;  %778 = vst.msk [vmem:[#allocation2 + $0x98] sm:$0xff] %vm758_vm1, %v10030_v50  ;;  %v10041_v53 = vadd.f32 %v9996_v38, %v609_v51  ;;  %v10044_v54 = vadd.f32 %v9996_v38, %v689_v52 }
 0x1d1   : > { %761 = vst.msk [vmem:[#allocation2 + $0x10] sm:$0xff] %vm758_vm1, %v10041_v53  ;;  %777 = vst.msk [vmem:[#allocation2 + $0x90] sm:$0xff] %vm758_vm1, %v10044_v54 }
 0x1d3   : > { %983 = vrot.lane.b32.xlu1 %v10012_v46, %s9672_s9  ;;  %823 = vrot.lane.b32.xlu0 %v10009_v45, %s9671_s15 }
 0x1d4   : > { %v8831_v55 = vpop.f32.mrf.mxu0  ;;  %v8855_v56 = vpop.f32.mrf.mxu1 }
 0x1d5   : > { %v10055_v57 = vadd.f32 %v8831_v55, %v9996_v38  ;;  %v10058_v58 = vadd.f32 %v8855_v56, %v9996_v38 }
 0x1d6   : > { %v619_v59 = vpop.f32.mrf.mxu0  ;;  %v699_v60 = vpop.f32.mrf.mxu1 }
 0x1d7   : > { %764 = vst.msk [vmem:[#allocation2 + $0x28] sm:$0xff] %vm758_vm1, %v10055_v57  ;;  %780 = vst.msk [vmem:[#allocation2 + $0xa8] sm:$0xff] %vm758_vm1, %v10058_v58  ;;  %861 = vrot.lane.b32.xlu0 %v10030_v50, %s9671_s15  ;;  %v10067_v61 = vadd.f32 %v9996_v38, %v619_v59  ;;  %v10070_v62 = vadd.f32 %v9996_v38, %v699_v60  ;;  %829 = vrot.lane.b32.xlu1 %v10027_v49, %s9671_s15 }
 0x1d8   : > { %v1351_v17 = vcombine.low %v9999_v41, %v10055_v57  ;;  %v1352_v18 = vcombine.high %v9999_v41, %v10055_v57  ;;  %v1487_v28 = vcombine.low %v10002_v42, %v10058_v58  ;;  %v1488_v29 = vcombine.high %v10002_v42, %v10058_v58 }
 0x1d9   : > { %763 = vst.msk [vmem:[#allocation2 + $0x20] sm:$0xff] %vm758_vm1, %v10067_v61  ;;  %779 = vst.msk [vmem:[#allocation2 + $0xa0] sm:$0xff] %vm758_vm1, %v10070_v62  ;;  %v1079_v35 = vcombine.low %v10009_v45, %v10067_v61  ;;  %v1080_v40 = vcombine.high %v10009_v45, %v10067_v61  ;;  %v1215_v45 = vcombine.low %v10012_v46, %v10070_v62 }
 0x1da   : > { %v1359_v33 = vrot.slane %v1351_v17, %v10110_v16  ;;  %v1366_v34 = vrot.slane %v1352_v18, %v10110_v16  ;;  %v1495_v44 = vrot.slane %v1487_v28, %v10110_v16  ;;  %v1502_v47 = vrot.slane %v1488_v29, %v10110_v16 }
 0x1db   : > { %957 = vrot.lane.b32.xlu0 %v10027_v49, %s9672_s9  ;;  %827 = vrot.lane.b32.xlu1 %v10041_v53, %s9671_s15 }
 0x1dc   : > { %v8834_v63 = vpop.f32.mrf.mxu0  ;;  %v8858_v0 = vpop.f32.mrf.mxu1 }
 0x1dd   : > { %v10083_v1 = vadd.f32 %v8834_v63, %v9996_v38  ;;  %v10086_v2 = vadd.f32 %v8858_v0, %v9996_v38  ;;  %v1087_v63 = vrot.slane %v1079_v35, %v10110_v16  ;;  %v1094_v0 = vrot.slane %v1080_v40, %v10110_v16 }
 0x1de   : > { %v629_v6 = vpop.f32.mrf.mxu0  ;;  %v709_v7 = vpop.f32.mrf.mxu1 }
 0x1df   : > { %766 = vst.msk [vmem:[#allocation2 + $0x38] sm:$0xff] %vm758_vm1, %v10083_v1  ;;  %782 = vst.msk [vmem:[#allocation2 + $0xb8] sm:$0xff] %vm758_vm1, %v10086_v2  ;;  %989 = vrot.lane.b32.xlu0 %v10030_v50, %s9672_s9  ;;  %v10095_v8 = vadd.f32 %v9996_v38, %v629_v6  ;;  %v10098_v9 = vadd.f32 %v9996_v38, %v709_v7  ;;  %859 = vrot.lane.b32.xlu1 %v10044_v54, %s9671_s15 }
 0x1e0   : > { %v1367_v20 = vcombine.low %v10027_v49, %v10083_v1  ;;  %v1368_v27 = vcombine.high %v10027_v49, %v10083_v1  ;;  %v1503_v30 = vcombine.low %v10030_v50, %v10086_v2  ;;  %v1504_v31 = vcombine.high %v10030_v50, %v10086_v2 }
 0x1e1   : > { %765 = vst.msk [vmem:[#allocation2 + $0x30] sm:$0xff] %vm758_vm1, %v10095_v8  ;;  %781 = vst.msk [vmem:[#allocation2 + $0xb0] sm:$0xff] %vm758_vm1, %v10098_v9  ;;  %v1095_v52 = vcombine.low %v10041_v53, %v10095_v8  ;;  %v1231_v4 = vcombine.low %v10044_v54, %v10098_v9  ;;  %v10207_v7 = vrot.slane %v1215_v45, %v10110_v16 }
 0x1e2   : > { %v1375_v36 = vrot.slane %v1367_v20, %v10110_v16  ;;  %v1382_v41 = vrot.slane %v1368_v27, %v10110_v16  ;;  %v1511_v48 = vrot.slane %v1503_v30, %v10110_v16  ;;  %v1518_v49 = vrot.slane %v1504_v31, %v10110_v16 }
 0x1e3   : > { %833 = vrot.lane.b32.xlu0 %v10055_v57, %s9671_s15  ;;  %955 = vrot.lane.b32.xlu1 %v10041_v53, %s9672_s9  ;;  %v1103_v11 = vrot.slane %v1095_v52, %v10110_v16  ;;  %v1232_v12 = vcombine.high %v10044_v54, %v10098_v9  ;;  %v10230_v20 = vrot.slane %v1231_v4, %v10110_v16 }
 0x1e4   : > { %v8837_v14 = vpop.f32.mrf.mxu0  ;;  %v8861_v15 = vpop.f32.mrf.mxu1  ;;  %v1415_v59 = vcombine.low %v1359_v33, %v1375_v36  ;;  %v1416_v60 = vcombine.high %v1359_v33, %v1375_v36  ;;  %v1431_v3 = vcombine.low %v1366_v34, %v1382_v41  ;;  %v1551_v5 = vcombine.low %v1495_v44, %v1511_v48 }
 0x1e5   : > { %v10123_v23 = vadd.f32 %v8837_v14, %v9996_v38  ;;  %v10126_v24 = vadd.f32 %v8861_v15, %v9996_v38  ;;  %v1567_v6 = vcombine.low %v1502_v47, %v1518_v49  ;;  %v1568_v10 = vcombine.high %v1502_v47, %v1518_v49 }
 0x1e6   : > { %v639_v21 = vpop.f32.mrf.mxu0  ;;  %v719_v22 = vpop.f32.mrf.mxu1  ;;  %v10218_v14 = vrot.slane %v1415_v59, %v10152_v32  ;;  %v10221_v15 = vrot.slane %v1416_v60, %v10152_v32  ;;  %v10242_v28 = vrot.slane %v1551_v5, %v10152_v32  ;;  %v1143_v31 = vcombine.low %v1087_v63, %v1103_v11 }
 0x1e7   : > { %865 = vrot.lane.b32.xlu0 %v10058_v58, %s9671_s15  ;;  %987 = vrot.lane.b32.xlu1 %v10044_v54, %s9672_s9  ;;  %v10129_v25 = vadd.f32 %v9996_v38, %v639_v21  ;;  %v10132_v26 = vadd.f32 %v9996_v38, %v719_v22  ;;  %768 = vst.msk [vmem:[#allocation2 + $0x48] sm:$0xff] %vm758_vm1, %v10123_v23  ;;  %784 = vst.msk [vmem:[#allocation2 + $0xc8] sm:$0xff] %vm758_vm1, %v10126_v24 }
 0x1e8   : > { %v10227_v54 = vrot.slane %v1431_v3, %v10152_v32  ;;  %v10248_v29 = vrot.slane %v1567_v6, %v10152_v32  ;;  %v10251_v30 = vrot.slane %v1568_v10, %v10152_v32  ;;  %v1144_v33 = vcombine.high %v1087_v63, %v1103_v11 }
 0x1e9   : > { %767 = vst.msk [vmem:[#allocation2 + $0x40] sm:$0xff] %vm758_vm1, %v10129_v25  ;;  %783 = vst.msk [vmem:[#allocation2 + $0xc0] sm:$0xff] %vm758_vm1, %v10132_v26  ;;  %v10291_v52 = vrot.slane %v1143_v31, %v10152_v32 }
 0x1eb   : > { %961 = vrot.lane.b32.xlu0 %v10055_v57, %s9672_s9  ;;  %831 = vrot.lane.b32.xlu1 %v10067_v61, %s9671_s15  ;;  %v1216_v57 = vcombine.high %v10012_v46, %v10070_v62  ;;  %v1432_v46 = vcombine.high %v1366_v34, %v1382_v41  ;;  %v10254_v34 = vrot.slane %v1232_v12, %v10110_v16 }
 0x1ec   : > { %v8840_v37 = vpop.f32.mrf.mxu0  ;;  %v8864_v39 = vpop.f32.mrf.mxu1 }
 0x1ed   : > { %v10167_v42 = vadd.f32 %v8840_v37, %v9996_v38  ;;  %v10170_v43 = vadd.f32 %v8864_v39, %v9996_v38  ;;  %v10215_v13 = vrot.slane %v1216_v57, %v10110_v16  ;;  %v10239_v27 = vrot.slane %v1432_v46, %v10152_v32 }
 0x1ee   : > { %v649_v50 = vpop.f32.mrf.mxu0  ;;  %v729_v51 = vpop.f32.mrf.mxu1  ;;  %v10294_v57 = vrot.slane %v1144_v33, %v10152_v32 }
 0x1ef   : > { %993 = vrot.lane.b32.xlu0 %v10058_v58, %s9672_s9  ;;  %770 = vst.msk [vmem:[#allocation2 + $0x58] sm:$0xff] %vm758_vm1, %v10167_v42  ;;  %786 = vst.msk [vmem:[#allocation2 + $0xd8] sm:$0xff] %vm758_vm1, %v10170_v43  ;;  %v10187_v55 = vadd.f32 %v9996_v38, %v649_v50  ;;  %v10190_v56 = vadd.f32 %v9996_v38, %v729_v51  ;;  %v1096_v58 = vcombine.high %v10041_v53, %v10095_v8 }
 0x1f0   : > { %863 = vrot.lane.b32.xlu1 %v10070_v62, %s9671_s15  ;;  %v1552_v53 = vcombine.high %v1495_v44, %v1511_v48  ;;  %v1279_v44 = vcombine.low %v10207_v7, %v10230_v20 }
 0x1f1   : > { %769 = vst.msk [vmem:[#allocation2 + $0x50] sm:$0xff] %vm758_vm1, %v10187_v55  ;;  %785 = vst.msk [vmem:[#allocation2 + $0xd0] sm:$0xff] %vm758_vm1, %v10190_v56  ;;  %v1110_v17 = vrot.slane %v1096_v58, %v10110_v16 }
 0x1f3   : > { %837 = vrot.lane.b32.xlu0 %v10083_v1, %s9671_s15  ;;  %v1159_v37 = vcombine.low %v1094_v0, %v1110_v17  ;;  %v1160_v39 = vcombine.high %v1094_v0, %v1110_v17 }
 0x1f4   : > { %959 = vrot.lane.b32.xlu1 %v10067_v61, %s9672_s9  ;;  %v8843_v18 = vpop.f32.mrf.mxu0  ;;  %v8867_v19 = vpop.f32.mrf.mxu1  ;;  %v10245_v61 = vrot.slane %v1552_v53, %v10152_v32 }
 0x1f5   : > { %v10233_v21 = vadd.f32 %v8843_v18, %v9996_v38  ;;  %v10236_v22 = vadd.f32 %v8867_v19, %v9996_v38  ;;  %v10303_v58 = vrot.slane %v1159_v37, %v10152_v32  ;;  %v10306_v63 = vrot.slane %v1160_v39, %v10152_v32 }
 0x1f6   : > { %v659_v35 = vpop.f32.mrf.mxu0  ;;  %v739_v36 = vpop.f32.mrf.mxu1 }
 0x1f7   : > { %869 = vrot.lane.b32.xlu0 %v10086_v2, %s9671_s15  ;;  %772 = vst.msk [vmem:[#allocation2 + $0x68] sm:$0xff] %vm758_vm1, %v10233_v21  ;;  %788 = vst.msk [vmem:[#allocation2 + $0xe8] sm:$0xff] %vm758_vm1, %v10236_v22  ;;  %v10265_v40 = vadd.f32 %v9996_v38, %v659_v35  ;;  %v10268_v41 = vadd.f32 %v9996_v38, %v739_v36  ;;  %v1383_v48 = vcombine.low %v10123_v23, %v10233_v21 }
 0x1f8   : > { %991 = vrot.lane.b32.xlu1 %v10070_v62, %s9672_s9  ;;  %v1384_v49 = vcombine.high %v10123_v23, %v10233_v21  ;;  %v1519_v62 = vcombine.low %v10126_v24, %v10236_v22  ;;  %v1520_v50 = vcombine.high %v10126_v24, %v10236_v22 }
 0x1f9   : > { %771 = vst.msk [vmem:[#allocation2 + $0x60] sm:$0xff] %vm758_vm1, %v10265_v40  ;;  %v1111_v51 = vcombine.low %v10129_v25, %v10265_v40  ;;  %v1112_v45 = vcombine.high %v10129_v25, %v10265_v40  ;;  %787 = vst.msk [vmem:[#allocation2 + $0xe0] sm:$0xff] %vm758_vm1, %v10268_v41  ;;  %v1247_v0 = vcombine.low %v10132_v26, %v10268_v41 }
 0x1fa   : > { %v1248_v3 = vcombine.high %v10132_v26, %v10268_v41  ;;  %v1391_v5 = vrot.slane %v1383_v48, %v10110_v16  ;;  %v1527_v10 = vrot.slane %v1519_v62, %v10110_v16  ;;  %v1534_v11 = vrot.slane %v1520_v50, %v10110_v16 }
 0x1fb   : > { %965 = vrot.lane.b32.xlu0 %v10083_v1, %s9672_s9  ;;  %v1398_v1 = vrot.slane %v1384_v49, %v10110_v16  ;;  %v10325_v12 = vrot.slane %v1111_v51, %v10110_v16  ;;  %v10328_v17 = vrot.slane %v1112_v45, %v10110_v16  ;;  %v10345_v37 = vrot.slane %v1247_v0, %v10110_v16 }
 0x1fc   : > { %835 = vrot.lane.b32.xlu1 %v10095_v8, %s9671_s15  ;;  %v8846_v4 = vpop.f32.mrf.mxu0  ;;  %v8870_v46 = vpop.f32.mrf.mxu1  ;;  %v10348_v39 = vrot.slane %v1248_v3, %v10110_v16 }
 0x1fd   : > { %v10317_v53 = vadd.f32 %v8846_v4, %v9996_v38  ;;  %v10320_v6 = vadd.f32 %v8870_v46, %v9996_v38 }
 0x1fe   : > { %v669_v18 = vpop.f32.mrf.mxu0  ;;  %v749_v19 = vpop.f32.mrf.mxu1 }
 0x1ff   : > { %774 = vst.msk [vmem:[#allocation2 + $0x78] sm:$0xff] %vm758_vm1, %v10317_v53  ;;  %v1399_v31 = vcombine.low %v10167_v42, %v10317_v53  ;;  %v1400_v33 = vcombine.high %v10167_v42, %v10317_v53  ;;  %790 = vst.msk [vmem:[#allocation2 + $0xf8] sm:$0xff] %vm758_vm1, %v10320_v6  ;;  %v1535_v35 = vcombine.low %v10170_v43, %v10320_v6  ;;  %997 = vrot.lane.b32.xlu0 %v10086_v2, %s9672_s9 }
 0x200   : > { %v1536_v36 = vcombine.high %v10170_v43, %v10320_v6  ;;  %v10351_v48 = vadd.f32 %v9996_v38, %v669_v18  ;;  %v10354_v49 = vadd.f32 %v9996_v38, %v749_v19  ;;  %867 = vrot.lane.b32.xlu1 %v10098_v9, %s9671_s15 }
 0x201   : > { %v1407_v62 = vrot.slane %v1399_v31, %v10110_v16  ;;  %v1414_v50 = vrot.slane %v1400_v33, %v10110_v16  ;;  %v1543_v2 = vrot.slane %v1535_v35, %v10110_v16 }
 0x202   : > { %v1550_v51 = vrot.slane %v1536_v36, %v10110_v16  ;;  %773 = vst.msk [vmem:[#allocation2 + $0x70] sm:$0xff] %vm758_vm1, %v10351_v48  ;;  %v1127_v45 = vcombine.low %v10187_v55, %v10351_v48  ;;  %v1128_v38 = vcombine.high %v10187_v55, %v10351_v48  ;;  %789 = vst.msk [vmem:[#allocation2 + $0xf0] sm:$0xff] %vm758_vm1, %v10354_v49 }
 0x203   : > { %v1263_v0 = vcombine.low %v10190_v56, %v10354_v49  ;;  %v1264_v3 = vcombine.high %v10190_v56, %v10354_v49  ;;  %v1447_v4 = vcombine.low %v1391_v5, %v1407_v62  ;;  %v1448_v46 = vcombine.high %v1391_v5, %v1407_v62  ;;  %841 = vrot.lane.b32.xlu0 %v10123_v23, %s9671_s15 }
 0x204   : > { %v1463_v18 = vcombine.low %v1398_v1, %v1414_v50  ;;  %v1464_v19 = vcombine.high %v1398_v1, %v1414_v50  ;;  %v1583_v31 = vcombine.low %v1527_v10, %v1543_v2  ;;  %v1584_v33 = vcombine.high %v1527_v10, %v1543_v2  ;;  %963 = vrot.lane.b32.xlu1 %v10095_v8, %s9672_s9 }
 0x205   : > { %v1599_v35 = vcombine.low %v1534_v11, %v1550_v51  ;;  %v1600_v36 = vcombine.high %v1534_v11, %v1550_v51  ;;  %v1455_v60 = vrot.slane %v1447_v4, %v10152_v32  ;;  %v1462_v59 = vrot.slane %v1448_v46, %v10152_v32 }
 0x206   : > { %v1471_v47 = vrot.slane %v1463_v18, %v10152_v32  ;;  %v1478_v5 = vrot.slane %v1464_v19, %v10152_v32  ;;  %v1591_v1 = vrot.slane %v1583_v31, %v10152_v32  ;;  %v1598_v62 = vrot.slane %v1584_v33, %v10152_v32 }
 0x207   : > { %v1607_v50 = vrot.slane %v1599_v35, %v10152_v32  ;;  %v1614_v10 = vrot.slane %v1600_v36, %v10152_v32  ;;  %v1479_v11 = vcombine.low %v10218_v14, %v1455_v60  ;;  %v1480_v8 = vcombine.high %v10218_v14, %v1455_v60  ;;  %873 = vrot.lane.b32.xlu0 %v10126_v24, %s9671_s15 }
 0x208   : > { %v1481_v2 = vcombine.low %v10221_v15, %v1462_v59  ;;  %v1482_v51 = vcombine.high %v10221_v15, %v1462_v59  ;;  %v1483_v4 = vcombine.low %v10227_v54, %v1471_v47  ;;  %v1484_v46 = vcombine.high %v10227_v54, %v1471_v47  ;;  %995 = vrot.lane.b32.xlu1 %v10098_v9, %s9672_s9 }
 0x209   : > { %v1485_v18 = vcombine.low %v10239_v27, %v1478_v5  ;;  %v1486_v19 = vcombine.high %v10239_v27, %v1478_v5  ;;  %1639 = vst.msk [vmem:[#allocation5 + $0x80] sm:$0xff] %vm758_vm1, %v1479_v11  ;;  %1641 = vst.msk [vmem:[#allocation5 + $0x90] sm:$0xff] %vm758_vm1, %v1480_v8  ;;  %v1615_v14 = vcombine.low %v10242_v28, %v1591_v1 }
 0x20a   : > { %1643 = vst.msk [vmem:[#allocation5 + $0xa0] sm:$0xff] %vm758_vm1, %v1481_v2  ;;  %1645 = vst.msk [vmem:[#allocation5 + $0xb0] sm:$0xff] %vm758_vm1, %v1482_v51  ;;  %v1616_v15 = vcombine.high %v10242_v28, %v1591_v1  ;;  %v1617_v54 = vcombine.low %v10245_v61, %v1598_v62  ;;  %v1618_v47 = vcombine.high %v10245_v61, %v1598_v62 }
 0x20b   : > { %1647 = vst.msk [vmem:[#allocation5 + $0xc0] sm:$0xff] %vm758_vm1, %v1483_v4  ;;  %1649 = vst.msk [vmem:[#allocation5 + $0xd0] sm:$0xff] %vm758_vm1, %v1484_v46  ;;  %v1619_v9 = vcombine.low %v10248_v29, %v1607_v50  ;;  %v1620_v27 = vcombine.high %v10248_v29, %v1607_v50  ;;  %v1621_v59 = vcombine.low %v10251_v30, %v1614_v10  ;;  %969 = vrot.lane.b32.xlu0 %v10123_v23, %s9672_s9 }
 0x20c   : > { %1651 = vst.msk [vmem:[#allocation5 + $0xe0] sm:$0xff] %vm758_vm1, %v1485_v18  ;;  %1653 = vst.msk [vmem:[#allocation5 + $0xf0] sm:$0xff] %vm758_vm1, %v1486_v19  ;;  %v1622_v28 = vcombine.high %v10251_v30, %v1614_v10  ;;  %v1135_v61 = vrot.slane %v1127_v45, %v10110_v16  ;;  %v1142_v60 = vrot.slane %v1128_v38, %v10110_v16  ;;  %839 = vrot.lane.b32.xlu1 %v10129_v25, %s9671_s15 }
 0x20d   : > { %1640 = vst.msk [vmem:[#allocation5 + $0x88] sm:$0xff] %vm758_vm1, %v1615_v14  ;;  %1642 = vst.msk [vmem:[#allocation5 + $0x98] sm:$0xff] %vm758_vm1, %v1616_v15  ;;  %v1271_v31 = vrot.slane %v1263_v0, %v10110_v16  ;;  %v1278_v29 = vrot.slane %v1264_v3, %v10110_v16  ;;  %v1287_v30 = vrot.slane %v1279_v44, %v10152_v32 }
 0x20e   : > { %1644 = vst.msk [vmem:[#allocation5 + $0xa8] sm:$0xff] %vm758_vm1, %v1617_v54  ;;  %1646 = vst.msk [vmem:[#allocation5 + $0xb8] sm:$0xff] %vm758_vm1, %v1618_v47  ;;  %v12564_v33 = vcombine.high %v10207_v7, %v10230_v20  ;;  %v12565_v45 = vcombine.low %v10215_v13, %v10254_v34  ;;  %v12566_v0 = vcombine.high %v10215_v13, %v10254_v34 }
 0x20f   : > { %1648 = vst.msk [vmem:[#allocation5 + $0xc8] sm:$0xff] %vm758_vm1, %v1619_v9  ;;  %1650 = vst.msk [vmem:[#allocation5 + $0xd8] sm:$0xff] %vm758_vm1, %v1620_v27  ;;  %v1175_v7 = vcombine.low %v10325_v12, %v1135_v61  ;;  %v1176_v20 = vcombine.high %v10325_v12, %v1135_v61  ;;  %v1191_v44 = vcombine.low %v10328_v17, %v1142_v60  ;;  %1001 = vrot.lane.b32.xlu0 %v10126_v24, %s9672_s9 }
 0x210   : > { %v1294_v35 = vrot.slane %v12564_v33, %v10152_v32  ;;  %v1303_v38 = vrot.slane %v12565_v45, %v10152_v32  ;;  %v1310_v23 = vrot.slane %v12566_v0, %v10152_v32  ;;  %1652 = vst.msk [vmem:[#allocation5 + $0xe8] sm:$0xff] %vm758_vm1, %v1621_v59  ;;  %1654 = vst.msk [vmem:[#allocation5 + $0xf8] sm:$0xff] %vm758_vm1, %v1622_v28  ;;  %871 = vrot.lane.b32.xlu1 %v10132_v26, %s9671_s15 }
 0x211   : > { %v1192_v13 = vcombine.high %v10328_v17, %v1142_v60  ;;  %v1311_v34 = vcombine.low %v10345_v37, %v1271_v31  ;;  %v1312_v3 = vcombine.high %v10345_v37, %v1271_v31  ;;  %v1327_v36 = vcombine.low %v10348_v39, %v1278_v29 }
 0x212   : > { %v1328_v5 = vcombine.high %v10348_v39, %v1278_v29  ;;  %v1183_v1 = vrot.slane %v1175_v7, %v10152_v32  ;;  %v1190_v62 = vrot.slane %v1176_v20, %v10152_v32  ;;  %v1199_v50 = vrot.slane %v1191_v44, %v10152_v32 }
 0x213   : > { %v1206_v12 = vrot.slane %v1192_v13, %v10152_v32  ;;  %v1319_v17 = vrot.slane %v1311_v34, %v10152_v32  ;;  %v1326_v10 = vrot.slane %v1312_v3, %v10152_v32  ;;  %v1335_v37 = vrot.slane %v1327_v36, %v10152_v32  ;;  %845 = vrot.lane.b32.xlu0 %v10167_v42, %s9671_s15 }
 0x214   : > { %v1342_v11 = vrot.slane %v1328_v5, %v10152_v32  ;;  %v1207_v39 = vcombine.low %v10291_v52, %v1183_v1  ;;  %v1208_v8 = vcombine.high %v10291_v52, %v1183_v1  ;;  %v1209_v2 = vcombine.low %v10294_v57, %v1190_v62  ;;  %967 = vrot.lane.b32.xlu1 %v10129_v25, %s9672_s9 }
 0x215   : > { %v1210_v51 = vcombine.high %v10294_v57, %v1190_v62  ;;  %v1211_v24 = vcombine.low %v10303_v58, %v1199_v50  ;;  %v1212_v4 = vcombine.high %v10303_v58, %v1199_v50  ;;  %v1213_v46 = vcombine.low %v10306_v63, %v1206_v12 }
 0x216   : > { %v1214_v18 = vcombine.high %v10306_v63, %v1206_v12  ;;  %1623 = vst.msk [vmem:[#allocation5] sm:$0xff] %vm758_vm1, %v1207_v39  ;;  %1625 = vst.msk [vmem:[#allocation5 + $0x10] sm:$0xff] %vm758_vm1, %v1208_v8  ;;  %v1343_v52 = vcombine.low %v1287_v30, %v1319_v17  ;;  %v1344_v19 = vcombine.high %v1287_v30, %v1319_v17 }
 0x217   : > { %1627 = vst.msk [vmem:[#allocation5 + $0x20] sm:$0xff] %vm758_vm1, %v1209_v2  ;;  %1629 = vst.msk [vmem:[#allocation5 + $0x30] sm:$0xff] %vm758_vm1, %v1210_v51  ;;  %v1345_v14 = vcombine.low %v1294_v35, %v1326_v10  ;;  %v1346_v57 = vcombine.high %v1294_v35, %v1326_v10  ;;  %v1347_v58 = vcombine.low %v1303_v38, %v1335_v37  ;;  %877 = vrot.lane.b32.xlu0 %v10170_v43, %s9671_s15 }
 0x218   : > { %1631 = vst.msk [vmem:[#allocation5 + $0x40] sm:$0xff] %vm758_vm1, %v1211_v24  ;;  %1633 = vst.msk [vmem:[#allocation5 + $0x50] sm:$0xff] %vm758_vm1, %v1212_v4  ;;  %v1348_v63 = vcombine.high %v1303_v38, %v1335_v37  ;;  %v1349_v15 = vcombine.low %v1310_v23, %v1342_v11  ;;  %v1350_v54 = vcombine.high %v1310_v23, %v1342_v11  ;;  %999 = vrot.lane.b32.xlu1 %v10132_v26, %s9672_s9 }
 0x219   : > { %1635 = vst.msk [vmem:[#allocation5 + $0x60] sm:$0xff] %vm758_vm1, %v1213_v46  ;;  %1637 = vst.msk [vmem:[#allocation5 + $0x70] sm:$0xff] %vm758_vm1, %v1214_v18 }
 0x21a   : > { %1624 = vst.msk [vmem:[#allocation5 + $0x8] sm:$0xff] %vm758_vm1, %v1343_v52  ;;  %1626 = vst.msk [vmem:[#allocation5 + $0x18] sm:$0xff] %vm758_vm1, %v1344_v19 }
 0x21b   : > { %1628 = vst.msk [vmem:[#allocation5 + $0x28] sm:$0xff] %vm758_vm1, %v1345_v14  ;;  %1630 = vst.msk [vmem:[#allocation5 + $0x38] sm:$0xff] %vm758_vm1, %v1346_v57  ;;  %973 = vrot.lane.b32.xlu0 %v10167_v42, %s9672_s9 }
 0x21c   : > { %1632 = vst.msk [vmem:[#allocation5 + $0x48] sm:$0xff] %vm758_vm1, %v1347_v58  ;;  %1634 = vst.msk [vmem:[#allocation5 + $0x58] sm:$0xff] %vm758_vm1, %v1348_v63  ;;  %843 = vrot.lane.b32.xlu1 %v10187_v55, %s9671_s15 }
 0x21d   : > { %1636 = vst.msk [vmem:[#allocation5 + $0x68] sm:$0xff] %vm758_vm1, %v1349_v15  ;;  %1638 = vst.msk [vmem:[#allocation5 + $0x78] sm:$0xff] %vm758_vm1, %v1350_v54 }
 0x21f   : > { %1005 = vrot.lane.b32.xlu0 %v10170_v43, %s9672_s9 }
 0x220   : > { %875 = vrot.lane.b32.xlu1 %v10190_v56, %s9671_s15 }
 0x223   : > { %849 = vrot.lane.b32.xlu0 %v10233_v21, %s9671_s15 }
 0x224   : > { %971 = vrot.lane.b32.xlu1 %v10187_v55, %s9672_s9 }
 0x227   : > { %881 = vrot.lane.b32.xlu0 %v10236_v22, %s9671_s15 }
 0x228   : > { %1003 = vrot.lane.b32.xlu1 %v10190_v56, %s9672_s9 }
 0x22b   : > { %977 = vrot.lane.b32.xlu0 %v10233_v21, %s9672_s9 }
 0x22c   : > { %847 = vrot.lane.b32.xlu1 %v10265_v40, %s9671_s15 }
 0x22f   : > { %1009 = vrot.lane.b32.xlu0 %v10236_v22, %s9672_s9 }
 0x230   : > { %879 = vrot.lane.b32.xlu1 %v10268_v41, %s9671_s15 }
 0x233   : > { %853 = vrot.lane.b32.xlu0 %v10317_v53, %s9671_s15 }
 0x234   : > { %975 = vrot.lane.b32.xlu1 %v10265_v40, %s9672_s9 }
 0x237   : > { %885 = vrot.lane.b32.xlu0 %v10320_v6, %s9671_s15 }
 0x238   : > { %1007 = vrot.lane.b32.xlu1 %v10268_v41, %s9672_s9 }
 0x239   : > { %v10530_v25 = vpop.permute.xlu1 %825  ;;  %v10532_v26 = vpop.permute.xlu0 %857 }
 0x23a   : > { %920 = vst.msk [vmem:[#allocation3 + $0x8] sm:$0xff] %vm758_vm1, %v10530_v25  ;;  %936 = vst.msk [vmem:[#allocation3 + $0x88] sm:$0xff] %vm758_vm1, %v10532_v26 }
 0x23b   : > { %981 = vrot.lane.b32.xlu0 %v10317_v53, %s9672_s9 }
 0x23c   : > { %851 = vrot.lane.b32.xlu1 %v10351_v48, %s9671_s15 }
 0x23d   : > { %v10542_v42 = vpop.permute.xlu1 %855  ;;  %v10544_v43 = vpop.permute.xlu0 %953 }
 0x23e   : > { %935 = vst.msk [vmem:[#allocation3 + $0x80] sm:$0xff] %vm758_vm1, %v10542_v42 }
 0x23f   : > { %1048 = vst.msk [vmem:[#allocation4 + $0x8] sm:$0xff] %vm436_vm0, %v10544_v43  ;;  %1013 = vrot.lane.b32.xlu0 %v10320_v6, %s9672_s9 }
 0x240   : > { %883 = vrot.lane.b32.xlu1 %v10354_v49, %s9671_s15 }
 0x241   : > { %v10554_v55 = vpop.permute.xlu1 %951  ;;  %v10556_v56 = vpop.permute.xlu0 %985 }
 0x242   : > { %1047 = vst.msk [vmem:[#allocation4] sm:$0xff] %vm436_vm0, %v10554_v55  ;;  %1064 = vst.msk [vmem:[#allocation4 + $0x88] sm:$0xff] %vm436_vm0, %v10556_v56 }
 0x244   : > { %979 = vrot.lane.b32.xlu1 %v10351_v48, %s9672_s9 }
 0x245   : > { %v10564_v21 = vpop.permute.xlu1 %983  ;;  %v10566_v22 = vpop.permute.xlu0 %823 }
 0x246   : > { %1063 = vst.msk [vmem:[#allocation4 + $0x80] sm:$0xff] %vm436_vm0, %v10564_v21 }
 0x247   : > { %919 = vst.msk [vmem:[#allocation3] sm:$0xff] %vm758_vm1, %v10566_v22 }
 0x248   : > { %1011 = vrot.lane.b32.xlu1 %v10354_v49, %s9672_s9 }
 0x249   : > { %v10574_v40 = vpop.permute.xlu0 %861  ;;  %v830_v41 = vpop.permute.xlu1 %829 }
 0x24a   : > { %938 = vst.msk [vmem:[#allocation3 + $0x98] sm:$0xff] %vm758_vm1, %v10574_v40  ;;  %922 = vst.msk [vmem:[#allocation3 + $0x18] sm:$0xff] %vm758_vm1, %v830_v41 }
 0x24d   : > { %v10579_v53 = vpop.permute.xlu0 %957  ;;  %v10581_v6 = vpop.permute.xlu1 %827 }
 0x24e   : > { %1050 = vst.msk [vmem:[#allocation4 + $0x18] sm:$0xff] %vm436_vm0, %v10579_v53 }
 0x24f   : > { %921 = vst.msk [vmem:[#allocation3 + $0x10] sm:$0xff] %vm758_vm1, %v10581_v6 }
 0x251   : > { %v10587_v48 = vpop.permute.xlu0 %989  ;;  %v10589_v49 = vpop.permute.xlu1 %859 }
 0x252   : > { %1066 = vst.msk [vmem:[#allocation4 + $0x98] sm:$0xff] %vm436_vm0, %v10587_v48 }
 0x253   : > { %937 = vst.msk [vmem:[#allocation3 + $0x90] sm:$0xff] %vm758_vm1, %v10589_v49 }
 0x255   : > { %v834_v47 = vpop.permute.xlu0 %833  ;;  %v10595_v9 = vpop.permute.xlu1 %955 }
 0x256   : > { %924 = vst.msk [vmem:[#allocation3 + $0x28] sm:$0xff] %vm758_vm1, %v834_v47  ;;  %v1927_v27 = vcombine.low %v10530_v25, %v834_v47  ;;  %v1928_v59 = vcombine.high %v10530_v25, %v834_v47 }
 0x257   : > { %1049 = vst.msk [vmem:[#allocation4 + $0x10] sm:$0xff] %vm436_vm0, %v10595_v9 }
 0x258   : > { %v10641_v50 = vrot.slane %v1927_v27, %v10110_v16  ;;  %v10644_v12 = vrot.slane %v1928_v59, %v10110_v16 }
 0x259   : > { %v866_v28 = vpop.permute.xlu0 %865  ;;  %v10602_v61 = vpop.permute.xlu1 %987 }
 0x25a   : > { %940 = vst.msk [vmem:[#allocation3 + $0xa8] sm:$0xff] %vm758_vm1, %v866_v28  ;;  %v2063_v60 = vcombine.low %v10532_v26, %v866_v28  ;;  %v2064_v31 = vcombine.high %v10532_v26, %v866_v28 }
 0x25b   : > { %1065 = vst.msk [vmem:[#allocation4 + $0x90] sm:$0xff] %vm436_vm0, %v10602_v61 }
 0x25c   : > { %v10672_v52 = vrot.slane %v2063_v60, %v10110_v16  ;;  %v10675_v19 = vrot.slane %v2064_v31, %v10110_v16 }
 0x25d   : > { %v962_v29 = vpop.permute.xlu0 %961  ;;  %v832_v30 = vpop.permute.xlu1 %831 }
 0x25e   : > { %1052 = vst.msk [vmem:[#allocation4 + $0x28] sm:$0xff] %vm436_vm0, %v962_v29  ;;  %v2503_v33 = vcombine.low %v10544_v43, %v962_v29  ;;  %v2504_v35 = vcombine.high %v10544_v43, %v962_v29  ;;  %v1655_v45 = vcombine.low %v10566_v22, %v832_v30  ;;  %v1656_v38 = vcombine.high %v10566_v22, %v832_v30 }
 0x25f   : > { %923 = vst.msk [vmem:[#allocation3 + $0x20] sm:$0xff] %vm758_vm1, %v832_v30 }
 0x260   : > { %v10684_v63 = vrot.slane %v2503_v33, %v10110_v16  ;;  %v10707_v59 = vrot.slane %v1655_v45, %v10110_v16  ;;  %v10710_v28 = vrot.slane %v1656_v38, %v10110_v16  ;;  %v10713_v60 = vrot.slane %v2504_v35, %v10110_v16 }
 0x261   : > { %v10615_v0 = vpop.permute.xlu0 %993 }
 0x262   : > { %v10617_v23 = vpop.permute.xlu1 %863  ;;  %1068 = vst.msk [vmem:[#allocation4 + $0xa8] sm:$0xff] %vm436_vm0, %v10615_v0  ;;  %v2639_v7 = vcombine.low %v10556_v56, %v10615_v0  ;;  %v2640_v20 = vcombine.high %v10556_v56, %v10615_v0 }
 0x263   : > { %939 = vst.msk [vmem:[#allocation3 + $0xa0] sm:$0xff] %vm758_vm1, %v10617_v23  ;;  %v1791_v44 = vcombine.low %v10542_v42, %v10617_v23  ;;  %v1792_v13 = vcombine.high %v10542_v42, %v10617_v23 }
 0x264   : > { %v10770_v42 = vrot.slane %v2639_v7, %v10110_v16  ;;  %v10776_v23 = vrot.slane %v2640_v20, %v10110_v16 }
 0x265   : > { %v838_v34 = vpop.permute.xlu0 %837 }
 0x266   : > { %v10631_v3 = vpop.permute.xlu1 %959  ;;  %926 = vst.msk [vmem:[#allocation3 + $0x38] sm:$0xff] %vm758_vm1, %v838_v34  ;;  %v1943_v36 = vcombine.low %v830_v41, %v838_v34  ;;  %v1944_v5 = vcombine.high %v830_v41, %v838_v34 }
 0x267   : > { %1051 = vst.msk [vmem:[#allocation4 + $0x20] sm:$0xff] %vm436_vm0, %v10631_v3  ;;  %v2231_v1 = vcombine.low %v10554_v55, %v10631_v3  ;;  %v2232_v62 = vcombine.high %v10554_v55, %v10631_v3 }
 0x268   : > { %v10647_v17 = vrot.slane %v1943_v36, %v10110_v16  ;;  %v10650_v10 = vrot.slane %v1944_v5, %v10110_v16 }
 0x269   : > { %v870_v37 = vpop.permute.xlu0 %869 }
 0x26a   : > { %v1991_v11 = vcombine.low %v10641_v50, %v10647_v17  ;;  %v1992_v39 = vcombine.high %v10641_v50, %v10647_v17  ;;  %v2007_v8 = vcombine.low %v10644_v12, %v10650_v10  ;;  %v2008_v2 = vcombine.high %v10644_v12, %v10650_v10  ;;  %v10660_v51 = vpop.permute.xlu1 %991  ;;  %942 = vst.msk [vmem:[#allocation3 + $0xb8] sm:$0xff] %vm758_vm1, %v870_v37 }
 0x26b   : > { %1067 = vst.msk [vmem:[#allocation4 + $0xa0] sm:$0xff] %vm436_vm0, %v10660_v51  ;;  %v2367_v24 = vcombine.low %v10564_v21, %v10660_v51  ;;  %v2368_v4 = vcombine.high %v10564_v21, %v10660_v51  ;;  %v2079_v46 = vcombine.low %v10574_v40, %v870_v37  ;;  %v2080_v18 = vcombine.high %v10574_v40, %v870_v37 }
 0x26c   : > { %v10918_v5 = vrot.slane %v1991_v11, %v10152_v32  ;;  %v10924_v38 = vrot.slane %v1992_v39, %v10152_v32  ;;  %v10930_v35 = vrot.slane %v2007_v8, %v10152_v32  ;;  %v10936_v33 = vrot.slane %v2008_v2, %v10152_v32 }
 0x26d   : > { %v10678_v14 = vrot.slane %v2079_v46, %v10110_v16  ;;  %v10681_v57 = vrot.slane %v2080_v18, %v10110_v16  ;;  %v966_v58 = vpop.permute.xlu0 %965  ;;  %v10855_v3 = vrot.slane %v2368_v4, %v10110_v16 }
 0x26e   : > { %v836_v15 = vpop.permute.xlu1 %835  ;;  %1054 = vst.msk [vmem:[#allocation4 + $0x38] sm:$0xff] %vm436_vm0, %v966_v58  ;;  %v2519_v54 = vcombine.low %v10579_v53, %v966_v58  ;;  %v2520_v25 = vcombine.high %v10579_v53, %v966_v58 }
 0x26f   : > { %v2127_v26 = vcombine.low %v10672_v52, %v10678_v14  ;;  %v2128_v43 = vcombine.high %v10672_v52, %v10678_v14  ;;  %v2143_v22 = vcombine.low %v10675_v19, %v10681_v57  ;;  %v2144_v40 = vcombine.high %v10675_v19, %v10681_v57  ;;  %925 = vst.msk [vmem:[#allocation3 + $0x30] sm:$0xff] %vm758_vm1, %v836_v15 }
 0x270   : > { %v1671_v41 = vcombine.low %v10581_v6, %v836_v15  ;;  %v1672_v47 = vcombine.high %v10581_v6, %v836_v15  ;;  %v10701_v53 = vrot.slane %v2519_v54, %v10110_v16  ;;  %v10704_v27 = vrot.slane %v2520_v25, %v10110_v16 }
 0x271   : > { %v998_v31 = vpop.permute.xlu0 %997  ;;  %v10747_v15 = vrot.slane %v1791_v44, %v10110_v16  ;;  %v10945_v50 = vrot.slane %v2127_v26, %v10152_v32  ;;  %v10951_v17 = vrot.slane %v2128_v43, %v10152_v32  ;;  %v10957_v12 = vrot.slane %v2143_v22, %v10152_v32 }
 0x272   : > { %v10716_v29 = vrot.slane %v1671_v41, %v10110_v16  ;;  %v10719_v6 = vrot.slane %v1672_v47, %v10110_v16  ;;  %v2567_v30 = vcombine.low %v10684_v63, %v10701_v53  ;;  %v868_v45 = vpop.permute.xlu1 %867  ;;  %1070 = vst.msk [vmem:[#allocation4 + $0xb8] sm:$0xff] %vm436_vm0, %v998_v31  ;;  %v2655_v47 = vcombine.low %v10587_v48, %v998_v31 }
 0x273   : > { %941 = vst.msk [vmem:[#allocation3 + $0xb0] sm:$0xff] %vm758_vm1, %v868_v45  ;;  %v1807_v34 = vcombine.low %v10589_v49, %v868_v45  ;;  %v1808_v36 = vcombine.high %v10589_v49, %v868_v45  ;;  %v10753_v49 = vrot.slane %v1792_v13, %v10110_v16  ;;  %v2656_v44 = vcombine.high %v10587_v48, %v998_v31 }
 0x274   : > { %v10791_v56 = vrot.slane %v2655_v47, %v10110_v16  ;;  %v10814_v47 = vrot.slane %v2232_v62, %v10110_v16  ;;  %v10849_v62 = vrot.slane %v2367_v24, %v10110_v16  ;;  %v10963_v10 = vrot.slane %v2144_v40, %v10152_v32 }
 0x275   : > { %v10741_v58 = vpop.permute.xlu0 %841  ;;  %v10758_v25 = vrot.slane %v1807_v34, %v10110_v16  ;;  %v10761_v41 = vrot.slane %v1808_v36, %v10110_v16  ;;  %v10794_v0 = vrot.slane %v2656_v44, %v10110_v16  ;;  %v10808_v34 = vrot.slane %v2231_v1, %v10110_v16 }
 0x276   : > { %v964_v54 = vpop.permute.xlu1 %963  ;;  %928 = vst.msk [vmem:[#allocation3 + $0x48] sm:$0xff] %vm758_vm1, %v10741_v58  ;;  %v10971_v39 = vrot.slane %v2567_v30, %v10152_v32  ;;  %v12567_v8 = vcombine.high %v10684_v63, %v10701_v53  ;;  %v12568_v52 = vcombine.low %v10713_v60, %v10704_v27  ;;  %v12569_v14 = vcombine.high %v10713_v60, %v10704_v27 }
 0x277   : > { %1053 = vst.msk [vmem:[#allocation4 + $0x30] sm:$0xff] %vm436_vm0, %v964_v54  ;;  %v2247_v13 = vcombine.low %v10595_v9, %v964_v54  ;;  %v2248_v45 = vcombine.high %v10595_v9, %v964_v54  ;;  %v12570_v26 = vcombine.low %v10707_v59, %v10716_v29  ;;  %v12571_v63 = vcombine.high %v10707_v59, %v10716_v29 }
 0x278   : > { %v10977_v2 = vrot.slane %v12567_v8, %v10152_v32  ;;  %v10983_v19 = vrot.slane %v12568_v52, %v10152_v32  ;;  %v10989_v57 = vrot.slane %v12569_v14, %v10152_v32  ;;  %v12572_v40 = vcombine.low %v10710_v28, %v10719_v6 }
 0x279   : > { %v10788_v36 = vpop.permute.xlu0 %873  ;;  %v10797_v9 = vrot.slane %v2247_v13, %v10110_v16  ;;  %v10800_v20 = vrot.slane %v2248_v45, %v10110_v16  ;;  %v10995_v43 = vrot.slane %v12570_v26, %v10152_v32  ;;  %v11001_v22 = vrot.slane %v12571_v63, %v10152_v32 }
 0x27a   : > { %v996_v54 = vpop.permute.xlu1 %995  ;;  %944 = vst.msk [vmem:[#allocation3 + $0xc8] sm:$0xff] %vm758_vm1, %v10788_v36  ;;  %v11007_v53 = vrot.slane %v12572_v40, %v10152_v32  ;;  %v12573_v27 = vcombine.high %v10710_v28, %v10719_v6  ;;  %v12574_v8 = vcombine.low %v10747_v15, %v10758_v25  ;;  %v12575_v29 = vcombine.high %v10747_v15, %v10758_v25 }
 0x27b   : > { %1069 = vst.msk [vmem:[#allocation4 + $0xb0] sm:$0xff] %vm436_vm0, %v996_v54  ;;  %v2383_v7 = vcombine.low %v10602_v61, %v996_v54  ;;  %v2384_v55 = vcombine.high %v10602_v61, %v996_v54  ;;  %v12576_v14 = vcombine.low %v10753_v49, %v10761_v41  ;;  %v12577_v6 = vcombine.high %v10753_v49, %v10761_v41 }
 0x27c   : > { %v11013_v60 = vrot.slane %v12573_v27, %v10152_v32  ;;  %v11019_v59 = vrot.slane %v12574_v8, %v10152_v32  ;;  %v11025_v52 = vrot.slane %v12575_v29, %v10152_v32  ;;  %v12578_v15 = vcombine.low %v10770_v42, %v10791_v56 }
 0x27d   : > { %v10833_v44 = vpop.permute.xlu0 %969  ;;  %v10858_v45 = vrot.slane %v2383_v7, %v10110_v16  ;;  %v10861_v31 = vrot.slane %v2384_v55, %v10110_v16  ;;  %v11031_v28 = vrot.slane %v12576_v14, %v10152_v32  ;;  %v11037_v26 = vrot.slane %v12577_v6, %v10152_v32 }
 0x27e   : > { %v10835_v13 = vpop.permute.xlu1 %839  ;;  %1056 = vst.msk [vmem:[#allocation4 + $0x48] sm:$0xff] %vm436_vm0, %v10833_v44  ;;  %v11044_v25 = vrot.slane %v12578_v15, %v10152_v32  ;;  %v12579_v40 = vcombine.high %v10770_v42, %v10791_v56  ;;  %v12580_v49 = vcombine.low %v10776_v23, %v10794_v0  ;;  %v12581_v8 = vcombine.high %v10776_v23, %v10794_v0 }
 0x27f   : > { %927 = vst.msk [vmem:[#allocation3 + $0x40] sm:$0xff] %vm758_vm1, %v10835_v13  ;;  %v12582_v42 = vcombine.low %v10808_v34, %v10797_v9  ;;  %v12583_v14 = vcombine.high %v10808_v34, %v10797_v9  ;;  %v12585_v0 = vcombine.low %v10814_v47, %v10800_v20 }
 0x280   : > { %v11050_v27 = vrot.slane %v12579_v40, %v10152_v32  ;;  %v11056_v41 = vrot.slane %v12580_v49, %v10152_v32  ;;  %v11062_v29 = vrot.slane %v12581_v8, %v10152_v32  ;;  %v12587_v49 = vcombine.high %v10814_v47, %v10800_v20 }
 0x281   : > { %v10843_v1 = vpop.permute.xlu0 %1001  ;;  %v11069_v56 = vrot.slane %v12582_v42, %v10152_v32  ;;  %v11075_v6 = vrot.slane %v12583_v14, %v10152_v32  ;;  %v11083_v40 = vrot.slane %v12585_v0, %v10152_v32  ;;  %v12591_v14 = vcombine.high %v10849_v62, %v10858_v45 }
 0x282   : > { %v10863_v61 = vpop.permute.xlu1 %871  ;;  %1072 = vst.msk [vmem:[#allocation4 + $0xc8] sm:$0xff] %vm436_vm0, %v10843_v1  ;;  %v11089_v8 = vrot.slane %v12587_v49, %v10152_v32 }
 0x283   : > { %943 = vst.msk [vmem:[#allocation3 + $0xc0] sm:$0xff] %vm758_vm1, %v10863_v61  ;;  %12584 = vst [vmem:[#allocation32_spill] sm:$0xff] %v11075_v6  ;;  %v11103_v0 = vrot.slane %v12591_v14, %v10152_v32 }
 0x284   : > { %12586 = vst [vmem:[#allocation33_spill] sm:$0xff] %v11083_v40  ;;  %12588 = vst [vmem:[#allocation34_spill] sm:$0xff] %v11089_v8 }
 0x285   : > { %v10877_v7 = vpop.permute.xlu0 %845  ;;  %12592 = vst [vmem:[#allocation36_spill] sm:$0xff] %v11103_v0 }
 0x286   : > { %v10879_v54 = vpop.permute.xlu1 %967  ;;  %930 = vst.msk [vmem:[#allocation3 + $0x58] sm:$0xff] %vm758_vm1, %v10877_v7 }
 0x287   : > { %1055 = vst.msk [vmem:[#allocation4 + $0x40] sm:$0xff] %vm436_vm0, %v10879_v54 }
 0x289   : > { %v10885_v55 = vpop.permute.xlu0 %877 }
 0x28a   : > { %v10887_v24 = vpop.permute.xlu1 %999  ;;  %946 = vst.msk [vmem:[#allocation3 + $0xd8] sm:$0xff] %vm758_vm1, %v10885_v55 }
 0x28b   : > { %1071 = vst.msk [vmem:[#allocation4 + $0xc0] sm:$0xff] %vm436_vm0, %v10887_v24 }
 0x28d   : > { %v10893_v4 = vpop.permute.xlu0 %973 }
 0x28e   : > { %v10895_v51 = vpop.permute.xlu1 %843  ;;  %1058 = vst.msk [vmem:[#allocation4 + $0x58] sm:$0xff] %vm436_vm0, %v10893_v4 }
 0x28f   : > { %929 = vst.msk [vmem:[#allocation3 + $0x50] sm:$0xff] %vm758_vm1, %v10895_v51 }
 0x291   : > { %v10901_v21 = vpop.permute.xlu0 %1005 }
 0x292   : > { %v10903_v48 = vpop.permute.xlu1 %875  ;;  %1074 = vst.msk [vmem:[#allocation4 + $0xd8] sm:$0xff] %vm436_vm0, %v10901_v21 }
 0x293   : > { %945 = vst.msk [vmem:[#allocation3 + $0xd0] sm:$0xff] %vm758_vm1, %v10903_v48 }
 0x295   : > { %v850_v18 = vpop.permute.xlu0 %849 }
 0x296   : > { %v10909_v46 = vpop.permute.xlu1 %971  ;;  %932 = vst.msk [vmem:[#allocation3 + $0x68] sm:$0xff] %vm758_vm1, %v850_v18  ;;  %v1959_v15 = vcombine.low %v10741_v58, %v850_v18  ;;  %v1960_v23 = vcombine.high %v10741_v58, %v850_v18  ;;  %v12589_v18 = vcombine.low %v10849_v62, %v10858_v45 }
 0x297   : > { %1057 = vst.msk [vmem:[#allocation4 + $0x50] sm:$0xff] %vm436_vm0, %v10909_v46 }
 0x298   : > { %v11097_v58 = vrot.slane %v12589_v18, %v10152_v32  ;;  %v12595_v18 = vcombine.high %v10855_v3, %v10861_v31 }
 0x299   : > { %v882_v37 = vpop.permute.xlu0 %881 }
 0x29a   : > { %v10938_v11 = vpop.permute.xlu1 %1003  ;;  %948 = vst.msk [vmem:[#allocation3 + $0xe8] sm:$0xff] %vm758_vm1, %v882_v37  ;;  %v2095_v34 = vcombine.low %v10788_v36, %v882_v37  ;;  %v2096_v9 = vcombine.high %v10788_v36, %v882_v37  ;;  %12590 = vst [vmem:[#allocation35_spill] sm:$0xff] %v11097_v58  ;;  %v12593_v37 = vcombine.low %v10855_v3, %v10861_v31 }
 0x29b   : > { %1073 = vst.msk [vmem:[#allocation4 + $0xd0] sm:$0xff] %vm436_vm0, %v10938_v11  ;;  %v11118_v45 = vrot.slane %v12595_v18, %v10152_v32 }
 0x29c   : > { %v11112_v36 = vrot.slane %v12593_v37, %v10152_v32  ;;  %v11131_v31 = vrot.slane %v2096_v9, %v10110_v16 }
 0x29d   : > { %v978_v30 = vpop.permute.xlu0 %977  ;;  %12596 = vst [vmem:[#allocation38_spill] sm:$0xff] %v11118_v45 }
 0x29e   : > { %v848_v63 = vpop.permute.xlu1 %847  ;;  %1060 = vst.msk [vmem:[#allocation4 + $0x68] sm:$0xff] %vm436_vm0, %v978_v30  ;;  %v2535_v20 = vcombine.low %v10833_v44, %v978_v30  ;;  %v2536_v47 = vcombine.high %v10833_v44, %v978_v30  ;;  %12594 = vst [vmem:[#allocation37_spill] sm:$0xff] %v11112_v36  ;;  %v1967_v44 = vrot.slane %v1959_v15, %v10110_v16 }
 0x29f   : > { %931 = vst.msk [vmem:[#allocation3 + $0x60] sm:$0xff] %vm758_vm1, %v848_v63  ;;  %v1687_v62 = vcombine.low %v10835_v13, %v848_v63  ;;  %v1688_v14 = vcombine.high %v10835_v13, %v848_v63  ;;  %v1974_v30 = vrot.slane %v1960_v23, %v10110_v16  ;;  %v11128_v36 = vrot.slane %v2095_v34, %v10110_v16 }
 0x2a0   : > { %v11136_v18 = vrot.slane %v2535_v20, %v10110_v16  ;;  %v11139_v15 = vrot.slane %v2536_v47, %v10110_v16 }
 0x2a1   : > { %v1010_v42 = vpop.permute.xlu0 %1009  ;;  %v11145_v9 = vrot.slane %v1687_v62, %v10110_v16 }
 0x2a2   : > { %v880_v49 = vpop.permute.xlu1 %879  ;;  %1076 = vst.msk [vmem:[#allocation4 + $0xe8] sm:$0xff] %vm436_vm0, %v1010_v42  ;;  %v2671_v0 = vcombine.low %v10843_v1, %v1010_v42  ;;  %v2672_v37 = vcombine.high %v10843_v1, %v1010_v42  ;;  %v11148_v42 = vrot.slane %v1688_v14, %v10110_v16 }
 0x2a3   : > { %947 = vst.msk [vmem:[#allocation3 + $0xe0] sm:$0xff] %vm758_vm1, %v880_v49  ;;  %v1823_v3 = vcombine.low %v10863_v61, %v880_v49  ;;  %v1824_v13 = vcombine.high %v10863_v61, %v880_v49 }
 0x2a4   : > { %v11154_v47 = vrot.slane %v2671_v0, %v10110_v16  ;;  %v11157_v49 = vrot.slane %v2672_v37, %v10110_v16 }
 0x2a5   : > { %v854_v63 = vpop.permute.xlu0 %853  ;;  %v11165_v14 = vrot.slane %v1824_v13, %v10110_v16 }
 0x2a6   : > { %v976_v23 = vpop.permute.xlu1 %975  ;;  %934 = vst.msk [vmem:[#allocation3 + $0x78] sm:$0xff] %vm758_vm1, %v854_v63  ;;  %v1975_v1 = vcombine.low %v10877_v7, %v854_v63  ;;  %v1976_v34 = vcombine.high %v10877_v7, %v854_v63  ;;  %v11162_v63 = vrot.slane %v1823_v3, %v10110_v16 }
 0x2a7   : > { %1059 = vst.msk [vmem:[#allocation4 + $0x60] sm:$0xff] %vm436_vm0, %v976_v23  ;;  %v2263_v61 = vcombine.low %v10879_v54, %v976_v23  ;;  %v2264_v20 = vcombine.high %v10879_v54, %v976_v23 }
 0x2a8   : > { %v1983_v7 = vrot.slane %v1975_v1, %v10110_v16  ;;  %v1990_v62 = vrot.slane %v1976_v34, %v10110_v16 }
 0x2a9   : > { %v11168_v45 = vrot.slane %v2263_v61, %v10110_v16  ;;  %v11171_v54 = vrot.slane %v2264_v20, %v10110_v16  ;;  %v886_v0 = vpop.permute.xlu0 %885 }
 0x2aa   : > { %v2023_v23 = vcombine.low %v1967_v44, %v1983_v7  ;;  %v2024_v37 = vcombine.high %v1967_v44, %v1983_v7  ;;  %v2039_v58 = vcombine.low %v1974_v30, %v1990_v62  ;;  %v2040_v8 = vcombine.high %v1974_v30, %v1990_v62  ;;  %v1008_v1 = vpop.permute.xlu1 %1007  ;;  %950 = vst.msk [vmem:[#allocation3 + $0xf8] sm:$0xff] %vm758_vm1, %v886_v0 }
 0x2ab   : > { %1075 = vst.msk [vmem:[#allocation4 + $0xe0] sm:$0xff] %vm436_vm0, %v1008_v1  ;;  %v2399_v3 = vcombine.low %v10887_v24, %v1008_v1  ;;  %v2400_v13 = vcombine.high %v10887_v24, %v1008_v1  ;;  %v2111_v34 = vcombine.low %v10885_v55, %v886_v0  ;;  %v2112_v61 = vcombine.high %v10885_v55, %v886_v0 }
 0x2ac   : > { %v2031_v20 = vrot.slane %v2023_v23, %v10152_v32  ;;  %v2038_v40 = vrot.slane %v2024_v37, %v10152_v32  ;;  %v2047_v44 = vrot.slane %v2039_v58, %v10152_v32  ;;  %v2054_v30 = vrot.slane %v2040_v8, %v10152_v32 }
 0x2ad   : > { %v11184_v7 = vrot.slane %v2399_v3, %v10110_v16  ;;  %v11187_v62 = vrot.slane %v2400_v13, %v10110_v16  ;;  %v2119_v24 = vrot.slane %v2111_v34, %v10110_v16  ;;  %v2126_v1 = vrot.slane %v2112_v61, %v10110_v16  ;;  %v982_v6 = vpop.permute.xlu0 %981 }
 0x2ae   : > { %v2055_v55 = vcombine.low %v10918_v5, %v2031_v20  ;;  %v2056_v0 = vcombine.high %v10918_v5, %v2031_v20  ;;  %v2057_v23 = vcombine.low %v10924_v38, %v2038_v40  ;;  %v2058_v58 = vcombine.high %v10924_v38, %v2038_v40  ;;  %v852_v8 = vpop.permute.xlu1 %851  ;;  %1062 = vst.msk [vmem:[#allocation4 + $0x78] sm:$0xff] %vm436_vm0, %v982_v6 }
 0x2af   : > { %v2059_v37 = vcombine.low %v10930_v35, %v2047_v44  ;;  %v2060_v3 = vcombine.high %v10930_v35, %v2047_v44  ;;  %v2061_v13 = vcombine.low %v10936_v33, %v2054_v30  ;;  %v2062_v34 = vcombine.high %v10936_v33, %v2054_v30  ;;  %933 = vst.msk [vmem:[#allocation3 + $0x70] sm:$0xff] %vm758_vm1, %v852_v8 }
 0x2b0   : > { %2215 = vst.msk [vmem:[#allocation6 + $0x80] sm:$0xff] %vm758_vm1, %v2055_v55  ;;  %2217 = vst.msk [vmem:[#allocation6 + $0x90] sm:$0xff] %vm758_vm1, %v2056_v0  ;;  %v2159_v38 = vcombine.low %v11128_v36, %v2119_v24  ;;  %v2160_v5 = vcombine.high %v11128_v36, %v2119_v24  ;;  %v2175_v35 = vcombine.low %v11131_v31, %v2126_v1 }
 0x2b1   : > { %2219 = vst.msk [vmem:[#allocation6 + $0xa0] sm:$0xff] %vm758_vm1, %v2057_v23  ;;  %2221 = vst.msk [vmem:[#allocation6 + $0xb0] sm:$0xff] %vm758_vm1, %v2058_v58  ;;  %v2176_v40 = vcombine.high %v11131_v31, %v2126_v1  ;;  %v1703_v33 = vcombine.low %v10895_v51, %v852_v8  ;;  %v1704_v61 = vcombine.high %v10895_v51, %v852_v8  ;;  %v11217_v44 = vpop.permute.xlu0 %1013 }
 0x2b2   : > { %2223 = vst.msk [vmem:[#allocation6 + $0xc0] sm:$0xff] %vm758_vm1, %v2059_v37  ;;  %2225 = vst.msk [vmem:[#allocation6 + $0xd0] sm:$0xff] %vm758_vm1, %v2060_v3  ;;  %v2551_v20 = vcombine.low %v10893_v4, %v982_v6  ;;  %v2552_v36 = vcombine.high %v10893_v4, %v982_v6  ;;  %v2167_v31 = vrot.slane %v2159_v38, %v10152_v32  ;;  %v11223_v55 = vpop.permute.xlu1 %883 }
 0x2b3   : > { %2227 = vst.msk [vmem:[#allocation6 + $0xe0] sm:$0xff] %vm758_vm1, %v2061_v13  ;;  %2229 = vst.msk [vmem:[#allocation6 + $0xf0] sm:$0xff] %vm758_vm1, %v2062_v34  ;;  %v2174_v30 = vrot.slane %v2160_v5, %v10152_v32  ;;  %v2183_v24 = vrot.slane %v2175_v35, %v10152_v32  ;;  %v2190_v1 = vrot.slane %v2176_v40, %v10152_v32 }
 0x2b4   : > { %1078 = vst.msk [vmem:[#allocation4 + $0xf8] sm:$0xff] %vm436_vm0, %v11217_v44  ;;  %v1711_v51 = vrot.slane %v1703_v33, %v10110_v16  ;;  %v1718_v0 = vrot.slane %v1704_v61, %v10110_v16  ;;  %v2559_v4 = vrot.slane %v2551_v20, %v10110_v16  ;;  %v2566_v6 = vrot.slane %v2552_v36, %v10110_v16 }
 0x2b5   : > { %949 = vst.msk [vmem:[#allocation3 + $0xf0] sm:$0xff] %vm758_vm1, %v11223_v55  ;;  %v2191_v23 = vcombine.low %v10945_v50, %v2167_v31  ;;  %v2192_v58 = vcombine.high %v10945_v50, %v2167_v31  ;;  %v2193_v8 = vcombine.low %v10951_v17, %v2174_v30  ;;  %v2194_v37 = vcombine.high %v10951_v17, %v2174_v30 }
 0x2b6   : > { %v2195_v3 = vcombine.low %v10957_v12, %v2183_v24  ;;  %v2196_v13 = vcombine.high %v10957_v12, %v2183_v24  ;;  %v2197_v34 = vcombine.low %v10963_v10, %v2190_v1  ;;  %v2198_v38 = vcombine.high %v10963_v10, %v2190_v1  ;;  %v11249_v35 = vpop.permute.xlu1 %979 }
 0x2b7   : > { %2216 = vst.msk [vmem:[#allocation6 + $0x88] sm:$0xff] %vm758_vm1, %v2191_v23  ;;  %2218 = vst.msk [vmem:[#allocation6 + $0x98] sm:$0xff] %vm758_vm1, %v2192_v58  ;;  %v1751_v50 = vcombine.low %v11145_v9, %v1711_v51  ;;  %v1752_v17 = vcombine.high %v11145_v9, %v1711_v51  ;;  %v1767_v5 = vcombine.low %v11148_v42, %v1718_v0 }
 0x2b8   : > { %2220 = vst.msk [vmem:[#allocation6 + $0xa8] sm:$0xff] %vm758_vm1, %v2193_v8  ;;  %2222 = vst.msk [vmem:[#allocation6 + $0xb8] sm:$0xff] %vm758_vm1, %v2194_v37  ;;  %v1768_v12 = vcombine.high %v11148_v42, %v1718_v0  ;;  %v2599_v10 = vcombine.low %v11136_v18, %v2559_v4  ;;  %v2600_v40 = vcombine.high %v11136_v18, %v2559_v4 }
 0x2b9   : > { %2224 = vst.msk [vmem:[#allocation6 + $0xc8] sm:$0xff] %vm758_vm1, %v2195_v3  ;;  %2226 = vst.msk [vmem:[#allocation6 + $0xd8] sm:$0xff] %vm758_vm1, %v2196_v13  ;;  %v2615_v9 = vcombine.low %v11139_v15, %v2566_v6  ;;  %v2616_v33 = vcombine.high %v11139_v15, %v2566_v6  ;;  %v1759_v42 = vrot.slane %v1751_v50, %v10152_v32 }
 0x2ba   : > { %2228 = vst.msk [vmem:[#allocation6 + $0xe8] sm:$0xff] %vm758_vm1, %v2197_v34  ;;  %2230 = vst.msk [vmem:[#allocation6 + $0xf8] sm:$0xff] %vm758_vm1, %v2198_v38  ;;  %v1766_v61 = vrot.slane %v1752_v17, %v10152_v32  ;;  %v1775_v20 = vrot.slane %v1767_v5, %v10152_v32  ;;  %v1782_v36 = vrot.slane %v1768_v12, %v10152_v32  ;;  %v1012_v4 = vpop.permute.xlu1 %1011 }
 0x2bb   : > { %1061 = vst.msk [vmem:[#allocation4 + $0x70] sm:$0xff] %vm436_vm0, %v11249_v35  ;;  %v2607_v31 = vrot.slane %v2599_v10, %v10152_v32  ;;  %v2614_v30 = vrot.slane %v2600_v40, %v10152_v32  ;;  %v2623_v18 = vrot.slane %v2615_v9, %v10152_v32  ;;  %v2630_v24 = vrot.slane %v2616_v33, %v10152_v32 }
 0x2bc   : > { %v1783_v15 = vcombine.low %v10995_v43, %v1759_v42  ;;  %v1784_v1 = vcombine.high %v10995_v43, %v1759_v42  ;;  %v1785_v51 = vcombine.low %v11001_v22, %v1766_v61  ;;  %v1786_v0 = vcombine.high %v11001_v22, %v1766_v61  ;;  %1077 = vst.msk [vmem:[#allocation4 + $0xf0] sm:$0xff] %vm436_vm0, %v1012_v4 }
 0x2bd   : > { %v1787_v6 = vcombine.low %v11007_v53, %v1775_v20  ;;  %v1788_v23 = vcombine.high %v11007_v53, %v1775_v20  ;;  %v1789_v58 = vcombine.low %v11013_v60, %v1782_v36  ;;  %v1790_v8 = vcombine.high %v11013_v60, %v1782_v36 }
 0x2be   : > { %2199 = vst.msk [vmem:[#allocation6] sm:$0xff] %vm758_vm1, %v1783_v15  ;;  %2201 = vst.msk [vmem:[#allocation6 + $0x10] sm:$0xff] %vm758_vm1, %v1784_v1  ;;  %v2631_v43 = vcombine.low %v10971_v39, %v2607_v31  ;;  %v2632_v22 = vcombine.high %v10971_v39, %v2607_v31  ;;  %v2633_v53 = vcombine.low %v10977_v2, %v2614_v30 }
 0x2bf   : > { %2203 = vst.msk [vmem:[#allocation6 + $0x20] sm:$0xff] %vm758_vm1, %v1785_v51  ;;  %2205 = vst.msk [vmem:[#allocation6 + $0x30] sm:$0xff] %vm758_vm1, %v1786_v0  ;;  %v2634_v37 = vcombine.high %v10977_v2, %v2614_v30  ;;  %v2635_v60 = vcombine.low %v10983_v19, %v2623_v18  ;;  %v2636_v3 = vcombine.high %v10983_v19, %v2623_v18 }
 0x2c0   : > { %2207 = vst.msk [vmem:[#allocation6 + $0x40] sm:$0xff] %vm758_vm1, %v1787_v6  ;;  %2209 = vst.msk [vmem:[#allocation6 + $0x50] sm:$0xff] %vm758_vm1, %v1788_v23  ;;  %v2637_v13 = vcombine.low %v10989_v57, %v2630_v24  ;;  %v2638_v39 = vcombine.high %v10989_v57, %v2630_v24  ;;  %v1839_v2 = vcombine.low %v10903_v48, %v11223_v55 }
 0x2c1   : > { %2211 = vst.msk [vmem:[#allocation6 + $0x60] sm:$0xff] %vm758_vm1, %v1789_v58  ;;  %2213 = vst.msk [vmem:[#allocation6 + $0x70] sm:$0xff] %vm758_vm1, %v1790_v8  ;;  %v1840_v34 = vcombine.high %v10903_v48, %v11223_v55  ;;  %v2687_v19 = vcombine.low %v10901_v21, %v11217_v44  ;;  %v2688_v57 = vcombine.high %v10901_v21, %v11217_v44 }
 0x2c2   : > { %2791 = vst.msk [vmem:[#allocation7 + $0x80] sm:$0xff] %vm436_vm0, %v2631_v43  ;;  %2793 = vst.msk [vmem:[#allocation7 + $0x90] sm:$0xff] %vm436_vm0, %v2632_v22  ;;  %v2279_v38 = vcombine.low %v10909_v46, %v11249_v35  ;;  %v2280_v48 = vcombine.high %v10909_v46, %v11249_v35  ;;  %v2415_v55 = vcombine.low %v10938_v11, %v1012_v4 }
 0x2c3   : > { %2795 = vst.msk [vmem:[#allocation7 + $0xa0] sm:$0xff] %vm436_vm0, %v2633_v53  ;;  %2797 = vst.msk [vmem:[#allocation7 + $0xb0] sm:$0xff] %vm436_vm0, %v2634_v37  ;;  %v2416_v50 = vcombine.high %v10938_v11, %v1012_v4  ;;  %v1847_v21 = vrot.slane %v1839_v2, %v10110_v16  ;;  %v1854_v44 = vrot.slane %v1840_v34, %v10110_v16 }
 0x2c4   : > { %2799 = vst.msk [vmem:[#allocation7 + $0xc0] sm:$0xff] %vm436_vm0, %v2635_v60  ;;  %2801 = vst.msk [vmem:[#allocation7 + $0xd0] sm:$0xff] %vm436_vm0, %v2636_v3  ;;  %v2695_v17 = vrot.slane %v2687_v19, %v10110_v16  ;;  %v2702_v5 = vrot.slane %v2688_v57, %v10110_v16  ;;  %v2287_v12 = vrot.slane %v2279_v38, %v10110_v16  ;;  %v12597_v38 = vld [vmem:[#allocation32_spill] sm:$0xff] }
 0x2c5   : > { %2803 = vst.msk [vmem:[#allocation7 + $0xe0] sm:$0xff] %vm436_vm0, %v2637_v13  ;;  %2805 = vst.msk [vmem:[#allocation7 + $0xf0] sm:$0xff] %vm436_vm0, %v2638_v39  ;;  %v11322_v10 = vrot.slane %v2280_v48, %v10110_v16  ;;  %v11325_v40 = vrot.slane %v2415_v55, %v10110_v16  ;;  %v11328_v46 = vrot.slane %v2416_v50, %v10110_v16  ;;  %v12598_v50 = vld [vmem:[#allocation33_spill] sm:$0xff] }
 0x2c6   : > { %v1887_v11 = vcombine.low %v11162_v63, %v1847_v21  ;;  %v1888_v35 = vcombine.high %v11162_v63, %v1847_v21  ;;  %v1903_v9 = vcombine.low %v11165_v14, %v1854_v44  ;;  %v1904_v33 = vcombine.high %v11165_v14, %v1854_v44 }
 0x2c7   : > { %v2735_v42 = vcombine.low %v11154_v47, %v2695_v17  ;;  %v2736_v61 = vcombine.high %v11154_v47, %v2695_v17  ;;  %v2751_v20 = vcombine.low %v11157_v49, %v2702_v5  ;;  %v2752_v36 = vcombine.high %v11157_v49, %v2702_v5  ;;  %v12599_v17 = vld [vmem:[#allocation34_spill] sm:$0xff] }
 0x2c8   : > { %v1895_v31 = vrot.slane %v1887_v11, %v10152_v32  ;;  %v1902_v16 = vrot.slane %v1888_v35, %v10152_v32  ;;  %v1911_v30 = vrot.slane %v1903_v9, %v10152_v32  ;;  %v1918_v63 = vrot.slane %v1904_v33, %v10152_v32  ;;  %v12602_v35 = vld [vmem:[#allocation37_spill] sm:$0xff] }
 0x2c9   : > { %v2743_v18 = vrot.slane %v2735_v42, %v10152_v32  ;;  %v2750_v14 = vrot.slane %v2736_v61, %v10152_v32  ;;  %v2759_v24 = vrot.slane %v2751_v20, %v10152_v32  ;;  %v2766_v47 = vrot.slane %v2752_v36, %v10152_v32  ;;  %v12603_v42 = vld [vmem:[#allocation38_spill] sm:$0xff] }
 0x2ca   : > { %v1919_v15 = vcombine.low %v11019_v59, %v1895_v31  ;;  %v1920_v49 = vcombine.high %v11019_v59, %v1895_v31  ;;  %v1921_v1 = vcombine.low %v11025_v52, %v1902_v16  ;;  %v1922_v51 = vcombine.high %v11025_v52, %v1902_v16 }
 0x2cb   : > { %v1923_v0 = vcombine.low %v11031_v28, %v1911_v30  ;;  %v1924_v4 = vcombine.high %v11031_v28, %v1911_v30  ;;  %v1925_v6 = vcombine.low %v11037_v26, %v1918_v63  ;;  %v1926_v23 = vcombine.high %v11037_v26, %v1918_v63 }
 0x2cc   : > { %2200 = vst.msk [vmem:[#allocation6 + $0x8] sm:$0xff] %vm758_vm1, %v1919_v15  ;;  %2202 = vst.msk [vmem:[#allocation6 + $0x18] sm:$0xff] %vm758_vm1, %v1920_v49  ;;  %v2767_v59 = vcombine.low %v11044_v25, %v2743_v18  ;;  %v2768_v52 = vcombine.high %v11044_v25, %v2743_v18  ;;  %v2769_v58 = vcombine.low %v11050_v27, %v2750_v14 }
 0x2cd   : > { %2204 = vst.msk [vmem:[#allocation6 + $0x28] sm:$0xff] %vm758_vm1, %v1921_v1  ;;  %2206 = vst.msk [vmem:[#allocation6 + $0x38] sm:$0xff] %vm758_vm1, %v1922_v51  ;;  %v2770_v28 = vcombine.high %v11050_v27, %v2750_v14  ;;  %v2771_v26 = vcombine.low %v11056_v41, %v2759_v24  ;;  %v2772_v8 = vcombine.high %v11056_v41, %v2759_v24 }
 0x2ce   : > { %2208 = vst.msk [vmem:[#allocation6 + $0x48] sm:$0xff] %vm758_vm1, %v1923_v0  ;;  %2210 = vst.msk [vmem:[#allocation6 + $0x58] sm:$0xff] %vm758_vm1, %v1924_v4  ;;  %v2773_v43 = vcombine.low %v11062_v29, %v2766_v47  ;;  %v2774_v25 = vcombine.high %v11062_v29, %v2766_v47  ;;  %v2327_v27 = vcombine.low %v11168_v45, %v2287_v12 }
 0x2cf   : > { %2212 = vst.msk [vmem:[#allocation6 + $0x68] sm:$0xff] %vm758_vm1, %v1925_v6  ;;  %2214 = vst.msk [vmem:[#allocation6 + $0x78] sm:$0xff] %vm758_vm1, %v1926_v23  ;;  %v2328_v22 = vcombine.high %v11168_v45, %v2287_v12  ;;  %v2343_v53 = vcombine.low %v11171_v54, %v11322_v10  ;;  %v2344_v41 = vcombine.high %v11171_v54, %v11322_v10 }
 0x2d0   : > { %2792 = vst.msk [vmem:[#allocation7 + $0x88] sm:$0xff] %vm436_vm0, %v2767_v59  ;;  %2794 = vst.msk [vmem:[#allocation7 + $0x98] sm:$0xff] %vm436_vm0, %v2768_v52  ;;  %v2463_v29 = vcombine.low %v11184_v7, %v11325_v40  ;;  %v2464_v45 = vcombine.high %v11184_v7, %v11325_v40  ;;  %v2479_v37 = vcombine.low %v11187_v62, %v11328_v46  ;;  %v12601_v40 = vld [vmem:[#allocation36_spill] sm:$0xff] }
 0x2d1   : > { %2796 = vst.msk [vmem:[#allocation7 + $0xa8] sm:$0xff] %vm436_vm0, %v2769_v58  ;;  %2798 = vst.msk [vmem:[#allocation7 + $0xb8] sm:$0xff] %vm436_vm0, %v2770_v28  ;;  %v2480_v54 = vcombine.high %v11187_v62, %v11328_v46  ;;  %v2335_v60 = vrot.slane %v2327_v27, %v10152_v32  ;;  %v2342_v3 = vrot.slane %v2328_v22, %v10152_v32 }
 0x2d2   : > { %2800 = vst.msk [vmem:[#allocation7 + $0xc8] sm:$0xff] %vm436_vm0, %v2771_v26  ;;  %2802 = vst.msk [vmem:[#allocation7 + $0xd8] sm:$0xff] %vm436_vm0, %v2772_v8  ;;  %v2351_v13 = vrot.slane %v2343_v53, %v10152_v32  ;;  %v2358_v39 = vrot.slane %v2344_v41, %v10152_v32  ;;  %v2471_v2 = vrot.slane %v2463_v29, %v10152_v32 }
 0x2d3   : > { %2804 = vst.msk [vmem:[#allocation7 + $0xe8] sm:$0xff] %vm436_vm0, %v2773_v43  ;;  %2806 = vst.msk [vmem:[#allocation7 + $0xf8] sm:$0xff] %vm436_vm0, %v2774_v25  ;;  %v2478_v34 = vrot.slane %v2464_v45, %v10152_v32  ;;  %v2487_v7 = vrot.slane %v2479_v37, %v10152_v32  ;;  %v2494_v19 = vrot.slane %v2480_v54, %v10152_v32  ;;  %v12600_v32 = vld [vmem:[#allocation35_spill] sm:$0xff] }
 0x2d4   : > { %v2359_v57 = vcombine.low %v11069_v56, %v2335_v60  ;;  %v2360_v62 = vcombine.high %v11069_v56, %v2335_v60  ;;  %v2361_v48 = vcombine.low %v12597_v38, %v2342_v3  ;;  %v2362_v55 = vcombine.high %v12597_v38, %v2342_v3 }
 0x2d5   : > { %v2363_v21 = vcombine.low %v12598_v50, %v2351_v13  ;;  %v2364_v44 = vcombine.high %v12598_v50, %v2351_v13  ;;  %v2365_v5 = vcombine.low %v12599_v17, %v2358_v39  ;;  %v2366_v12 = vcombine.high %v12599_v17, %v2358_v39 }
 0x2d6   : > { %2775 = vst.msk [vmem:[#allocation7] sm:$0xff] %vm436_vm0, %v2359_v57  ;;  %2777 = vst.msk [vmem:[#allocation7 + $0x10] sm:$0xff] %vm436_vm0, %v2360_v62  ;;  %v2495_v56 = vcombine.low %v12600_v32, %v2471_v2  ;;  %v2496_v10 = vcombine.high %v12600_v32, %v2471_v2  ;;  %v2497_v46 = vcombine.low %v12601_v40, %v2478_v34 }
 0x2d7   : > { %2779 = vst.msk [vmem:[#allocation7 + $0x20] sm:$0xff] %vm436_vm0, %v2361_v48  ;;  %2781 = vst.msk [vmem:[#allocation7 + $0x30] sm:$0xff] %vm436_vm0, %v2362_v55  ;;  %v2498_v11 = vcombine.high %v12601_v40, %v2478_v34  ;;  %v2499_v9 = vcombine.low %v12602_v35, %v2487_v7  ;;  %v2500_v33 = vcombine.high %v12602_v35, %v2487_v7 }
 0x2d8   : > { %2783 = vst.msk [vmem:[#allocation7 + $0x40] sm:$0xff] %vm436_vm0, %v2363_v21  ;;  %2785 = vst.msk [vmem:[#allocation7 + $0x50] sm:$0xff] %vm436_vm0, %v2364_v44  ;;  %v2501_v61 = vcombine.low %v12603_v42, %v2494_v19  ;;  %v2502_v20 = vcombine.high %v12603_v42, %v2494_v19 }
 0x2d9   : > { %2787 = vst.msk [vmem:[#allocation7 + $0x60] sm:$0xff] %vm436_vm0, %v2365_v5  ;;  %2789 = vst.msk [vmem:[#allocation7 + $0x70] sm:$0xff] %vm436_vm0, %v2366_v12 }
 0x2da   : > { %2776 = vst.msk [vmem:[#allocation7 + $0x8] sm:$0xff] %vm436_vm0, %v2495_v56  ;;  %2778 = vst.msk [vmem:[#allocation7 + $0x18] sm:$0xff] %vm436_vm0, %v2496_v10 }
 0x2db   : > { %2780 = vst.msk [vmem:[#allocation7 + $0x28] sm:$0xff] %vm436_vm0, %v2497_v46  ;;  %2782 = vst.msk [vmem:[#allocation7 + $0x38] sm:$0xff] %vm436_vm0, %v2498_v11 }
 0x2dc   : > { %2784 = vst.msk [vmem:[#allocation7 + $0x48] sm:$0xff] %vm436_vm0, %v2499_v9  ;;  %2786 = vst.msk [vmem:[#allocation7 + $0x58] sm:$0xff] %vm436_vm0, %v2500_v33 }
 0x2dd   : > { %2788 = vst.msk [vmem:[#allocation7 + $0x68] sm:$0xff] %vm436_vm0, %v2501_v61  ;;  %2790 = vst.msk [vmem:[#allocation7 + $0x78] sm:$0xff] %vm436_vm0, %v2502_v20 }
 0x2de PF: > { %v2878_v36 = vld [vmem:[#allocation6 + $0x8] sm:$0xff]  ;;  %vm2911_vm2 = vcmask 15360   ;;  %v2880_v31 = vld [vmem:[#allocation6 + $0x18] sm:$0xff]  ;;  %v12525_v16 = vmov 0.0   ;;  %s8504_s16 = sshll.u32 %s9645_s29, 3  ;;  %v2877_v30 = vld [vmem:[#allocation6] sm:$0xff] }
 0x2df   : > { %8871 = vmatprep.subr.mxu0 %v12525_v16  ;;  %8878 = vmatprep.subr.mxu1 %v12525_v16  ;;  %v2879_v63 = vld [vmem:[#allocation6 + $0x10] sm:$0xff]  ;;  %vm9676_vm3 = vmmov 0   ;;  %s11447_s17 = scalar_lea.vmem [#allocation5], %s8504_s16  ;;  %v2882_v24 = vld [vmem:[#allocation6 + $0x28] sm:$0xff]  ;;  %v2884_v47 = vld [vmem:[#allocation6 + $0x38] sm:$0xff]  ;;  %s11548_s20 = sshll.u32 %s9645_s29, 7 }
 0x2e0   : > { %8872 = vmatpush3.xpose.msk.msra.mxu0 %vm2911_vm2, %v2878_v36  ;;  %8879 = vmatpush3.xpose.msk.msra.mxu1 %vm2911_vm2, %v2880_v31  ;;  %v2861_v18 = vld [vmem:[%s11447_s17] sm:$0xff]  ;;  %v2862_v14 = vld [vmem:[%s11447_s17 + $0x10] sm:$0xff]  ;;  %v2886_v0 = vld [vmem:[#allocation6 + $0x48] sm:$0xff]  ;;  %s11563_s6 = scalar_lea.vmem [#allocation3], %s11548_s20  ;;  %s11575_s1 = scalar_lea.vmem [#allocation2], %s11548_s20  ;;  %vm4872_vm4 = vcmask 130048  }
 0x2e1   : > { %8873 = vmatprep.subr.mxu0 %v12525_v16  ;;  %8880 = vmatprep.subr.mxu1 %v12525_v16  ;;  %v2881_v15 = vld [vmem:[#allocation6 + $0x20] sm:$0xff]  ;;  %v2883_v49 = vld [vmem:[#allocation6 + $0x30] sm:$0xff]  ;;  %v2888_v4 = vld [vmem:[#allocation6 + $0x58] sm:$0xff]  ;;  %s2909_s19 = scalar_lea.vmem [#allocation9], %s8504_s16  ;;  %vm5003_vm5 = vcmask 1041409   ;;  %vm5005_vm6 = vcmask 1042434  }
 0x2e2   : > { %8875 = vmatprep.mubr.msk.f32.mxu0 %vm9676_vm3, %v12525_v16  ;;  %8882 = vmatprep.mubr.msk.f32.mxu1 %vm9676_vm3, %v12525_v16  ;;  %v2863_v1 = vld [vmem:[%s11447_s17 + $0x20] sm:$0xff]  ;;  %v2864_v51 = vld [vmem:[%s11447_s17 + $0x30] sm:$0xff]  ;;  %v2890_v58 = vld [vmem:[#allocation6 + $0x68] sm:$0xff]  ;;  %vm5007_vm7 = vcmask 1043459   ;;  %vm5009_vm8 = vcmask 1044484   ;;  %vm5011_vm9 = vcmask 1045509  }
 0x2e3   : > { %v2885_v6 = vld [vmem:[#allocation6 + $0x40] sm:$0xff]  ;;  %v2887_v23 = vld [vmem:[#allocation6 + $0x50] sm:$0xff]  ;;  %v2892_v28 = vld [vmem:[#allocation6 + $0x78] sm:$0xff]  ;;  %vm5013_vm10 = vcmask 1046534   ;;  %vm5015_vm11 = vcmask 1047559   ;;  %vm5131_vm12 = vcmask 130112  }
 0x2e4   : > { %8874 = vmatpush3.xpose.msk.msra.mxu0 %vm2911_vm2, %v2877_v30  ;;  %8881 = vmatpush3.xpose.msk.msra.mxu1 %vm2911_vm2, %v2879_v63  ;;  %v2865_v59 = vld [vmem:[%s11447_s17 + $0x40] sm:$0xff]  ;;  %v2866_v52 = vld [vmem:[%s11447_s17 + $0x50] sm:$0xff]  ;;  %v2894_v27 = vld [vmem:[#allocation6 + $0x88] sm:$0xff]  ;;  %s12273_s28 = scalar_lea.vmem [#allocation4], %s11548_s20  ;;  %s12615_s0 = sld [smem:[#allocation26_spill]] }
 0x2e5   : > { %8885 = vmatprep.subr.mxu0 %v12525_v16  ;;  %8892 = vmatprep.subr.mxu1 %v12525_v16  ;;  %v2889_v26 = vld [vmem:[#allocation6 + $0x60] sm:$0xff]  ;;  %v2891_v8 = vld [vmem:[#allocation6 + $0x70] sm:$0xff]  ;;  %v2896_v22 = vld [vmem:[#allocation6 + $0x98] sm:$0xff]  ;;  %s8287_s23 = sld [smem:[#allocation8]]  ;;  %s8312_s12 = sshll.u32 %s9958_s21, 4  ;;  %s12434_s12 = int_to_ptr.vmem [resolvable:$true] %s8312_s12 }
 0x2e6   : > { %v2867_v43 = vld [vmem:[%s11447_s17 + $0x60] sm:$0xff]  ;;  %v2868_v25 = vld [vmem:[%s11447_s17 + $0x70] sm:$0xff]  ;;  %v2898_v37 = vld [vmem:[#allocation6 + $0xa8] sm:$0xff]  ;;  %s12616_s15 = sld [smem:[#allocation46_spill]]  ;;  %s9529_s11 = scalar_lea.vmem %s12434_s12, 256 }
 0x2e7   : > { %8876 = vmatmul.mubr.msk.f32.vlgmr.msra.gmra.mxu0 %vm2911_vm2, %v2861_v18  ;;  %8883 = vmatmul.mubr.msk.f32.vlgmr.msra.gmra.mxu1 %vm2911_vm2, %v2862_v14  ;;  %v2893_v53 = vld [vmem:[#allocation6 + $0x80] sm:$0xff]  ;;  %v2895_v41 = vld [vmem:[#allocation6 + $0x90] sm:$0xff]  ;;  %v2900_v54 = vld [vmem:[#allocation6 + $0xb8] sm:$0xff]  ;;  %p9530_p13 = scmp.ne.s32.totalorder %s12434_s12, %s9529_s11  ;;  %p12617_p5 = scmp.ne.s32.totalorder %s12550_s18, 0 }
 0x2e8   : > { %8886 = vmatpush3.xpose.msk.msra.mxu0 %vm2911_vm2, %v2882_v24  ;;  %8893 = vmatpush3.xpose.msk.msra.mxu1 %vm2911_vm2, %v2884_v47  ;;  %v2869_v29 = vld [vmem:[%s11447_s17 + $0x80] sm:$0xff]  ;;  %v2870_v45 = vld [vmem:[%s11447_s17 + $0x90] sm:$0xff]  ;;  %v2902_v2 = vld [vmem:[#allocation6 + $0xc8] sm:$0xff] }
 0x2e9   : > { %8887 = vmatprep.subr.mxu0 %v12525_v16  ;;  %8894 = vmatprep.subr.mxu1 %v12525_v16  ;;  %v2897_v60 = vld [vmem:[#allocation6 + $0xa0] sm:$0xff]  ;;  %v2899_v3 = vld [vmem:[#allocation6 + $0xb0] sm:$0xff]  ;;  %v2904_v34 = vld [vmem:[#allocation6 + $0xd8] sm:$0xff]  ;;  %p9531_p3 = pnand %p9530_p13, %p12617_p5 }
 0x2ea   : > { %8889 = vmatprep.mubr.msk.f32.mxu0 %vm9676_vm3, %v12525_v16  ;;  %8896 = vmatprep.mubr.msk.f32.mxu1 %vm9676_vm3, %v12525_v16  ;;  %v2871_v13 = vld [vmem:[%s11447_s17 + $0xa0] sm:$0xff]  ;;  %v2872_v39 = vld [vmem:[%s11447_s17 + $0xb0] sm:$0xff]  ;;  %v2906_v38 = vld [vmem:[#allocation6 + $0xe8] sm:$0xff]  ;;  %s8619_s25 = sshll.u32 %s12615_s0, 2 }
 0x2eb   : > { %v2901_v7 = vld [vmem:[#allocation6 + $0xc0] sm:$0xff]  ;;  %v2903_v19 = vld [vmem:[#allocation6 + $0xd0] sm:$0xff]  ;;  %v2908_v48 = vld [vmem:[#allocation6 + $0xf8] sm:$0xff]  ;;  %s8309_s5 = sadd.s32 %s9645_s29, %s8619_s25  ;;  %s12439_s29 = scalar_lea.sflag [#allocation11], %s315_s13 }
 0x2ec   : > { %8888 = vmatpush3.xpose.msk.msra.mxu0 %vm2911_vm2, %v2881_v15  ;;  %8895 = vmatpush3.xpose.msk.msra.mxu1 %vm2911_vm2, %v2883_v49  ;;  %v2873_v57 = vld [vmem:[%s11447_s17 + $0xc0] sm:$0xff]  ;;  %v2874_v62 = vld [vmem:[%s11447_s17 + $0xd0] sm:$0xff]  ;;  %v2828_v21 = vld [vmem:[%s11563_s6 + $0x8] sm:$0xff]  ;;  %s8620_s22 = sshll.u32 %s8309_s5, 7  ;;  %p9532_p6 = pneg %p9531_p3 }
 0x2ed   : > { %8899 = vmatprep.subr.mxu0 %v12525_v16  ;;  %8906 = vmatprep.subr.mxu1 %v12525_v16  ;;  %v2905_v55 = vld [vmem:[#allocation6 + $0xe0] sm:$0xff]  ;;  %v2907_v50 = vld [vmem:[#allocation6 + $0xf0] sm:$0xff]  ;;  %v2830_v44 = vld [vmem:[%s11563_s6 + $0x18] sm:$0xff]  ;;  %s12432_s9 = scalar_lea.hbm %s12616_s15, %s8620_s22 }
 0x2ee   : > { %v2875_v17 = vld [vmem:[%s11447_s17 + $0xe0] sm:$0xff]  ;;  %v2876_v5 = vld [vmem:[%s11447_s17 + $0xf0] sm:$0xff]  ;;  %v2832_v40 = vld [vmem:[%s11563_s6 + $0x28] sm:$0xff] }
 0x2ef   : > { %8890 = vmatmul.mubr.msk.f32.vlgmr.msra.gmra.mxu0 %vm2911_vm2, %v2863_v1  ;;  %8897 = vmatmul.mubr.msk.f32.vlgmr.msra.gmra.mxu1 %vm2911_vm2, %v2864_v51  ;;  %v2827_v12 = vld [vmem:[%s11563_s6] sm:$0xff]  ;;  %v2829_v56 = vld [vmem:[%s11563_s6 + $0x10] sm:$0xff]  ;;  %v2834_v46 = vld [vmem:[%s11563_s6 + $0x38] sm:$0xff] }
 0x2f0   : > { %8900 = vmatpush3.xpose.msk.msra.mxu0 %vm2911_vm2, %v2886_v0  ;;  %8907 = vmatpush3.xpose.msk.msra.mxu1 %vm2911_vm2, %v2888_v4  ;;  %v2810_v32 = vld [vmem:[%s11575_s1] sm:$0xff]  ;;  %v2812_v10 = vld [vmem:[%s11575_s1 + $0x10] sm:$0xff]  ;;  %v2811_v11 = vld [vmem:[%s11575_s1 + $0x8] sm:$0xff] }
 0x2f1   : > { %8901 = vmatprep.subr.mxu0 %v12525_v16  ;;  %8908 = vmatprep.subr.mxu1 %v12525_v16  ;;  %v2813_v35 = vld [vmem:[%s11575_s1 + $0x18] sm:$0xff]  ;;  %v2831_v9 = vld [vmem:[%s11563_s6 + $0x20] sm:$0xff]  ;;  %v2833_v42 = vld [vmem:[%s11563_s6 + $0x30] sm:$0xff] }
 0x2f2   : > { %8903 = vmatprep.mubr.msk.f32.mxu0 %vm9676_vm3, %v12525_v16  ;;  %8910 = vmatprep.mubr.msk.f32.mxu1 %vm9676_vm3, %v12525_v16  ;;  %v2814_v33 = vld [vmem:[%s11575_s1 + $0x20] sm:$0xff]  ;;  %v2816_v61 = vld [vmem:[%s11575_s1 + $0x30] sm:$0xff]  ;;  %v2836_v20 = vld [vmem:[%s11563_s6 + $0x48] sm:$0xff] }
 0x2f3   : > { %v2838_v36 = vld [vmem:[%s11563_s6 + $0x58] sm:$0xff]  ;;  %v2815_v31 = vld [vmem:[%s11575_s1 + $0x28] sm:$0xff]  ;;  %v2835_v63 = vld [vmem:[%s11563_s6 + $0x40] sm:$0xff] }
 0x2f4   : > { %8902 = vmatpush3.xpose.msk.msra.mxu0 %vm2911_vm2, %v2885_v6  ;;  %8909 = vmatpush3.xpose.msk.msra.mxu1 %vm2911_vm2, %v2887_v23  ;;  %v2817_v30 = vld [vmem:[%s11575_s1 + $0x38] sm:$0xff]  ;;  %v2818_v18 = vld [vmem:[%s11575_s1 + $0x40] sm:$0xff]  ;;  %v2837_v14 = vld [vmem:[%s11563_s6 + $0x50] sm:$0xff] }
 0x2f5   : > { %8913 = vmatprep.subr.mxu0 %v12525_v16  ;;  %8920 = vmatprep.subr.mxu1 %v12525_v16  ;;  %v2820_v24 = vld [vmem:[%s11575_s1 + $0x50] sm:$0xff]  ;;  %v2840_v47 = vld [vmem:[%s11563_s6 + $0x68] sm:$0xff]  ;;  %v2842_v15 = vld [vmem:[%s11563_s6 + $0x78] sm:$0xff] }
 0x2f6   : > { %v2819_v49 = vld [vmem:[%s11575_s1 + $0x48] sm:$0xff]  ;;  %v2821_v1 = vld [vmem:[%s11575_s1 + $0x58] sm:$0xff]  ;;  %v2839_v51 = vld [vmem:[%s11563_s6 + $0x60] sm:$0xff] }
 0x2f7   : > { %8904 = vmatmul.mubr.msk.f32.vlgmr.msra.gmra.mxu0 %vm2911_vm2, %v2865_v59  ;;  %8911 = vmatmul.mubr.msk.f32.vlgmr.msra.gmra.mxu1 %vm2911_vm2, %v2866_v52  ;;  %v2822_v0 = vld [vmem:[%s11575_s1 + $0x60] sm:$0xff]  ;;  %v2841_v4 = vld [vmem:[%s11563_s6 + $0x70] sm:$0xff]  ;;  %v2823_v23 = vld [vmem:[%s11575_s1 + $0x68] sm:$0xff] }
 0x2f8   : > { %8914 = vmatpush3.xpose.msk.msra.mxu0 %vm2911_vm2, %v2890_v58  ;;  %8921 = vmatpush3.xpose.msk.msra.mxu1 %vm2911_vm2, %v2892_v28  ;;  %v2824_v6 = vld [vmem:[%s11575_s1 + $0x70] sm:$0xff]  ;;  %v2825_v59 = vld [vmem:[%s11575_s1 + $0x78] sm:$0xff]  ;;  %v11662_v52 = vld [vmem:[%s2909_s19] sm:$0xff] }
 0x2f9   : > { %8915 = vmatprep.subr.mxu0 %v12525_v16  ;;  %8922 = vmatprep.subr.mxu1 %v12525_v16 }
 0x2fa   : > { %8917 = vmatprep.mubr.msk.f32.mxu0 %vm9676_vm3, %v12525_v16  ;;  %8924 = vmatprep.mubr.msk.f32.mxu1 %vm9676_vm3, %v12525_v16 }
 0x2fc   : > { %8916 = vmatpush3.xpose.msk.msra.mxu0 %vm2911_vm2, %v2889_v26  ;;  %8923 = vmatpush3.xpose.msk.msra.mxu1 %vm2911_vm2, %v2891_v8 }
 0x2fd   : > { %8927 = vmatprep.subr.mxu0 %v12525_v16  ;;  %8934 = vmatprep.subr.mxu1 %v12525_v16 }
 0x2ff   : > { %8918 = vmatmul.mubr.msk.f32.vlgmr.msra.gmra.mxu0 %vm2911_vm2, %v2867_v43  ;;  %8925 = vmatmul.mubr.msk.f32.vlgmr.msra.gmra.mxu1 %vm2911_vm2, %v2868_v25 }
 0x300   : > { %8928 = vmatpush3.xpose.msk.msra.mxu0 %vm2911_vm2, %v2894_v27  ;;  %8935 = vmatpush3.xpose.msk.msra.mxu1 %vm2911_vm2, %v2896_v22 }
 0x301   : > { %8929 = vmatprep.subr.mxu0 %v12525_v16  ;;  %8936 = vmatprep.subr.mxu1 %v12525_v16 }
 0x302   : > { %8931 = vmatprep.mubr.msk.f32.mxu0 %vm9676_vm3, %v12525_v16  ;;  %8938 = vmatprep.mubr.msk.f32.mxu1 %vm9676_vm3, %v12525_v16 }
 0x304   : > { %8930 = vmatpush3.xpose.msk.msra.mxu0 %vm2911_vm2, %v2893_v53  ;;  %8937 = vmatpush3.xpose.msk.msra.mxu1 %vm2911_vm2, %v2895_v41 }
 0x305   : > { %8941 = vmatprep.subr.mxu0 %v12525_v16  ;;  %8948 = vmatprep.subr.mxu1 %v12525_v16 }
 0x307   : > { %8932 = vmatmul.mubr.msk.f32.vlgmr.msra.gmra.mxu0 %vm2911_vm2, %v2869_v29  ;;  %8939 = vmatmul.mubr.msk.f32.vlgmr.msra.gmra.mxu1 %vm2911_vm2, %v2870_v45 }
 0x308   : > { %8942 = vmatpush3.xpose.msk.msra.mxu0 %vm2911_vm2, %v2898_v37  ;;  %8949 = vmatpush3.xpose.msk.msra.mxu1 %vm2911_vm2, %v2900_v54 }
 0x309   : > { %8943 = vmatprep.subr.mxu0 %v12525_v16  ;;  %8950 = vmatprep.subr.mxu1 %v12525_v16 }
 0x30a   : > { %8945 = vmatprep.mubr.msk.f32.mxu0 %vm9676_vm3, %v12525_v16  ;;  %8952 = vmatprep.mubr.msk.f32.mxu1 %vm9676_vm3, %v12525_v16 }
 0x30c   : > { %8944 = vmatpush3.xpose.msk.msra.mxu0 %vm2911_vm2, %v2897_v60  ;;  %8951 = vmatpush3.xpose.msk.msra.mxu1 %vm2911_vm2, %v2899_v3 }
 0x30d   : > { %8955 = vmatprep.subr.mxu0 %v12525_v16  ;;  %8962 = vmatprep.subr.mxu1 %v12525_v16 }
 0x30f   : > { %8946 = vmatmul.mubr.msk.f32.vlgmr.msra.gmra.mxu0 %vm2911_vm2, %v2871_v13  ;;  %8953 = vmatmul.mubr.msk.f32.vlgmr.msra.gmra.mxu1 %vm2911_vm2, %v2872_v39 }
 0x310   : > { %8956 = vmatpush3.xpose.msk.msra.mxu0 %vm2911_vm2, %v2902_v2  ;;  %8963 = vmatpush3.xpose.msk.msra.mxu1 %vm2911_vm2, %v2904_v34 }
 0x311   : > { %8957 = vmatprep.subr.mxu0 %v12525_v16  ;;  %8964 = vmatprep.subr.mxu1 %v12525_v16 }
 0x312   : > { %8959 = vmatprep.mubr.msk.f32.mxu0 %vm9676_vm3, %v12525_v16  ;;  %8966 = vmatprep.mubr.msk.f32.mxu1 %vm9676_vm3, %v12525_v16 }
 0x314   : > { %8958 = vmatpush3.xpose.msk.msra.mxu0 %vm2911_vm2, %v2901_v7  ;;  %8965 = vmatpush3.xpose.msk.msra.mxu1 %vm2911_vm2, %v2903_v19 }
 0x315   : > { %8969 = vmatprep.subr.mxu0 %v12525_v16  ;;  %8976 = vmatprep.subr.mxu1 %v12525_v16 }
 0x317   : > { %8960 = vmatmul.mubr.msk.f32.vlgmr.msra.gmra.mxu0 %vm2911_vm2, %v2873_v57  ;;  %8967 = vmatmul.mubr.msk.f32.vlgmr.msra.gmra.mxu1 %vm2911_vm2, %v2874_v62 }
 0x318   : > { %8970 = vmatpush3.xpose.msk.msra.mxu0 %vm2911_vm2, %v2906_v38  ;;  %8977 = vmatpush3.xpose.msk.msra.mxu1 %vm2911_vm2, %v2908_v48 }
 0x319   : > { %8971 = vmatprep.subr.mxu0 %v12525_v16  ;;  %8978 = vmatprep.subr.mxu1 %v12525_v16 }
 0x31a   : > { %8973 = vmatprep.mubr.msk.f32.mxu0 %vm9676_vm3, %v12525_v16  ;;  %8980 = vmatprep.mubr.msk.f32.mxu1 %vm9676_vm3, %v12525_v16 }
 0x31c   : > { %8972 = vmatpush3.xpose.msk.msra.mxu0 %vm2911_vm2, %v2905_v55  ;;  %8979 = vmatpush3.xpose.msk.msra.mxu1 %vm2911_vm2, %v2907_v50 }
 0x31d   : > { %8983 = vmatprep.subr.msk.mxu0 %vm2911_vm2, %v2828_v21  ;;  %8990 = vmatprep.subr.msk.mxu1 %vm2911_vm2, %v2830_v44 }
 0x31f   : > { %8974 = vmatmul.mubr.msk.f32.vlgmr.msra.gmra.mxu0 %vm2911_vm2, %v2875_v17  ;;  %8981 = vmatmul.mubr.msk.f32.vlgmr.msra.gmra.mxu1 %vm2911_vm2, %v2876_v5 }
 0x320   : > { %8984 = vmatpush3.xpose.msk.msra.mxu0 %vm2911_vm2, %v2828_v21  ;;  %8991 = vmatpush3.xpose.msk.msra.mxu1 %vm2911_vm2, %v2830_v44 }
 0x321   : > { %8985 = vmatprep.subr.msk.mxu0 %vm2911_vm2, %v2827_v12  ;;  %8987 = vmatprep.mubr.msk.f32.mxu0 %vm2911_vm2, %v2810_v32 }
 0x322   : > { %8992 = vmatprep.subr.msk.mxu1 %vm2911_vm2, %v2829_v56  ;;  %8994 = vmatprep.mubr.msk.f32.mxu1 %vm2911_vm2, %v2812_v10 }
 0x324   : > { %8986 = vmatpush3.xpose.msk.msra.mxu0 %vm2911_vm2, %v2827_v12  ;;  %8993 = vmatpush3.xpose.msk.msra.mxu1 %vm2911_vm2, %v2829_v56 }
 0x325   : > { %8997 = vmatprep.subr.msk.mxu0 %vm2911_vm2, %v2832_v40  ;;  %9004 = vmatprep.subr.msk.mxu1 %vm2911_vm2, %v2834_v46 }
 0x327   : > { %8988 = vmatmul.mubr.msk.f32.vlgmr.msra.gmra.mxu0 %vm2911_vm2, %v2811_v11  ;;  %8995 = vmatmul.mubr.msk.f32.vlgmr.msra.gmra.mxu1 %vm2911_vm2, %v2813_v35 }
 0x328   : > { %8998 = vmatpush3.xpose.msk.msra.mxu0 %vm2911_vm2, %v2832_v40  ;;  %9005 = vmatpush3.xpose.msk.msra.mxu1 %vm2911_vm2, %v2834_v46 }
 0x329   : > { %8999 = vmatprep.subr.msk.mxu0 %vm2911_vm2, %v2831_v9  ;;  %9001 = vmatprep.mubr.msk.f32.mxu0 %vm2911_vm2, %v2814_v33 }
 0x32a   : > { %9006 = vmatprep.subr.msk.mxu1 %vm2911_vm2, %v2833_v42  ;;  %9008 = vmatprep.mubr.msk.f32.mxu1 %vm2911_vm2, %v2816_v61 }
 0x32c   : > { %9000 = vmatpush3.xpose.msk.msra.mxu0 %vm2911_vm2, %v2831_v9  ;;  %9007 = vmatpush3.xpose.msk.msra.mxu1 %vm2911_vm2, %v2833_v42 }
 0x32d   : > { %9011 = vmatprep.subr.msk.mxu0 %vm2911_vm2, %v2836_v20  ;;  %9018 = vmatprep.subr.msk.mxu1 %vm2911_vm2, %v2838_v36 }
 0x32f   : > { %9002 = vmatmul.mubr.msk.f32.vlgmr.msra.gmra.mxu0 %vm2911_vm2, %v2815_v31  ;;  %9009 = vmatmul.mubr.msk.f32.vlgmr.msra.gmra.mxu1 %vm2911_vm2, %v2817_v30 }
 0x330   : > { %9012 = vmatpush3.xpose.msk.msra.mxu0 %vm2911_vm2, %v2836_v20  ;;  %9019 = vmatpush3.xpose.msk.msra.mxu1 %vm2911_vm2, %v2838_v36 }
 0x331   : > { %9013 = vmatprep.subr.msk.mxu0 %vm2911_vm2, %v2835_v63  ;;  %9015 = vmatprep.mubr.msk.f32.mxu0 %vm2911_vm2, %v2818_v18 }
 0x332   : > { %9020 = vmatprep.subr.msk.mxu1 %vm2911_vm2, %v2837_v14  ;;  %9022 = vmatprep.mubr.msk.f32.mxu1 %vm2911_vm2, %v2820_v24 }
 0x334   : > { %9014 = vmatpush3.xpose.msk.msra.mxu0 %vm2911_vm2, %v2835_v63  ;;  %9021 = vmatpush3.xpose.msk.msra.mxu1 %vm2911_vm2, %v2837_v14 }
 0x335   : > { %9025 = vmatprep.subr.msk.mxu0 %vm2911_vm2, %v2840_v47  ;;  %9032 = vmatprep.subr.msk.mxu1 %vm2911_vm2, %v2842_v15 }
 0x337   : > { %9016 = vmatmul.mubr.msk.f32.vlgmr.msra.gmra.mxu0 %vm2911_vm2, %v2819_v49  ;;  %9023 = vmatmul.mubr.msk.f32.vlgmr.msra.gmra.mxu1 %vm2911_vm2, %v2821_v1 }
 0x338   : > { %9026 = vmatpush3.xpose.msk.msra.mxu0 %vm2911_vm2, %v2840_v47  ;;  %9033 = vmatpush3.xpose.msk.msra.mxu1 %vm2911_vm2, %v2842_v15 }
 0x339   : > { %9027 = vmatprep.subr.msk.mxu0 %vm2911_vm2, %v2839_v51  ;;  %9029 = vmatprep.mubr.msk.f32.mxu0 %vm2911_vm2, %v2822_v0 }
 0x33a   : > { %9034 = vmatprep.subr.msk.mxu1 %vm2911_vm2, %v2841_v4  ;;  %9036 = vmatprep.mubr.msk.f32.mxu1 %vm2911_vm2, %v2824_v6 }
 0x33c   : > { %9028 = vmatpush3.xpose.msk.msra.mxu0 %vm2911_vm2, %v2839_v51  ;;  %9035 = vmatpush3.xpose.msk.msra.mxu1 %vm2911_vm2, %v2841_v4 }
 0x33d   : > { %9039 = vmatprep.subr.mxu0 %v12525_v16  ;;  %9046 = vmatprep.subr.mxu1 %v12525_v16 }
 0x33f   : > { %9030 = vmatmul.mubr.msk.f32.vlgmr.msra.gmra.mxu0 %vm2911_vm2, %v2823_v23  ;;  %9037 = vmatmul.mubr.msk.f32.vlgmr.msra.gmra.mxu1 %vm2911_vm2, %v2825_v59 }
 0x340   : > { %9043 = vmatprep.mubr.msk.f32.mxu0 %vm9676_vm3, %v12525_v16  ;;  %9050 = vmatprep.mubr.msk.f32.mxu1 %vm9676_vm3, %v12525_v16 }
 0x3a7   : > { %v2987_v58 = vpop.f32.mrf.mxu0  ;;  %v3066_v28 = vpop.f32.mrf.mxu1 }
 0x3a8   : > { %v11665_v26 = vadd.f32 %v2987_v58, %v11662_v52  ;;  %v11668_v25 = vadd.f32 %v3066_v28, %v11662_v52 }
 0x3a9   : > { %v8877_v8 = vpop.f32.mrf.mxu0  ;;  %v8884_v43 = vpop.f32.mrf.mxu1 }
 0x3aa   : > { %v4873_v27 = vsel %vm4872_vm4, %v11665_v26, -inf  ;;  %v4876_v22 = vsel %vm4872_vm4, %v11668_v25, -inf }
 0x3ab   : > { %4874 = vmax.xlane.f32.xlu0 %v4873_v27 }
 0x3af   : > { %v3224_v53 = vpop.f32.mrf.mxu1  ;;  %4877 = vmax.xlane.f32.xlu0 %v4876_v22  ;;  %v3145_v41 = vpop.f32.mrf.mxu0 }
 0x3b0   : > { %v11675_v29 = vadd.f32 %v3145_v41, %v11662_v52  ;;  %v11678_v54 = vadd.f32 %v3224_v53, %v11662_v52 }
 0x3b1   : > { %v8891_v45 = vpop.f32.mrf.mxu0  ;;  %v8898_v37 = vpop.f32.mrf.mxu1 }
 0x3b2   : > { %v4879_v60 = vsel %vm4872_vm4, %v11675_v29, -inf  ;;  %v4882_v3 = vsel %vm4872_vm4, %v11678_v54, -inf }
 0x3b3   : > { %4880 = vmax.xlane.f32.xlu1 %v4879_v60 }
 0x3b7   : > { %v3382_v13 = vpop.f32.mrf.mxu1  ;;  %4883 = vmax.xlane.f32.xlu1 %v4882_v3  ;;  %v3303_v39 = vpop.f32.mrf.mxu0 }
 0x3b8   : > { %v11685_v2 = vadd.f32 %v3303_v39, %v11662_v52  ;;  %v11688_v19 = vadd.f32 %v3382_v13, %v11662_v52 }
 0x3b9   : > { %v8905_v34 = vpop.f32.mrf.mxu0  ;;  %v8912_v7 = vpop.f32.mrf.mxu1 }
 0x3ba   : > { %v4885_v57 = vsel %vm4872_vm4, %v11685_v2, -inf  ;;  %v4888_v62 = vsel %vm4872_vm4, %v11688_v19, -inf }
 0x3bb   : > { %4886 = vmax.xlane.f32.xlu0 %v4885_v57 }
 0x3bf   : > { %v3540_v38 = vpop.f32.mrf.mxu1  ;;  %4889 = vmax.xlane.f32.xlu0 %v4888_v62  ;;  %v3461_v48 = vpop.f32.mrf.mxu0 }
 0x3c0   : > { %v11695_v55 = vadd.f32 %v3461_v48, %v11662_v52  ;;  %v11698_v44 = vadd.f32 %v3540_v38, %v11662_v52 }
 0x3c1   : > { %v8919_v50 = vpop.f32.mrf.mxu0  ;;  %v8926_v21 = vpop.f32.mrf.mxu1 }
 0x3c2   : > { %v4891_v17 = vsel %vm4872_vm4, %v11695_v55, -inf  ;;  %v4894_v5 = vsel %vm4872_vm4, %v11698_v44, -inf }
 0x3c3   : > { %4892 = vmax.xlane.f32.xlu0 %v4891_v17 }
 0x3c7   : > { %v3698_v12 = vpop.f32.mrf.mxu1  ;;  %4895 = vmax.xlane.f32.xlu0 %v4894_v5  ;;  %v3619_v32 = vpop.f32.mrf.mxu0 }
 0x3c8   : > { %v11705_v56 = vadd.f32 %v3698_v12, %v11662_v52  ;;  %v11708_v10 = vadd.f32 %v3619_v32, %v11662_v52 }
 0x3c9   : > { %v8933_v40 = vpop.f32.mrf.mxu0  ;;  %v8940_v46 = vpop.f32.mrf.mxu1 }
 0x3ca   : > { %v4900_v11 = vsel %vm4872_vm4, %v11705_v56, -inf  ;;  %v4897_v35 = vsel %vm4872_vm4, %v11708_v10, -inf }
 0x3cb   : > { %4901 = vmax.xlane.f32.xlu1 %v4900_v11  ;;  %4898 = vmax.xlane.f32.xlu0 %v4897_v35 }
 0x3cf   : > { %v3777_v9 = vpop.f32.mrf.mxu0  ;;  %v3856_v33 = vpop.f32.mrf.mxu1 }
 0x3d0   : > { %v11715_v42 = vadd.f32 %v3777_v9, %v11662_v52  ;;  %v11718_v36 = vadd.f32 %v3856_v33, %v11662_v52 }
 0x3d1   : > { %v8947_v61 = vpop.f32.mrf.mxu0  ;;  %v8954_v20 = vpop.f32.mrf.mxu1 }
 0x3d2   : > { %v4903_v31 = vsel %vm4872_vm4, %v11715_v42, -inf  ;;  %v4906_v30 = vsel %vm4872_vm4, %v11718_v36, -inf }
 0x3d3   : > { %4904 = vmax.xlane.f32.xlu1 %v4903_v31  ;;  %v4937_v31 = vlaneseq }
 0x3d7   : > { %v4014_v63 = vpop.f32.mrf.mxu1  ;;  %4907 = vmax.xlane.f32.xlu1 %v4906_v30  ;;  %v3935_v18 = vpop.f32.mrf.mxu0 }
 0x3d8   : > { %v11725_v14 = vadd.f32 %v3935_v18, %v11662_v52  ;;  %v11728_v15 = vadd.f32 %v4014_v63, %v11662_v52  ;;  %v4938_v18 = vand.u32 127, %v4937_v31 }
 0x3d9   : > { %v8961_v24 = vpop.f32.mrf.mxu0  ;;  %v8968_v47 = vpop.f32.mrf.mxu1 }
 0x3da   : > { %v4909_v49 = vsel %vm4872_vm4, %v11725_v14, -inf  ;;  %v4912_v1 = vsel %vm4872_vm4, %v11728_v15, -inf  ;;  %v11808_v24 = vshrl.u32 %v4937_v31, 7 }
 0x3db   : > { %4910 = vmax.xlane.f32.xlu1 %v4909_v49 }
 0x3dc   : > { %12604 = vst [vmem:[#allocation39_spill] sm:$0xff] %v11808_v24  ;;  %v11811_v49 = vsub.s32 %v4938_v18, %v11808_v24 }
 0x3df   : > { %v4172_v51 = vpop.f32.mrf.mxu1  ;;  %4913 = vmax.xlane.f32.xlu1 %v4912_v1  ;;  %v4093_v0 = vpop.f32.mrf.mxu0 }
 0x3e0   : > { %v11735_v4 = vadd.f32 %v4172_v51, %v11662_v52  ;;  %v11738_v6 = vadd.f32 %v4093_v0, %v11662_v52 }
 0x3e1   : > { %v8975_v23 = vpop.f32.mrf.mxu0  ;;  %v8982_v59 = vpop.f32.mrf.mxu1 }
 0x3e2   : > { %v4915_v58 = vsel %vm4872_vm4, %v11738_v6, -inf  ;;  %v4918_v28 = vsel %vm4872_vm4, %v11735_v4, -inf }
 0x3e3   : > { %4916 = vmax.xlane.f32.xlu0 %v4915_v58  ;;  %4919 = vmax.xlane.f32.xlu1 %v4918_v28 }
 0x3e7   : > { %v11744_v8 = vpop.f32.mrf.mxu0  ;;  %v11746_v43 = vpop.f32.mrf.mxu1 }
 0x3e8   : > { %v5061_v27 = vsel %vm4872_vm4, %v11744_v8, -inf  ;;  %v5067_v41 = vsel %vm4872_vm4, %v11746_v43, -inf }
 0x3e9   : > { %v11750_v22 = vpop.f32.mrf.mxu0  ;;  %5062 = vmax.xlane.f32.xlu1 %v5061_v27  ;;  %v11752_v52 = vpop.f32.mrf.mxu1 }
 0x3ea   : > { %v5058_v53 = vsel %vm4872_vm4, %v11750_v22, -inf  ;;  %v5064_v45 = vsel %vm4872_vm4, %v11752_v52, -inf }
 0x3eb   : > { %5059 = vmax.xlane.f32.xlu0 %v5058_v53 }
 0x3ed   : > { %5068 = vmax.xlane.f32.xlu1 %v5067_v41 }
 0x3ef   : > { %5065 = vmax.xlane.f32.xlu0 %v5064_v45  ;;  %v11760_v37 = vpop.f32.mrf.mxu0  ;;  %v11762_v60 = vpop.f32.mrf.mxu1 }
 0x3f0   : > { %v5073_v3 = vsel %vm4872_vm4, %v11760_v37, -inf  ;;  %v5079_v7 = vsel %vm4872_vm4, %v11762_v60, -inf }
 0x3f1   : > { %v11766_v13 = vpop.f32.mrf.mxu0  ;;  %5074 = vmax.xlane.f32.xlu1 %v5073_v3  ;;  %v11768_v39 = vpop.f32.mrf.mxu1 }
 0x3f2   : > { %v5070_v34 = vsel %vm4872_vm4, %v11766_v13, -inf  ;;  %v5076_v57 = vsel %vm4872_vm4, %v11768_v39, -inf }
 0x3f3   : > { %5071 = vmax.xlane.f32.xlu0 %v5070_v34 }
 0x3f5   : > { %5080 = vmax.xlane.f32.xlu1 %v5079_v7 }
 0x3f7   : > { %5077 = vmax.xlane.f32.xlu0 %v5076_v57  ;;  %v11776_v62 = vpop.f32.mrf.mxu0  ;;  %v11778_v38 = vpop.f32.mrf.mxu1 }
 0x3f8   : > { %v5085_v48 = vsel %vm4872_vm4, %v11776_v62, -inf  ;;  %v5091_v5 = vsel %vm4872_vm4, %v11778_v38, -inf }
 0x3f9   : > { %v11782_v50 = vpop.f32.mrf.mxu0  ;;  %5086 = vmax.xlane.f32.xlu1 %v5085_v48  ;;  %v11784_v21 = vpop.f32.mrf.mxu1 }
 0x3fa   : > { %v5082_v17 = vsel %vm4872_vm4, %v11782_v50, -inf  ;;  %v5088_v12 = vsel %vm4872_vm4, %v11784_v21, -inf }
 0x3fb   : > { %5083 = vmax.xlane.f32.xlu0 %v5082_v17 }
 0x3fd   : > { %5092 = vmax.xlane.f32.xlu1 %v5091_v5 }
 0x3ff   : > { %5089 = vmax.xlane.f32.xlu0 %v5088_v12  ;;  %v11792_v32 = vpop.f32.mrf.mxu0  ;;  %v11794_v40 = vpop.f32.mrf.mxu1 }
 0x400   : > { %v5097_v46 = vsel %vm4872_vm4, %v11792_v32, -inf  ;;  %v5103_v33 = vsel %vm4872_vm4, %v11794_v40, -inf }
 0x401   : > { %v11798_v11 = vpop.f32.mrf.mxu0  ;;  %5098 = vmax.xlane.f32.xlu1 %v5097_v46  ;;  %v11800_v35 = vpop.f32.mrf.mxu1 }
 0x402   : > { %v5094_v9 = vsel %vm4872_vm4, %v11798_v11, -inf  ;;  %v5100_v61 = vsel %vm4872_vm4, %v11800_v35, -inf }
 0x403   : > { %5095 = vmax.xlane.f32.xlu0 %v5094_v9 }
 0x405   : > { %5104 = vmax.xlane.f32.xlu1 %v5103_v33 }
 0x407   : > { %5101 = vmax.xlane.f32.xlu0 %v5100_v61 }
 0x434   : > { %v4875_v20 = vpop.xlane.xlu0 %4874 }
 0x435   : > { %v4942_v59 = vrot.slane %v4875_v20, %v11811_v49 }
 0x438   : > { %v4878_v30 = vpop.xlane.xlu0 %4877 }
 0x439   : > { %v4946_v0 = vrot.slane %v4878_v30, %v11811_v49 }
 0x43b   : > { %v5004_v53 = vsel %vm5003_vm5, %v4946_v0, %v4942_v59 }
 0x43c   : > { %v4881_v63 = vpop.xlane.xlu1 %4880 }
 0x43d   : > { %v4950_v23 = vrot.slane %v4881_v63, %v11811_v49 }
 0x43f   : > { %v5006_v45 = vsel %vm5005_vm6, %v4950_v23, %v5004_v53 }
 0x440   : > { %v4884_v1 = vpop.xlane.xlu1 %4883 }
 0x441   : > { %v4954_v58 = vrot.slane %v4884_v1, %v11811_v49 }
 0x443   : > { %v5008_v34 = vsel %vm5007_vm7, %v4954_v58, %v5006_v45 }
 0x444   : > { %v4887_v47 = vpop.xlane.xlu0 %4886 }
 0x445   : > { %v4958_v28 = vrot.slane %v4887_v47, %v11811_v49 }
 0x447   : > { %v5010_v7 = vsel %vm5009_vm8, %v4958_v28, %v5008_v34 }
 0x448   : > { %v4890_v51 = vpop.xlane.xlu0 %4889 }
 0x449   : > { %v4962_v41 = vrot.slane %v4890_v51, %v11811_v49 }
 0x44b   : > { %v5012_v17 = vsel %vm5011_vm9, %v4962_v41, %v5010_v7 }
 0x44c   : > { %v4893_v27 = vpop.xlane.xlu0 %4892 }
 0x44d   : > { %v4966_v3 = vrot.slane %v4893_v27, %v11811_v49 }
 0x44f   : > { %v5014_v5 = vsel %vm5013_vm10, %v4966_v3, %v5012_v17 }
 0x450   : > { %v4896_v57 = vpop.xlane.xlu0 %4895 }
 0x451   : > { %v4970_v48 = vrot.slane %v4896_v57, %v11811_v49 }
 0x453   : > { %v5016_v12 = vsel %vm5015_vm11, %v4970_v48, %v5014_v5 }
 0x454   : > { %5026 = vxpose.xlu0.b32.start [1/2] (short) (narrow) %v5016_v12, 8  ;;  %v4902_v46 = vpop.xlane.xlu1 %4901  ;;  %v4899_v61 = vpop.xlane.xlu0 %4898 }
 0x455   : > { %v4978_v31 = vrot.slane %v4902_v46, %v11811_v49  ;;  %v4974_v30 = vrot.slane %v4899_v61, %v11811_v49  ;;  %v5126_v61 = vadd.s32 4294967288, %v4938_v18 }
 0x457   : > { %v5017_v0 = vsel %vm5003_vm5, %v4978_v31, %v4974_v30 }
 0x45c   : > { %v4905_v9 = vpop.xlane.xlu1 %4904 }
 0x45d   : > { %v4982_v63 = vrot.slane %v4905_v9, %v11811_v49 }
 0x45f   : > { %v5018_v59 = vsel %vm5005_vm6, %v4982_v63, %v5017_v0 }
 0x460   : > { %v4908_v33 = vpop.xlane.xlu1 %4907 }
 0x461   : > { %v4986_v47 = vrot.slane %v4908_v33, %v11811_v49 }
 0x463   : > { %v5019_v58 = vsel %vm5007_vm7, %v4986_v47, %v5018_v59 }
 0x464   : > { %v4911_v20 = vpop.xlane.xlu1 %4910 }
 0x465   : > { %v4990_v51 = vrot.slane %v4911_v20, %v11811_v49  ;;  %v11844_v20 = vsub.s32 %v5126_v61, %v11808_v24 }
 0x467   : > { %v5020_v53 = vsel %vm5009_vm8, %v4990_v51, %v5019_v58 }
 0x468   : > { %v4914_v1 = vpop.xlane.xlu1 %4913 }
 0x469   : > { %v4994_v23 = vrot.slane %v4914_v1, %v11811_v49 }
 0x46b   : > { %v5021_v3 = vsel %vm5011_vm9, %v4994_v23, %v5020_v53 }
 0x46c   : > { %v4917_v28 = vpop.xlane.xlu0 %4916  ;;  %v4920_v27 = vpop.xlane.xlu1 %4919 }
 0x46d   : > { %v4998_v41 = vrot.slane %v4917_v28, %v11811_v49  ;;  %v5002_v45 = vrot.slane %v4920_v27, %v11811_v49 }
 0x46f   : > { %v5022_v34 = vsel %vm5013_vm10, %v4998_v41, %v5021_v3 }
 0x470   : > { %v5023_v7 = vsel %vm5015_vm11, %v5002_v45, %v5022_v34 }
 0x471   : > { %5027 = vxpose.xlu0.b32.end [2/2] (short) (narrow) %v5023_v7, 8 }
 0x472   : > { %v5063_v57 = vpop.xlane.xlu1 %5062 }
 0x473   : > { %v5130_v63 = vrot.slane %v5063_v57, %v11844_v20 }
 0x474   : > { %v5060_v48 = vpop.xlane.xlu0 %5059 }
 0x475   : > { %v5125_v47 = vrot.slane %v5060_v48, %v11811_v49 }
 0x476   : > { %v5069_v17 = vpop.xlane.xlu1 %5068 }
 0x477   : > { %v5140_v1 = vrot.slane %v5069_v17, %v11844_v20  ;;  %v5132_v58 = vsel %vm5131_vm12, %v5130_v63, %v5125_v47 }
 0x478   : > { %v5066_v5 = vpop.xlane.xlu0 %5065 }
 0x479   : > { %v5136_v51 = vrot.slane %v5066_v5, %v11811_v49 }
 0x47a   : > { %v5075_v12 = vpop.xlane.xlu1 %5074 }
 0x47b   : > { %v5149_v0 = vrot.slane %v5075_v12, %v11844_v20  ;;  %v5141_v28 = vsel %vm5131_vm12, %v5140_v1, %v5136_v51 }
 0x47c   : > { %v5072_v46 = vpop.xlane.xlu0 %5071  ;;  %v5196_v41 = vsel %vm5003_vm5, %v5141_v28, %v5132_v58  ;;  %v11877_v58 = vsub.s32 0, %v11808_v24 }
 0x47d   : > { %v5145_v23 = vrot.slane %v5072_v46, %v11811_v49 }
 0x47e   : > { %v5081_v9 = vpop.xlane.xlu1 %5080 }
 0x47f   : > { %v5158_v27 = vrot.slane %v5081_v9, %v11844_v20  ;;  %v5150_v45 = vsel %vm5131_vm12, %v5149_v0, %v5145_v23 }
 0x480   : > { %v5078_v33 = vpop.xlane.xlu0 %5077  ;;  %v5197_v48 = vsel %vm5005_vm6, %v5150_v45, %v5196_v41  ;;  %v11882_v45 = vsub.s32 1, %v11808_v24 }
 0x481   : > { %v5154_v53 = vrot.slane %v5078_v33, %v11811_v49 }
 0x482   : > { %v5087_v31 = vpop.xlane.xlu1 %5086 }
 0x483   : > { %v5167_v3 = vrot.slane %v5087_v31, %v11844_v20  ;;  %v5159_v17 = vsel %vm5131_vm12, %v5158_v27, %v5154_v53 }
 0x484   : > { %v5084_v30 = vpop.xlane.xlu0 %5083  ;;  %v5198_v46 = vsel %vm5007_vm7, %v5159_v17, %v5197_v48  ;;  %v11890_v48 = vsub.s32 4, %v11808_v24 }
 0x485   : > { %v5163_v34 = vrot.slane %v5084_v30, %v11811_v49 }
 0x486   : > { %v5093_v59 = vpop.xlane.xlu1 %5092 }
 0x487   : > { %v5176_v5 = vrot.slane %v5093_v59, %v11844_v20  ;;  %v5168_v9 = vsel %vm5131_vm12, %v5167_v3, %v5163_v34 }
 0x488   : > { %v5090_v18 = vpop.xlane.xlu0 %5089  ;;  %v5199_v47 = vsel %vm5009_vm8, %v5168_v9, %v5198_v46  ;;  %v11898_v46 = vsub.s32 5, %v11808_v24 }
 0x489   : > { %v5172_v12 = vrot.slane %v5090_v18, %v11811_v49 }
 0x48a   : > { %v5099_v7 = vpop.xlane.xlu1 %5098 }
 0x48b   : > { %v5185_v33 = vrot.slane %v5099_v7, %v11844_v20  ;;  %v5177_v63 = vsel %vm5131_vm12, %v5176_v5, %v5172_v12  ;;  %v11895_v12 = vsub.s32 3, %v11808_v24 }
 0x48c   : > { %v5096_v57 = vpop.xlane.xlu0 %5095  ;;  %v5200_v23 = vsel %vm5011_vm9, %v5177_v63, %v5199_v47  ;;  %v11908_v47 = vsub.s32 7, %v11808_v24 }
 0x48d   : > { %v5181_v61 = vrot.slane %v5096_v57, %v11811_v49  ;;  %v11887_v57 = vsub.s32 2, %v11808_v24 }
 0x48e   : > { %v5105_v31 = vpop.xlane.xlu1 %5104 }
 0x48f   : > { %v5194_v1 = vrot.slane %v5105_v31, %v11844_v20  ;;  %v5186_v0 = vsel %vm5131_vm12, %v5185_v33, %v5181_v61 }
 0x490   : > { %v5102_v30 = vpop.xlane.xlu0 %5101  ;;  %v5201_v18 = vsel %vm5013_vm10, %v5186_v0, %v5200_v23 }
 0x491   : > { %v5190_v51 = vrot.slane %v5102_v30, %v11811_v49  ;;  %v11904_v30 = vsub.s32 6, %v11808_v24 }
 0x493   : > { %v5195_v59 = vsel %vm5131_vm12, %v5194_v1, %v5190_v51 }
 0x494   : > { %v5202_v28 = vsel %vm5015_vm11, %v5195_v59, %v5201_v18 }
 0x4e9   : > { %v5042_v27 = vpop.trf.xlu0 }
 0x4ea   : > { %v5204_v53 = vmax.f32 %v5042_v27, %v5202_v28 }
 0x4ec   : > { %5205 = vxpose.xlu1.b32.start.end [1/1] (short) (narrow) %v5204_v53, 16  ;;  %v5400_v41 = vrot.slane %v5204_v53, %v11877_v58  ;;  %v5411_v27 = vrot.slane %v5204_v53, %v11882_v45 }
 0x4ee   : > { %5402 = vbcast.lane.b32.xlu0 %v5400_v41, 256 }
 0x568   : > { %v5221_v3 = vpop.trf.xlu1 }
 0x569   : > { %v5247_v34 = vrot.slane %v5221_v3, %v11882_v45  ;;  %v5240_v7 = vrot.slane %v5221_v3, %v11877_v58  ;;  %v5254_v17 = vrot.slane %v5221_v3, %v11887_v57  ;;  %v5268_v5 = vrot.slane %v5221_v3, %v11890_v48 }
 0x56a   : > { %v5261_v33 = vrot.slane %v5221_v3, %v11895_v12  ;;  %v5275_v61 = vrot.slane %v5221_v3, %v11898_v46  ;;  %v5282_v63 = vrot.slane %v5221_v3, %v11904_v30  ;;  %v5289_v51 = vrot.slane %v5221_v3, %v11908_v47 }
 0x56b   : > { %5249 = vbcast.lane.b32.xlu1 %v5247_v34, 256  ;;  %5242 = vbcast.lane.b32.xlu0 %v5240_v7, 256  ;;  %v5422_v34 = vrot.slane %v5204_v53, %v11887_v57  ;;  %v5433_v7 = vrot.slane %v5204_v53, %v11895_v12 }
 0x56c   : > { %v5222_v9 = vpop.trf.xlu1 }
 0x56d   : > { %v5303_v31 = vrot.slane %v5222_v9, %v11882_v45  ;;  %v5310_v1 = vrot.slane %v5222_v9, %v11887_v57  ;;  %v5317_v0 = vrot.slane %v5222_v9, %v11895_v12  ;;  %v5296_v23 = vrot.slane %v5222_v9, %v11877_v58 }
 0x56e   : > { %v5324_v59 = vrot.slane %v5222_v9, %v11890_v48  ;;  %v5338_v18 = vrot.slane %v5222_v9, %v11904_v30  ;;  %v5331_v28 = vrot.slane %v5222_v9, %v11898_v46  ;;  %v5345_v3 = vrot.slane %v5222_v9, %v11908_v47 }
 0x56f   : > { %5256 = vbcast.lane.b32.xlu1 %v5254_v17, 256  ;;  %5270 = vbcast.lane.b32.xlu0 %v5268_v5, 256  ;;  %v5444_v17 = vrot.slane %v5204_v53, %v11890_v48  ;;  %v5455_v5 = vrot.slane %v5204_v53, %v11898_v46  ;;  %v5477_v9 = vrot.slane %v5204_v53, %v11908_v47 }
 0x573   : > { %5263 = vbcast.lane.b32.xlu1 %v5261_v33, 256  ;;  %5277 = vbcast.lane.b32.xlu0 %v5275_v61, 256  ;;  %v5466_v33 = vrot.slane %v5204_v53, %v11904_v30  ;;  %v5403_v61 = vpop.permute.xlu0 %5402 }
 0x577   : > { %5305 = vbcast.lane.b32.xlu1 %v5303_v31, 256  ;;  %5284 = vbcast.lane.b32.xlu0 %v5282_v63, 256 }
 0x57b   : > { %5312 = vbcast.lane.b32.xlu1 %v5310_v1, 256  ;;  %5291 = vbcast.lane.b32.xlu0 %v5289_v51, 256 }
 0x57f   : > { %5319 = vbcast.lane.b32.xlu1 %v5317_v0, 256  ;;  %5298 = vbcast.lane.b32.xlu0 %v5296_v23, 256 }
 0x583   : > { %5326 = vbcast.lane.b32.xlu1 %v5324_v59, 256  ;;  %5340 = vbcast.lane.b32.xlu0 %v5338_v18, 256 }
 0x587   : > { %5333 = vbcast.lane.b32.xlu1 %v5331_v28, 256  ;;  %5413 = vbcast.lane.b32.xlu0 %v5411_v27, 256 }
 0x58b   : > { %5347 = vbcast.lane.b32.xlu1 %v5345_v3, 256  ;;  %5424 = vbcast.lane.b32.xlu0 %v5422_v34, 256 }
 0x58f   : > { %5406 = vbcast.lane.b32.xlu1 %v5400_v41, 264  ;;  %5435 = vbcast.lane.b32.xlu0 %v5433_v7, 256  ;;  %v5485_v41 = vsub.f32 %v11750_v22, %v5403_v61 }
 0x591   : > { %v5501_v31 = vmul.f32 1.442695, %v5485_v41 }
 0x593   : > { %5417 = vbcast.lane.b32.xlu1 %v5411_v27, 264  ;;  %5446 = vbcast.lane.b32.xlu0 %v5444_v17, 256  ;;  %9355 = vpow2.f32 %v5501_v31 }
 0x597   : > { %5428 = vbcast.lane.b32.xlu1 %v5422_v34, 264  ;;  %5457 = vbcast.lane.b32.xlu0 %v5455_v5, 256 }
 0x59b   : > { %5439 = vbcast.lane.b32.xlu1 %v5433_v7, 264  ;;  %5468 = vbcast.lane.b32.xlu0 %v5466_v33, 256 }
 0x59f   : > { %5450 = vbcast.lane.b32.xlu1 %v5444_v17, 264  ;;  %5479 = vbcast.lane.b32.xlu0 %v5477_v9, 256 }
 0x5a0   : > { %v11926_v63 = vpop.eup %9355 }
 0x5a1   : > { %v5709_v1 = vsel %vm4872_vm4, %v11926_v63, 0.0 }
 0x5a3   : > { %5461 = vbcast.lane.b32.xlu1 %v5455_v5, 264 }
 0x5a7   : > { %5472 = vbcast.lane.b32.xlu1 %v5466_v33, 264 }
 0x5ab   : > { %5483 = vbcast.lane.b32.xlu1 %v5477_v9, 264 }
 0x5be   : > { %5710 = vadd.xlane.f32.xlu0 %v5709_v1 }
 0x5dd   : > { %v5250_v51 = vpop.permute.xlu1 %5249  ;;  %v5243_v0 = vpop.permute.xlu0 %5242 }
 0x5de   : > { %v5350_v53 = vsub.f32 %v11668_v25, %v5250_v51  ;;  %v5349_v23 = vsub.f32 %v11665_v26, %v5243_v0 }
 0x5e0   : > { %v5367_v59 = vmul.f32 1.442695, %v5350_v53  ;;  %v5365_v18 = vmul.f32 1.442695, %v5349_v23 }
 0x5e1   : > { %v5257_v28 = vpop.permute.xlu1 %5256  ;;  %v5271_v22 = vpop.permute.xlu0 %5270 }
 0x5e2   : > { %9357 = vpow2.f32 %v5367_v59  ;;  %v5351_v27 = vsub.f32 %v11675_v29, %v5257_v28  ;;  %v5353_v34 = vsub.f32 %v11685_v2, %v5271_v22 }
 0x5e3   : > { %9359 = vpow2.f32 %v5365_v18 }
 0x5e4   : > { %v5369_v3 = vmul.f32 1.442695, %v5351_v27  ;;  %v5373_v25 = vmul.f32 1.442695, %v5353_v34 }
 0x5e5   : > { %v5264_v7 = vpop.permute.xlu1 %5263  ;;  %v5278_v17 = vpop.permute.xlu0 %5277 }
 0x5e6   : > { %9361 = vpow2.f32 %v5369_v3  ;;  %v5352_v5 = vsub.f32 %v11678_v54, %v5264_v7  ;;  %v5354_v26 = vsub.f32 %v11688_v19, %v5278_v17 }
 0x5e8   : > { %v5371_v33 = vmul.f32 1.442695, %v5352_v5  ;;  %v5375_v29 = vmul.f32 1.442695, %v5354_v26 }
 0x5e9   : > { %v5306_v9 = vpop.permute.xlu1 %5305  ;;  %v5285_v61 = vpop.permute.xlu0 %5284 }
 0x5ea   : > { %9363 = vpow2.f32 %v5371_v33  ;;  %v5358_v41 = vsub.f32 %v11705_v56, %v5306_v9  ;;  %v5355_v1 = vsub.f32 %v11695_v55, %v5285_v61 }
 0x5eb   : > { %9365 = vpow2.f32 %v5373_v25 }
 0x5ec   : > { %v5383_v31 = vmul.f32 1.442695, %v5358_v41  ;;  %v5377_v56 = vmul.f32 1.442695, %v5355_v1 }
 0x5ed   : > { %v5313_v2 = vpop.permute.xlu1 %5312  ;;  %v5292_v51 = vpop.permute.xlu0 %5291 }
 0x5ee   : > { %9367 = vpow2.f32 %v5383_v31  ;;  %v5359_v0 = vsub.f32 %v11715_v42, %v5313_v2  ;;  %v5356_v59 = vsub.f32 %v11698_v44, %v5292_v51 }
 0x5ef   : > { %v11939_v54 = vpop.eup %9357  ;;  %9369 = vpow2.f32 %v5375_v29 }
 0x5f0   : > { %v11941_v53 = vpop.eup %9359  ;;  %v5385_v19 = vmul.f32 1.442695, %v5359_v0  ;;  %v5536_v23 = vsel %vm4872_vm4, %v11939_v54, 0.0  ;;  %v5379_v34 = vmul.f32 1.442695, %v5356_v59 }
 0x5f1   : > { %v5320_v18 = vpop.permute.xlu1 %5319  ;;  %5537 = vadd.xlane.f32.xlu1 %v5536_v23  ;;  %v5533_v55 = vsel %vm4872_vm4, %v11941_v53, 0.0  ;;  %v5299_v28 = vpop.permute.xlu0 %5298 }
 0x5f2   : > { %9371 = vpow2.f32 %v5385_v19  ;;  %v5360_v42 = vsub.f32 %v11718_v36, %v5320_v18  ;;  %5534 = vadd.xlane.f32.xlu0 %v5533_v55  ;;  %v5357_v44 = vsub.f32 %v11708_v10, %v5299_v28 }
 0x5f3   : > { %v11949_v22 = vpop.eup %9361  ;;  %9373 = vpow2.f32 %v5377_v56 }
 0x5f4   : > { %v5387_v27 = vmul.f32 1.442695, %v5360_v42  ;;  %v5539_v3 = vsel %vm4872_vm4, %v11949_v22, 0.0  ;;  %v5381_v26 = vmul.f32 1.442695, %v5357_v44 }
 0x5f5   : > { %v5327_v7 = vpop.permute.xlu1 %5326  ;;  %v5341_v17 = vpop.permute.xlu0 %5340 }
 0x5f6   : > { %9375 = vpow2.f32 %v5387_v27  ;;  %v5361_v5 = vsub.f32 %v11725_v14, %v5327_v7  ;;  %5540 = vadd.xlane.f32.xlu0 %v5539_v3  ;;  %v5363_v9 = vsub.f32 %v11738_v6, %v5341_v17 }
 0x5f7   : > { %v11955_v33 = vpop.eup %9363  ;;  %9377 = vpow2.f32 %v5379_v34 }
 0x5f8   : > { %v5389_v36 = vmul.f32 1.442695, %v5361_v5  ;;  %v5542_v25 = vsel %vm4872_vm4, %v11955_v33, 0.0  ;;  %v11960_v31 = vpop.eup %9365  ;;  %v5393_v2 = vmul.f32 1.442695, %v5363_v9 }
 0x5f9   : > { %v5334_v61 = vpop.permute.xlu1 %5333  ;;  %v5414_v41 = vpop.permute.xlu0 %5413  ;;  %v5545_v6 = vsel %vm4872_vm4, %v11960_v31, 0.0 }
 0x5fa   : > { %9379 = vpow2.f32 %v5389_v36  ;;  %v5362_v10 = vsub.f32 %v11728_v15, %v5334_v61  ;;  %5543 = vadd.xlane.f32.xlu0 %v5542_v25  ;;  %v5487_v51 = vsub.f32 %v11752_v52, %v5414_v41 }
 0x5fb   : > { %v11963_v14 = vpop.eup %9367  ;;  %9381 = vpow2.f32 %v5381_v26 }
 0x5fc   : > { %v5391_v29 = vmul.f32 1.442695, %v5362_v10  ;;  %v5560_v1 = vsel %vm4872_vm4, %v11963_v14, 0.0  ;;  %v11970_v23 = vpop.eup %9369  ;;  %v5505_v52 = vmul.f32 1.442695, %v5487_v51 }
 0x5fd   : > { %v5348_v0 = vpop.permute.xlu1 %5347  ;;  %5561 = vadd.xlane.f32.xlu1 %v5560_v1  ;;  %v5425_v19 = vpop.permute.xlu0 %5424  ;;  %v5548_v42 = vsel %vm4872_vm4, %v11970_v23, 0.0 }
 0x5fe   : > { %9383 = vpow2.f32 %v5391_v29  ;;  %v5364_v15 = vsub.f32 %v11735_v4, %v5348_v0  ;;  %5546 = vadd.xlane.f32.xlu0 %v5545_v6  ;;  %v5489_v55 = vsub.f32 %v11766_v13, %v5425_v19 }
 0x5ff   : > { %v11973_v56 = vpop.eup %9371  ;;  %9385 = vpow2.f32 %v5393_v2 }
 0x600   : > { %v5395_v59 = vmul.f32 1.442695, %v5364_v15  ;;  %v5563_v18 = vsel %vm4872_vm4, %v11973_v56, 0.0  ;;  %v11980_v3 = vpop.eup %9373  ;;  %v5509_v13 = vmul.f32 1.442695, %v5489_v55 }
 0x601   : > { %5564 = vadd.xlane.f32.xlu1 %v5563_v18  ;;  %v5407_v28 = vpop.permute.xlu1 %5406  ;;  %v5436_v27 = vpop.permute.xlu0 %5435  ;;  %v5551_v36 = vsel %vm4872_vm4, %v11980_v3, 0.0 }
 0x602   : > { %9387 = vpow2.f32 %v5395_v59  ;;  %v5486_v4 = vsub.f32 %v11744_v8, %v5407_v28  ;;  %5549 = vadd.xlane.f32.xlu0 %v5548_v42  ;;  %v5491_v17 = vsub.f32 %v11768_v39, %v5436_v27 }
 0x603   : > { %v11983_v34 = vpop.eup %9375  ;;  %9389 = vpow2.f32 %v5505_v52 }
 0x604   : > { %v5503_v44 = vmul.f32 1.442695, %v5486_v4  ;;  %v5566_v7 = vsel %vm4872_vm4, %v11983_v34, 0.0  ;;  %v11990_v26 = vpop.eup %9377  ;;  %v5513_v39 = vmul.f32 1.442695, %v5491_v17 }
 0x605   : > { %5567 = vadd.xlane.f32.xlu1 %v5566_v7  ;;  %v5418_v5 = vpop.permute.xlu1 %5417  ;;  %v5447_v25 = vpop.permute.xlu0 %5446  ;;  %v5554_v1 = vsel %vm4872_vm4, %v11990_v26, 0.0 }
 0x606   : > { %9391 = vpow2.f32 %v5503_v44  ;;  %v5488_v8 = vsub.f32 %v11746_v43, %v5418_v5  ;;  %5552 = vadd.xlane.f32.xlu0 %v5551_v36  ;;  %v5493_v10 = vsub.f32 %v11782_v50, %v5447_v25 }
 0x607   : > { %v11993_v9 = vpop.eup %9379  ;;  %9393 = vpow2.f32 %v5509_v13 }
 0x608   : > { %v5507_v61 = vmul.f32 1.442695, %v5488_v8  ;;  %v5569_v41 = vsel %vm4872_vm4, %v11993_v9, 0.0  ;;  %v12000_v51 = vpop.eup %9381  ;;  %v5517_v50 = vmul.f32 1.442695, %v5493_v10 }
 0x609   : > { %5570 = vadd.xlane.f32.xlu1 %v5569_v41  ;;  %v5429_v29 = vpop.permute.xlu1 %5428  ;;  %v5458_v2 = vpop.permute.xlu0 %5457  ;;  %v5557_v18 = vsel %vm4872_vm4, %v12000_v51, 0.0 }
 0x60a   : > { %9395 = vpow2.f32 %v5507_v61  ;;  %v5490_v43 = vsub.f32 %v11760_v37, %v5429_v29  ;;  %5555 = vadd.xlane.f32.xlu0 %v5554_v1  ;;  %v5495_v15 = vsub.f32 %v11784_v21, %v5458_v2 }
 0x60b   : > { %v12003_v0 = vpop.eup %9383  ;;  %9397 = vpow2.f32 %v5513_v39 }
 0x60c   : > { %v5511_v6 = vmul.f32 1.442695, %v5490_v43  ;;  %v5572_v19 = vsel %vm4872_vm4, %v12003_v0, 0.0  ;;  %v12010_v55 = vpop.eup %9385  ;;  %v5521_v21 = vmul.f32 1.442695, %v5495_v15 }
 0x60d   : > { %5573 = vadd.xlane.f32.xlu1 %v5572_v19  ;;  %v5440_v59 = vpop.permute.xlu1 %5439  ;;  %v5469_v52 = vpop.permute.xlu0 %5468  ;;  %v5575_v7 = vsel %vm4872_vm4, %v12010_v55, 0.0 }
 0x60e   : > { %9399 = vpow2.f32 %v5511_v6  ;;  %v5492_v37 = vsub.f32 %v11762_v60, %v5440_v59  ;;  %5558 = vadd.xlane.f32.xlu0 %v5557_v18  ;;  %v5497_v4 = vsub.f32 %v11798_v11, %v5469_v52 }
 0x60f   : > { %v12013_v28 = vpop.eup %9387  ;;  %9401 = vpow2.f32 %v5517_v50 }
 0x610   : > { %v5515_v42 = vmul.f32 1.442695, %v5492_v37  ;;  %v5578_v27 = vsel %vm4872_vm4, %v12013_v28, 0.0  ;;  %v12020_v13 = vpop.eup %9389  ;;  %v5525_v11 = vmul.f32 1.442695, %v5497_v4 }
 0x611   : > { %5579 = vadd.xlane.f32.xlu1 %v5578_v27  ;;  %v5451_v44 = vpop.permute.xlu1 %5450  ;;  %v5480_v17 = vpop.permute.xlu0 %5479  ;;  %v5715_v41 = vsel %vm4872_vm4, %v12020_v13, 0.0 }
 0x612   : > { %9403 = vpow2.f32 %v5515_v42  ;;  %v5494_v60 = vsub.f32 %v11776_v62, %v5451_v44  ;;  %5576 = vadd.xlane.f32.xlu0 %v5575_v7  ;;  %v5499_v8 = vsub.f32 %v11800_v35, %v5480_v17 }
 0x613   : > { %v12023_v5 = vpop.eup %9391  ;;  %9405 = vpow2.f32 %v5521_v21 }
 0x614   : > { %v5519_v36 = vmul.f32 1.442695, %v5494_v60  ;;  %v5712_v25 = vsel %vm4872_vm4, %v12023_v5, 0.0  ;;  %v12030_v39 = vpop.eup %9393  ;;  %v5529_v2 = vmul.f32 1.442695, %v5499_v8 }
 0x615   : > { %5713 = vadd.xlane.f32.xlu1 %v5712_v25  ;;  %v5462_v61 = vpop.permute.xlu1 %5461  ;;  %v5721_v43 = vsel %vm4872_vm4, %v12030_v39, 0.0 }
 0x616   : > { %9407 = vpow2.f32 %v5519_v36  ;;  %v5496_v62 = vsub.f32 %v11778_v38, %v5462_v61  ;;  %5716 = vadd.xlane.f32.xlu0 %v5715_v41 }
 0x617   : > { %v12033_v10 = vpop.eup %9395  ;;  %9409 = vpow2.f32 %v5525_v11 }
 0x618   : > { %v5523_v29 = vmul.f32 1.442695, %v5496_v62  ;;  %v5718_v1 = vsel %vm4872_vm4, %v12033_v10, 0.0  ;;  %v12039_v6 = vpop.eup %9397 }
 0x619   : > { %5719 = vadd.xlane.f32.xlu1 %v5718_v1  ;;  %v5473_v35 = vpop.permute.xlu1 %5472  ;;  %v5727_v18 = vsel %vm4872_vm4, %v12039_v6, 0.0 }
 0x61a   : > { %9411 = vpow2.f32 %v5523_v29  ;;  %v5498_v19 = vsub.f32 %v11792_v32, %v5473_v35  ;;  %5722 = vadd.xlane.f32.xlu0 %v5721_v43 }
 0x61b   : > { %v12042_v38 = vpop.eup %9399  ;;  %9413 = vpow2.f32 %v5529_v2 }
 0x61c   : > { %v5527_v50 = vmul.f32 1.442695, %v5498_v19  ;;  %v5724_v15 = vsel %vm4872_vm4, %v12042_v38, 0.0  ;;  %v12048_v52 = vpop.eup %9401 }
 0x61d   : > { %5725 = vadd.xlane.f32.xlu1 %v5724_v15  ;;  %v5484_v59 = vpop.permute.xlu1 %5483  ;;  %v5733_v21 = vsel %vm4872_vm4, %v12048_v52, 0.0 }
 0x61e   : > { %9415 = vpow2.f32 %v5527_v50  ;;  %v5500_v37 = vsub.f32 %v11794_v40, %v5484_v59  ;;  %5728 = vadd.xlane.f32.xlu0 %v5727_v18 }
 0x61f   : > { %v12051_v32 = vpop.eup %9403 }
 0x620   : > { %v5531_v42 = vmul.f32 1.442695, %v5500_v37  ;;  %v5730_v27 = vsel %vm4872_vm4, %v12051_v32, 0.0  ;;  %v12057_v4 = vpop.eup %9405 }
 0x621   : > { %5731 = vadd.xlane.f32.xlu1 %v5730_v27  ;;  %v5739_v7 = vsel %vm4872_vm4, %v12057_v4, 0.0 }
 0x622   : > { %9417 = vpow2.f32 %v5531_v42  ;;  %5734 = vadd.xlane.f32.xlu0 %v5733_v21 }
 0x623   : > { %v12059_v44 = vpop.eup %9407 }
 0x624   : > { %v5736_v40 = vsel %vm4872_vm4, %v12059_v44, 0.0  ;;  %v12065_v60 = vpop.eup %9409 }
 0x625   : > { %5737 = vadd.xlane.f32.xlu1 %v5736_v40  ;;  %v5745_v25 = vsel %vm4872_vm4, %v12065_v60, 0.0 }
 0x626   : > { %5740 = vadd.xlane.f32.xlu0 %v5739_v7 }
 0x627   : > { %v12067_v17 = vpop.eup %9411 }
 0x628   : > { %12605 = vst [vmem:[#allocation40_spill] sm:$0xff] %v12067_v17  ;;  %v5742_v36 = vsel %vm4872_vm4, %v12067_v17, 0.0  ;;  %v12073_v11 = vpop.eup %9413 }
 0x629   : > { %5743 = vadd.xlane.f32.xlu1 %v5742_v36  ;;  %12606 = vst [vmem:[#allocation41_spill] sm:$0xff] %v12073_v11  ;;  %v5751_v41 = vsel %vm4872_vm4, %v12073_v11, 0.0 }
 0x62a   : > { %5746 = vadd.xlane.f32.xlu0 %v5745_v25 }
 0x62b   : > { %v12075_v8 = vpop.eup %9415 }
 0x62c   : > { %12607 = vst [vmem:[#allocation42_spill] sm:$0xff] %v12075_v8  ;;  %v5748_v61 = vsel %vm4872_vm4, %v12075_v8, 0.0 }
 0x62d   : > { %5749 = vadd.xlane.f32.xlu1 %v5748_v61 }
 0x62e   : > { %5752 = vadd.xlane.f32.xlu0 %v5751_v41 }
 0x62f   : > { %v12081_v62 = vpop.eup %9417 }
 0x630   : > { %12608 = vst [vmem:[#allocation43_spill] sm:$0xff] %v12081_v62  ;;  %v5754_v29 = vsel %vm4872_vm4, %v12081_v62, 0.0 }
 0x631   : > { %5755 = vadd.xlane.f32.xlu1 %v5754_v29 }
 0x647   : > { %v12085_v1 = vpop.xlane.xlu0 %5710 }
 0x67a   : > { %v5538_v43 = vpop.xlane.xlu1 %5537 }
 0x67b   : > { %v5535_v2 = vpop.xlane.xlu0 %5534  ;;  %v5604_v37 = vrot.slane %v5538_v43, %v11811_v49 }
 0x67c   : > { %v5600_v42 = vrot.slane %v5535_v2, %v11811_v49 }
 0x67e   : > { %v5661_v25 = vsel %vm5003_vm5, %v5604_v37, %v5600_v42 }
 0x67f   : > { %v5541_v35 = vpop.xlane.xlu0 %5540 }
 0x680   : > { %v5608_v27 = vrot.slane %v5541_v35, %v11811_v49 }
 0x682   : > { %v5662_v41 = vsel %vm5005_vm6, %v5608_v27, %v5661_v25 }
 0x683   : > { %v5544_v19 = vpop.xlane.xlu0 %5543 }
 0x684   : > { %v5612_v21 = vrot.slane %v5544_v19, %v11811_v49 }
 0x686   : > { %v5562_v50 = vpop.xlane.xlu1 %5561  ;;  %v5663_v43 = vsel %vm5007_vm7, %v5612_v21, %v5662_v41 }
 0x687   : > { %v5547_v15 = vpop.xlane.xlu0 %5546  ;;  %v5636_v42 = vrot.slane %v5562_v50, %v11811_v49 }
 0x688   : > { %v5616_v7 = vrot.slane %v5547_v15, %v11811_v49 }
 0x68a   : > { %v5565_v59 = vpop.xlane.xlu1 %5564  ;;  %v5664_v2 = vsel %vm5009_vm8, %v5616_v7, %v5663_v43 }
 0x68b   : > { %v5550_v18 = vpop.xlane.xlu0 %5549  ;;  %v5640_v21 = vrot.slane %v5565_v59, %v11811_v49 }
 0x68c   : > { %v5620_v61 = vrot.slane %v5550_v18, %v11811_v49 }
 0x68e   : > { %v5568_v40 = vpop.xlane.xlu1 %5567  ;;  %v5665_v19 = vsel %vm5011_vm9, %v5620_v61, %v5664_v2 }
 0x68f   : > { %v5553_v36 = vpop.xlane.xlu0 %5552  ;;  %v5644_v7 = vrot.slane %v5568_v40, %v11811_v49 }
 0x690   : > { %v5624_v29 = vrot.slane %v5553_v36, %v11811_v49 }
 0x692   : > { %v5571_v16 = vpop.xlane.xlu1 %5570  ;;  %v5666_v15 = vsel %vm5013_vm10, %v5624_v29, %v5665_v19 }
 0x693   : > { %v5556_v35 = vpop.xlane.xlu0 %5555  ;;  %v5648_v25 = vrot.slane %v5571_v16, %v11811_v49 }
 0x694   : > { %v5628_v24 = vrot.slane %v5556_v35, %v11811_v49 }
 0x696   : > { %v5574_v62 = vpop.xlane.xlu1 %5573  ;;  %v5667_v37 = vsel %vm5015_vm11, %v5628_v24, %v5666_v15 }
 0x697   : > { %5677 = vxpose.xlu0.b32.start [1/2] (short) (narrow) %v5667_v37, 8  ;;  %v5559_v18 = vpop.xlane.xlu0 %5558  ;;  %v5652_v24 = vrot.slane %v5574_v62, %v11811_v49 }
 0x698   : > { %v5632_v27 = vrot.slane %v5559_v18, %v11811_v49 }
 0x69a   : > { %v5668_v36 = vsel %vm5003_vm5, %v5636_v42, %v5632_v27  ;;  %v5580_v41 = vpop.xlane.xlu1 %5579 }
 0x69b   : > { %v5669_v61 = vsel %vm5005_vm6, %v5640_v21, %v5668_v36  ;;  %v5577_v29 = vpop.xlane.xlu0 %5576  ;;  %v5660_v59 = vrot.slane %v5580_v41, %v11811_v49 }
 0x69c   : > { %v5670_v43 = vsel %vm5007_vm7, %v5644_v7, %v5669_v61  ;;  %v5656_v50 = vrot.slane %v5577_v29, %v11811_v49 }
 0x69d   : > { %v5671_v2 = vsel %vm5009_vm8, %v5648_v25, %v5670_v43 }
 0x69e   : > { %v5672_v40 = vsel %vm5011_vm9, %v5652_v24, %v5671_v2  ;;  %v5714_v19 = vpop.xlane.xlu1 %5713 }
 0x69f   : > { %v5673_v35 = vsel %vm5013_vm10, %v5656_v50, %v5672_v40  ;;  %v5717_v37 = vpop.xlane.xlu0 %5716  ;;  %v5780_v43 = vrot.slane %v5714_v19, %v11844_v20 }
 0x6a0   : > { %v5674_v16 = vsel %vm5015_vm11, %v5660_v59, %v5673_v35  ;;  %v5785_v50 = vrot.slane %v5717_v37, %v11811_v49 }
 0x6a1   : > { %5678 = vxpose.xlu0.b32.end [2/2] (short) (narrow) %v5674_v16, 8  ;;  %v5776_v16 = vrot.slane %v12085_v1, %v11811_v49 }
 0x6a2   : > { %v5720_v15 = vpop.xlane.xlu1 %5719 }
 0x6a3   : > { %v5723_v62 = vpop.xlane.xlu0 %5722  ;;  %v5789_v29 = vrot.slane %v5720_v15, %v11844_v20 }
 0x6a4   : > { %v5794_v59 = vrot.slane %v5723_v62, %v11811_v49  ;;  %v5781_v62 = vsel %vm5131_vm12, %v5780_v43, %v5776_v16  ;;  %v6119_v16 = vld [vmem:[#allocation7] sm:$0xff] }
 0x6a5   : > { %v5790_v8 = vsel %vm5131_vm12, %v5789_v29, %v5785_v50 }
 0x6a6   : > { %v5726_v18 = vpop.xlane.xlu1 %5725  ;;  %v5845_v29 = vsel %vm5003_vm5, %v5790_v8, %v5781_v62 }
 0x6a7   : > { %v5729_v27 = vpop.xlane.xlu0 %5728  ;;  %v5798_v24 = vrot.slane %v5726_v18, %v11844_v20 }
 0x6a8   : > { %v5803_v15 = vrot.slane %v5729_v27, %v11811_v49 }
 0x6a9   : > { %v5799_v19 = vsel %vm5131_vm12, %v5798_v24, %v5794_v59 }
 0x6aa   : > { %v5732_v42 = vpop.xlane.xlu1 %5731  ;;  %v5846_v24 = vsel %vm5005_vm6, %v5799_v19, %v5845_v29 }
 0x6ab   : > { %v5735_v7 = vpop.xlane.xlu0 %5734  ;;  %v5807_v2 = vrot.slane %v5732_v42, %v11844_v20 }
 0x6ac   : > { %v5812_v37 = vrot.slane %v5735_v7, %v11811_v49 }
 0x6ae   : > { %v5738_v21 = vpop.xlane.xlu1 %5737 }
 0x6af   : > { %v5741_v25 = vpop.xlane.xlu0 %5740  ;;  %v5816_v40 = vrot.slane %v5738_v21, %v11844_v20  ;;  %v5808_v21 = vsel %vm5131_vm12, %v5807_v2, %v5803_v15  ;;  %v6121_v15 = vld [vmem:[#allocation7 + $0x10] sm:$0xff] }
 0x6b0   : > { %v5821_v17 = vrot.slane %v5741_v25, %v11811_v49  ;;  %v5847_v43 = vsel %vm5007_vm7, %v5808_v21, %v5846_v24 }
 0x6b1   : > { %v5817_v27 = vsel %vm5131_vm12, %v5816_v40, %v5812_v37 }
 0x6b2   : > { %v5744_v36 = vpop.xlane.xlu1 %5743  ;;  %v5848_v25 = vsel %vm5009_vm8, %v5817_v27, %v5847_v43 }
 0x6b3   : > { %v5747_v41 = vpop.xlane.xlu0 %5746  ;;  %v5825_v18 = vrot.slane %v5744_v36, %v11844_v20 }
 0x6b4   : > { %v5830_v36 = vrot.slane %v5747_v41, %v11811_v49 }
 0x6b5   : > { %v5826_v7 = vsel %vm5131_vm12, %v5825_v18, %v5821_v17 }
 0x6b6   : > { %v5750_v61 = vpop.xlane.xlu1 %5749  ;;  %v5849_v8 = vsel %vm5011_vm9, %v5826_v7, %v5848_v25 }
 0x6b7   : > { %v5834_v42 = vrot.slane %v5750_v61, %v11844_v20  ;;  %v5753_v11 = vpop.xlane.xlu0 %5752 }
 0x6b8   : > { %v5839_v61 = vrot.slane %v5753_v11, %v11811_v49  ;;  %v6120_v49 = vld [vmem:[#allocation7 + $0x8] sm:$0xff]  ;;  %v6122_v11 = vld [vmem:[#allocation7 + $0x18] sm:$0xff] }
 0x6b9   : > { %v5835_v50 = vsel %vm5131_vm12, %v5834_v42, %v5830_v36  ;;  %9040 = vmatpush3.msra.mxu0 %v6120_v49  ;;  %9047 = vmatpush3.msra.mxu1 %v6122_v11 }
 0x6ba   : > { %v5756_v35 = vpop.xlane.xlu1 %5755  ;;  %v5850_v2 = vsel %vm5013_vm10, %v5835_v50, %v5849_v8 }
 0x6bb   : > { %v5843_v1 = vrot.slane %v5756_v35, %v11844_v20  ;;  %v12609_v35 = vmov 0.0  }
 0x6bc   : > { %9041 = vmatprep.subr.mxu0 %v12609_v35  ;;  %9048 = vmatprep.subr.mxu1 %v12609_v35 }
 0x6bd   : > { %v5844_v20 = vsel %vm5131_vm12, %v5843_v1, %v5839_v61  ;;  %9042 = vmatpush3.msra.mxu0 %v6119_v16  ;;  %9049 = vmatpush3.msra.mxu1 %v6121_v15  ;;  %v6124_v16 = vld [vmem:[#allocation7 + $0x28] sm:$0xff]  ;;  %v6126_v15 = vld [vmem:[#allocation7 + $0x38] sm:$0xff] }
 0x6be   : > { %v5851_v41 = vsel %vm5015_vm11, %v5844_v20, %v5850_v2  ;;  %9053 = vmatprep.subr.mxu0 %v12609_v35  ;;  %9060 = vmatprep.subr.mxu1 %v12609_v35 }
 0x719   : > { %v5693_v59 = vpop.trf.xlu0 }
 0x71a   : > { %v5853_v40 = vadd.f32 %v5851_v41, %v5693_v59 }
 0x71c   : > { %9419 = vrcp.f32 %v5853_v40 }
 0x729   : > { %v12149_v17 = vpop.eup %9419 }
 0x72a   : > { %5855 = vxpose.xlu1.b32.start.end [1/1] (short) (narrow) %v12149_v17, 16  ;;  %v6018_v8 = vrot.slane %v12149_v17, %v11877_v58  ;;  %v6029_v41 = vrot.slane %v12149_v17, %v11882_v45  ;;  %v6040_v59 = vrot.slane %v12149_v17, %v11887_v57  ;;  %v6051_v40 = vrot.slane %v12149_v17, %v11895_v12 }
 0x7a6   : > { %v5871_v18 = vpop.trf.xlu1 }
 0x7a7   : > { %v5897_v19 = vrot.slane %v5871_v18, %v11882_v45  ;;  %v5890_v37 = vrot.slane %v5871_v18, %v11877_v58  ;;  %v5904_v42 = vrot.slane %v5871_v18, %v11887_v57  ;;  %v5918_v62 = vrot.slane %v5871_v18, %v11890_v48 }
 0x7a8   : > { %v5911_v1 = vrot.slane %v5871_v18, %v11895_v12  ;;  %v5932_v29 = vrot.slane %v5871_v18, %v11904_v30  ;;  %v5925_v36 = vrot.slane %v5871_v18, %v11898_v46  ;;  %v5939_v7 = vrot.slane %v5871_v18, %v11908_v47 }
 0x7a9   : > { %5899 = vbcast.lane.b32.xlu1 %v5897_v19, 256  ;;  %5892 = vbcast.lane.b32.xlu0 %v5890_v37, 256  ;;  %v6127_v19 = vld [vmem:[#allocation7 + $0x40] sm:$0xff] }
 0x7aa   : > { %v5872_v21 = vpop.trf.xlu1 }
 0x7ab   : > { %v5946_v27 = vrot.slane %v5872_v21, %v11877_v58  ;;  %v5960_v24 = vrot.slane %v5872_v21, %v11887_v57  ;;  %v5953_v61 = vrot.slane %v5872_v21, %v11882_v45  ;;  %v5974_v43 = vrot.slane %v5872_v21, %v11890_v48 }
 0x7ac   : > { %v5967_v50 = vrot.slane %v5872_v21, %v11895_v12  ;;  %v5988_v25 = vrot.slane %v5872_v21, %v11904_v30  ;;  %v5981_v20 = vrot.slane %v5872_v21, %v11898_v46  ;;  %v5995_v2 = vrot.slane %v5872_v21, %v11908_v47 }
 0x7ad   : > { %5906 = vbcast.lane.b32.xlu1 %v5904_v42, 256  ;;  %5920 = vbcast.lane.b32.xlu0 %v5918_v62, 256  ;;  %v6062_v58 = vrot.slane %v12149_v17, %v11890_v48  ;;  %v6073_v45 = vrot.slane %v12149_v17, %v11898_v46  ;;  %v6084_v57 = vrot.slane %v12149_v17, %v11904_v30  ;;  %v6123_v30 = vld [vmem:[#allocation7 + $0x20] sm:$0xff] }
 0x7ae   : > { %v6095_v12 = vrot.slane %v12149_v17, %v11908_v47 }
 0x7b1   : > { %5913 = vbcast.lane.b32.xlu1 %v5911_v1, 256  ;;  %5934 = vbcast.lane.b32.xlu0 %v5932_v29, 256  ;;  %v6132_v1 = vld [vmem:[#allocation7 + $0x68] sm:$0xff]  ;;  %v6129_v29 = vld [vmem:[#allocation7 + $0x50] sm:$0xff] }
 0x7b5   : > { %5927 = vbcast.lane.b32.xlu1 %v5925_v36, 256  ;;  %5948 = vbcast.lane.b32.xlu0 %v5946_v27, 256  ;;  %v6131_v36 = vld [vmem:[#allocation7 + $0x60] sm:$0xff] }
 0x7b9   : > { %5941 = vbcast.lane.b32.xlu1 %v5939_v7, 256  ;;  %5962 = vbcast.lane.b32.xlu0 %v5960_v24, 256  ;;  %v6134_v24 = vld [vmem:[#allocation7 + $0x78] sm:$0xff] }
 0x7bd   : > { %5955 = vbcast.lane.b32.xlu1 %v5953_v61, 256  ;;  %5976 = vbcast.lane.b32.xlu0 %v5974_v43, 256 }
 0x7c1   : > { %5969 = vbcast.lane.b32.xlu1 %v5967_v50, 256  ;;  %5990 = vbcast.lane.b32.xlu0 %v5988_v25, 256  ;;  %v6133_v50 = vld [vmem:[#allocation7 + $0x70] sm:$0xff]  ;;  %v6135_v25 = vld [vmem:[#allocation7 + $0x80] sm:$0xff] }
 0x7c5   : > { %5983 = vbcast.lane.b32.xlu1 %v5981_v20, 256  ;;  %6020 = vbcast.lane.b32.xlu0 %v6018_v8, 256 }
 0x7c9   : > { %5997 = vbcast.lane.b32.xlu1 %v5995_v2, 256  ;;  %6031 = vbcast.lane.b32.xlu0 %v6029_v41, 256  ;;  %v6138_v2 = vld [vmem:[#allocation7 + $0x98] sm:$0xff] }
 0x7cd   : > { %6024 = vbcast.lane.b32.xlu1 %v6018_v8, 264  ;;  %6042 = vbcast.lane.b32.xlu0 %v6040_v59, 256 }
 0x7d1   : > { %6035 = vbcast.lane.b32.xlu1 %v6029_v41, 264  ;;  %6053 = vbcast.lane.b32.xlu0 %v6051_v40, 256 }
 0x7d5   : > { %6046 = vbcast.lane.b32.xlu1 %v6040_v59, 264  ;;  %6064 = vbcast.lane.b32.xlu0 %v6062_v58, 256  ;;  %v6137_v59 = vld [vmem:[#allocation7 + $0x90] sm:$0xff] }
 0x7d9   : > { %6057 = vbcast.lane.b32.xlu1 %v6051_v40, 264  ;;  %6075 = vbcast.lane.b32.xlu0 %v6073_v45, 256 }
 0x7dd   : > { %6068 = vbcast.lane.b32.xlu1 %v6062_v58, 264  ;;  %6086 = vbcast.lane.b32.xlu0 %v6084_v57, 256 }
 0x7e1   : > { %6079 = vbcast.lane.b32.xlu1 %v6073_v45, 264  ;;  %6097 = vbcast.lane.b32.xlu0 %v6095_v12, 256  ;;  %v6139_v45 = vld [vmem:[#allocation7 + $0xa0] sm:$0xff] }
 0x7e5   : > { %6090 = vbcast.lane.b32.xlu1 %v6084_v57, 264  ;;  %v6142_v57 = vld [vmem:[#allocation7 + $0xb8] sm:$0xff] }
 0x7e9   : > { %6101 = vbcast.lane.b32.xlu1 %v6095_v12, 264 }
 0x81b   : > { %v5893_v48 = vpop.permute.xlu0 %5892  ;;  %v5900_v49 = vpop.permute.xlu1 %5899 }
 0x81c   : > { %v5999_v11 = vmul.f32 %v11941_v53, %v5893_v48  ;;  %v6000_v46 = vmul.f32 %v11939_v54, %v5900_v49  ;;  %v6128_v53 = vld [vmem:[#allocation7 + $0x48] sm:$0xff]  ;;  %v6125_v54 = vld [vmem:[#allocation7 + $0x30] sm:$0xff] }
 0x81e   : > { %9044 = vmatmul.mubr.msk.f32.vlgmr.msra.gmra.mxu0 %vm4872_vm4, %v5999_v11  ;;  %9051 = vmatmul.mubr.msk.f32.vlgmr.msra.gmra.mxu1 %vm4872_vm4, %v6000_v46  ;;  %v6141_v11 = vld [vmem:[#allocation7 + $0xb0] sm:$0xff]  ;;  %v6143_v46 = vld [vmem:[#allocation7 + $0xc0] sm:$0xff] }
 0x81f   : > { %9054 = vmatpush3.msra.mxu0 %v6124_v16  ;;  %v5921_v18 = vpop.permute.xlu0 %5920  ;;  %v5907_v47 = vpop.permute.xlu1 %5906  ;;  %9057 = vmatprep.mubr.msk.f32.mxu0 %vm9676_vm3, %v12609_v35 }
 0x820   : > { %v6001_v17 = vmul.f32 %v11949_v22, %v5907_v47  ;;  %9055 = vmatprep.subr.mxu0 %v12609_v35  ;;  %9061 = vmatpush3.msra.mxu1 %v6126_v15  ;;  %v6130_v22 = vld [vmem:[#allocation7 + $0x58] sm:$0xff]  ;;  %v6003_v21 = vmul.f32 %v11960_v31, %v5921_v18  ;;  %v6145_v47 = vld [vmem:[#allocation7 + $0xd0] sm:$0xff] }
 0x821   : > { %9056 = vmatpush3.msra.mxu0 %v6123_v30  ;;  %9062 = vmatprep.subr.mxu1 %v12609_v35  ;;  %v6146_v30 = vld [vmem:[#allocation7 + $0xd8] sm:$0xff] }
 0x822   : > { %9058 = vmatmul.mubr.msk.f32.vlgmr.msra.gmra.mxu0 %vm4872_vm4, %v6001_v17  ;;  %9067 = vmatprep.subr.mxu0 %v12609_v35 }
 0x823   : > { %v5935_v37 = vpop.permute.xlu0 %5934  ;;  %9068 = vmatpush3.msra.mxu0 %v6128_v53  ;;  %v5914_v42 = vpop.permute.xlu1 %5913  ;;  %9063 = vmatpush3.msra.mxu1 %v6125_v54  ;;  %v6147_v54 = vld [vmem:[#allocation7 + $0xe0] sm:$0xff] }
 0x824   : > { %v6002_v62 = vmul.f32 %v11955_v33, %v5914_v42  ;;  %9069 = vmatprep.subr.mxu0 %v12609_v35  ;;  %9064 = vmatprep.mubr.msk.f32.mxu1 %vm9676_vm3, %v12609_v35  ;;  %v6005_v7 = vmul.f32 %v11980_v3, %v5935_v37  ;;  %v6150_v37 = vld [vmem:[#allocation7 + $0xf8] sm:$0xff] }
 0x825   : > { %9070 = vmatpush3.msra.mxu0 %v6127_v19  ;;  %9071 = vmatprep.mubr.msk.f32.mxu0 %vm9676_vm3, %v12609_v35 }
 0x826   : > { %9074 = vmatprep.subr.mxu1 %v12609_v35  ;;  %9065 = vmatmul.mubr.msk.f32.vlgmr.msra.gmra.mxu1 %vm4872_vm4, %v6002_v62 }
 0x827   : > { %9072 = vmatmul.mubr.msk.f32.vlgmr.msra.gmra.mxu0 %vm4872_vm4, %v6003_v21  ;;  %9075 = vmatpush3.msra.mxu1 %v6130_v22  ;;  %v5949_v33 = vpop.permute.xlu0 %5948  ;;  %v5928_v27 = vpop.permute.xlu1 %5927  ;;  %v6149_v22 = vld [vmem:[#allocation7 + $0xf0] sm:$0xff] }
 0x828   : > { %9081 = vmatprep.subr.mxu0 %v12609_v35  ;;  %9076 = vmatprep.subr.mxu1 %v12609_v35  ;;  %v6004_v31 = vmul.f32 %v11970_v23, %v5928_v27  ;;  %v6136_v23 = vld [vmem:[#allocation7 + $0x88] sm:$0xff]  ;;  %v6007_v41 = vmul.f32 %v12000_v51, %v5949_v33 }
 0x829   : > { %9082 = vmatpush3.msra.mxu0 %v6132_v1  ;;  %9077 = vmatpush3.msra.mxu1 %v6129_v29  ;;  %v2847_v1 = vld [vmem:[%s12273_s28 + $0x18] sm:$0xff] }
 0x82a   : > { %9083 = vmatprep.subr.mxu0 %v12609_v35  ;;  %9078 = vmatprep.mubr.msk.f32.mxu1 %vm9676_vm3, %v12609_v35 }
 0x82b   : > { %9084 = vmatpush3.msra.mxu0 %v6131_v36  ;;  %9085 = vmatprep.mubr.msk.f32.mxu0 %vm9676_vm3, %v12609_v35  ;;  %v5963_v61 = vpop.permute.xlu0 %5962  ;;  %v5942_v43 = vpop.permute.xlu1 %5941 }
 0x82c   : > { %9088 = vmatprep.subr.mxu1 %v12609_v35  ;;  %9079 = vmatmul.mubr.msk.f32.vlgmr.msra.gmra.mxu1 %vm4872_vm4, %v6004_v31  ;;  %v6006_v3 = vmul.f32 %v11990_v26, %v5942_v43  ;;  %v6140_v26 = vld [vmem:[#allocation7 + $0xa8] sm:$0xff]  ;;  %v6009_v12 = vmul.f32 %v11973_v56, %v5963_v61  ;;  %v2846_v31 = vld [vmem:[%s12273_s28 + $0x10] sm:$0xff]  ;;  %v2851_v61 = vld [vmem:[%s12273_s28 + $0x38] sm:$0xff] }
 0x82d   : > { %9086 = vmatmul.mubr.msk.f32.vlgmr.msra.gmra.mxu0 %vm4872_vm4, %v6005_v7  ;;  %9089 = vmatpush3.msra.mxu1 %v6134_v24  ;;  %v2849_v24 = vld [vmem:[%s12273_s28 + $0x28] sm:$0xff]  ;;  %v2850_v43 = vld [vmem:[%s12273_s28 + $0x30] sm:$0xff] }
 0x82e   : > { %9095 = vmatprep.subr.mxu0 %v12609_v35  ;;  %9090 = vmatprep.subr.mxu1 %v12609_v35 }
 0x82f   : > { %9096 = vmatpush3.msra.mxu0 %v6136_v23  ;;  %9091 = vmatpush3.msra.mxu1 %v6133_v50  ;;  %v5977_v20 = vpop.permute.xlu0 %5976  ;;  %v5956_v8 = vpop.permute.xlu1 %5955 }
 0x830   : > { %9097 = vmatprep.subr.mxu0 %v12609_v35  ;;  %9092 = vmatprep.mubr.msk.f32.mxu1 %vm9676_vm3, %v12609_v35  ;;  %v6008_v51 = vmul.f32 %v11963_v14, %v5956_v8  ;;  %v6144_v14 = vld [vmem:[#allocation7 + $0xc8] sm:$0xff]  ;;  %v6011_v18 = vmul.f32 %v11993_v9, %v5977_v20  ;;  %v2855_v20 = vld [vmem:[%s12273_s28 + $0x58] sm:$0xff] }
 0x831   : > { %9098 = vmatpush3.msra.mxu0 %v6135_v25  ;;  %9099 = vmatprep.mubr.msk.f32.mxu0 %vm9676_vm3, %v12609_v35 }
 0x832   : > { %9102 = vmatprep.subr.mxu1 %v12609_v35  ;;  %9093 = vmatmul.mubr.msk.f32.vlgmr.msra.gmra.mxu1 %vm4872_vm4, %v6006_v3 }
 0x833   : > { %9100 = vmatmul.mubr.msk.f32.vlgmr.msra.gmra.mxu0 %vm4872_vm4, %v6007_v41  ;;  %9103 = vmatpush3.msra.mxu1 %v6138_v2  ;;  %v5991_v40 = vpop.permute.xlu0 %5990  ;;  %v5970_v58 = vpop.permute.xlu1 %5969  ;;  %v2854_v41 = vld [vmem:[%s12273_s28 + $0x50] sm:$0xff] }
 0x834   : > { %9109 = vmatprep.subr.mxu0 %v12609_v35  ;;  %9104 = vmatprep.subr.mxu1 %v12609_v35  ;;  %v6010_v56 = vmul.f32 %v11983_v34, %v5970_v58  ;;  %v6148_v34 = vld [vmem:[#allocation7 + $0xe8] sm:$0xff]  ;;  %v6013_v42 = vmul.f32 %v12010_v55, %v5991_v40  ;;  %v12611_v40 = vld [vmem:[#allocation41_spill] sm:$0xff] }
 0x835   : > { %9110 = vmatpush3.msra.mxu0 %v6140_v26  ;;  %9105 = vmatpush3.msra.mxu1 %v6137_v59  ;;  %v2845_v55 = vld [vmem:[%s12273_s28 + $0x8] sm:$0xff] }
 0x836   : > { %9111 = vmatprep.subr.mxu0 %v12609_v35  ;;  %9106 = vmatprep.mubr.msk.f32.mxu1 %vm9676_vm3, %v12609_v35  ;;  %v12610_v26 = vld [vmem:[#allocation40_spill] sm:$0xff] }
 0x837   : > { %9112 = vmatpush3.msra.mxu0 %v6139_v45  ;;  %9113 = vmatprep.mubr.msk.f32.mxu0 %vm9676_vm3, %v12609_v35  ;;  %v5984_v48 = vpop.permute.xlu1 %5983  ;;  %v6021_v49 = vpop.permute.xlu0 %6020  ;;  %v2856_v45 = vld [vmem:[%s12273_s28 + $0x60] sm:$0xff] }
 0x838   : > { %9116 = vmatprep.subr.mxu1 %v12609_v35  ;;  %9107 = vmatmul.mubr.msk.f32.vlgmr.msra.gmra.mxu1 %vm4872_vm4, %v6008_v51  ;;  %v6012_v9 = vmul.f32 %v12003_v0, %v5984_v48  ;;  %v6103_v19 = vmul.f32 %v11926_v63, %v6021_v49  ;;  %v2857_v51 = vld [vmem:[%s12273_s28 + $0x68] sm:$0xff]  ;;  %v2858_v49 = vld [vmem:[%s12273_s28 + $0x70] sm:$0xff] }
 0x839   : > { %9114 = vmatmul.mubr.msk.f32.vlgmr.msra.gmra.mxu0 %vm4872_vm4, %v6009_v12  ;;  %9117 = vmatpush3.msra.mxu1 %v6142_v57  ;;  %v12612_v57 = vld [vmem:[#allocation42_spill] sm:$0xff] }
 0x83a   : > { %9123 = vmatprep.subr.mxu0 %v12609_v35  ;;  %9118 = vmatprep.subr.mxu1 %v12609_v35 }
 0x83b   : > { %9124 = vmatpush3.msra.mxu0 %v6144_v14  ;;  %9119 = vmatpush3.msra.mxu1 %v6141_v11  ;;  %v5998_v16 = vpop.permute.xlu1 %5997  ;;  %v6032_v15 = vpop.permute.xlu0 %6031  ;;  %v12613_v14 = vld [vmem:[#allocation43_spill] sm:$0xff] }
 0x83c   : > { %9125 = vmatprep.subr.mxu0 %v12609_v35  ;;  %9120 = vmatprep.mubr.msk.f32.mxu1 %vm9676_vm3, %v12609_v35  ;;  %v6014_v63 = vmul.f32 %v12013_v28, %v5998_v16  ;;  %v6105_v21 = vmul.f32 %v12020_v13, %v6032_v15  ;;  %v2844_v28 = vld [vmem:[%s12273_s28] sm:$0xff] }
 0x83d   : > { %9126 = vmatpush3.msra.mxu0 %v6143_v46  ;;  %9127 = vmatprep.mubr.msk.f32.mxu0 %vm9676_vm3, %v12609_v35 }
 0x83e   : > { %9130 = vmatprep.subr.mxu1 %v12609_v35  ;;  %9121 = vmatmul.mubr.msk.f32.vlgmr.msra.gmra.mxu1 %vm4872_vm4, %v6010_v56  ;;  %v9677_v56 = vmov 1983009808  }
 0x83f   : > { %9128 = vmatmul.mubr.msk.f32.vlgmr.msra.gmra.mxu0 %vm4872_vm4, %v6011_v18  ;;  %9131 = vmatpush3.msra.mxu1 %v6146_v30  ;;  %v6025_v17 = vpop.permute.xlu1 %6024  ;;  %v6043_v53 = vpop.permute.xlu0 %6042  ;;  %v7970_v46 = vunpack.c.l.s4 %v9677_v56 }
 0x840   : > { %9137 = vmatprep.subr.mxu0 %v12609_v35  ;;  %9132 = vmatprep.subr.mxu1 %v12609_v35  ;;  %v6104_v33 = vmul.f32 %v12023_v5, %v6025_v17  ;;  %v6107_v27 = vmul.f32 %v12030_v39, %v6043_v53  ;;  %v2848_v39 = vld [vmem:[%s12273_s28 + $0x20] sm:$0xff] }
 0x841   : > { %9138 = vmatpush3.msra.mxu0 %v6148_v34  ;;  %9133 = vmatpush3.msra.mxu1 %v6145_v47  ;;  %v7971_v34 = vunpack.c.0.s8 %v7970_v46 }
 0x842   : > { %9139 = vmatprep.subr.mxu0 %v12609_v35  ;;  %9134 = vmatprep.mubr.msk.f32.mxu1 %vm9676_vm3, %v12609_v35 }
 0x843   : > { %9140 = vmatpush3.msra.mxu0 %v6147_v54  ;;  %9141 = vmatprep.mubr.msk.f32.mxu0 %vm9676_vm3, %v12609_v35  ;;  %v6036_v62 = vpop.permute.xlu1 %6035  ;;  %v6054_v0 = vpop.permute.xlu0 %6053 }
 0x844   : > { %9144 = vmatprep.subr.mxu1 %v12609_v35  ;;  %9135 = vmatmul.mubr.msk.f32.vlgmr.msra.gmra.mxu1 %vm4872_vm4, %v6012_v9  ;;  %v6109_v36 = vmul.f32 %v12039_v6, %v6054_v0  ;;  %v12614_v9 = vld [vmem:[#allocation39_spill] sm:$0xff] }
 0x845   : > { %9142 = vmatmul.mubr.msk.f32.vlgmr.msra.gmra.mxu0 %vm4872_vm4, %v6013_v42  ;;  %9145 = vmatpush3.msra.mxu1 %v6150_v37  ;;  %v12326_v54 = vsub.s32 %v7971_v34, %v12614_v9 }
 0x846   : > { %9146 = vmatprep.subr.mxu1 %v12609_v35  ;;  %9155 = vmatprep.mubr.msk.f32.mxu0 %vm4872_vm4, %v6103_v19 }
 0x847   : > { %9147 = vmatpush3.msra.mxu1 %v6149_v22  ;;  %9148 = vmatprep.mubr.msk.f32.mxu1 %vm9676_vm3, %v12609_v35  ;;  %v6047_v29 = vpop.permute.xlu1 %6046  ;;  %v6065_v13 = vpop.permute.xlu0 %6064  ;;  %v6106_v35 = vmul.f32 %v12033_v10, %v6036_v62 }
 0x848   : > { %9151 = vmatprep.subr.mxu0 %v2845_v55  ;;  %9149 = vmatmul.mubr.msk.f32.vlgmr.msra.gmra.mxu1 %vm4872_vm4, %v6014_v63  ;;  %v6108_v10 = vmul.f32 %v12042_v38, %v6047_v29  ;;  %v6111_v6 = vmul.f32 %v12048_v52, %v6065_v13  ;;  %v2853_v38 = vld [vmem:[%s12273_s28 + $0x48] sm:$0xff]  ;;  %v2852_v52 = vld [vmem:[%s12273_s28 + $0x40] sm:$0xff] }
 0x849   : > { %9152 = vmatpush3.msra.mxu0 %v2845_v55  ;;  %9162 = vmatprep.mubr.msk.f32.mxu1 %vm4872_vm4, %v6105_v21 }
 0x84a   : > { %9153 = vmatprep.subr.mxu0 %v2844_v28  ;;  %9158 = vmatprep.subr.mxu1 %v2847_v1 }
 0x84b   : > { %9154 = vmatpush3.msra.mxu0 %v2844_v28  ;;  %9159 = vmatpush3.msra.mxu1 %v2847_v1  ;;  %v6058_v7 = vpop.permute.xlu1 %6057  ;;  %v6076_v5 = vpop.permute.xlu0 %6075 }
 0x84c   : > { %9156 = vmatmul.mubr.msk.f32.vlgmr.msra.gmra.mxu0 %vm4872_vm4, %v6104_v33  ;;  %9160 = vmatprep.subr.mxu1 %v2846_v31  ;;  %v6110_v3 = vmul.f32 %v12051_v32, %v6058_v7  ;;  %v6113_v25 = vmul.f32 %v12057_v4, %v6076_v5 }
 0x84d   : > { %9169 = vmatprep.mubr.msk.f32.mxu0 %vm4872_vm4, %v6107_v27  ;;  %9161 = vmatpush3.msra.mxu1 %v2846_v31 }
 0x84e   : > { %9163 = vmatmul.mubr.msk.f32.vlgmr.msra.gmra.mxu1 %vm4872_vm4, %v6106_v35  ;;  %9165 = vmatprep.subr.mxu0 %v2849_v24 }
 0x84f   : > { %9166 = vmatpush3.msra.mxu0 %v2849_v24  ;;  %9176 = vmatprep.mubr.msk.f32.mxu1 %vm4872_vm4, %v6109_v36  ;;  %v6069_v23 = vpop.permute.xlu1 %6068  ;;  %v6087_v50 = vpop.permute.xlu0 %6086 }
 0x850   : > { %9167 = vmatprep.subr.mxu0 %v2848_v39  ;;  %9172 = vmatprep.subr.mxu1 %v2851_v61  ;;  %v6112_v32 = vmul.f32 %v12059_v44, %v6069_v23  ;;  %v6115_v4 = vmul.f32 %v12065_v60, %v6087_v50  ;;  %v2859_v60 = vld [vmem:[%s12273_s28 + $0x78] sm:$0xff]  ;;  %v9678_v23 = vmov 1934713408  }
 0x851   : > { %9168 = vmatpush3.msra.mxu0 %v2848_v39  ;;  %9173 = vmatpush3.msra.mxu1 %v2851_v61  ;;  %v8034_v50 = vunpack.c.l.s4 %v9678_v23 }
 0x852   : > { %9170 = vmatmul.mubr.msk.f32.vlgmr.msra.gmra.mxu0 %vm4872_vm4, %v6108_v10  ;;  %9174 = vmatprep.subr.mxu1 %v2850_v43 }
 0x853   : > { %9183 = vmatprep.mubr.msk.f32.mxu0 %vm4872_vm4, %v6111_v6  ;;  %9175 = vmatpush3.msra.mxu1 %v2850_v43  ;;  %v6080_v8 = vpop.permute.xlu1 %6079  ;;  %v6098_v2 = vpop.permute.xlu0 %6097 }
 0x854   : > { %9177 = vmatmul.mubr.msk.f32.vlgmr.msra.gmra.mxu1 %vm4872_vm4, %v6110_v3  ;;  %9179 = vmatprep.subr.mxu0 %v2853_v38  ;;  %v6114_v59 = vmul.f32 %v12610_v26, %v6080_v8  ;;  %v6117_v58 = vmul.f32 %v12611_v40, %v6098_v2  ;;  %v8035_v2 = vunpack.c.0.s8 %v8034_v50 }
 0x855   : > { %9180 = vmatpush3.msra.mxu0 %v2853_v38  ;;  %9190 = vmatprep.mubr.msk.f32.mxu1 %vm4872_vm4, %v6113_v25 }
 0x856   : > { %9181 = vmatprep.subr.mxu0 %v2852_v52  ;;  %9186 = vmatprep.subr.mxu1 %v2855_v20 }
 0x857   : > { %9182 = vmatpush3.msra.mxu0 %v2852_v52  ;;  %9187 = vmatpush3.msra.mxu1 %v2855_v20  ;;  %v6091_v44 = vpop.permute.xlu1 %6090 }
 0x858   : > { %9184 = vmatmul.mubr.msk.f32.vlgmr.msra.gmra.mxu0 %vm4872_vm4, %v6112_v32  ;;  %9188 = vmatprep.subr.mxu1 %v2854_v41  ;;  %v6116_v12 = vmul.f32 %v12612_v57, %v6091_v44  ;;  %v12376_v57 = vsub.s32 %v8035_v2, %v12614_v9 }
 0x859   : > { %9197 = vmatprep.mubr.msk.f32.mxu0 %vm4872_vm4, %v6115_v4  ;;  %9189 = vmatpush3.msra.mxu1 %v2854_v41 }
 0x85a   : > { %9191 = vmatmul.mubr.msk.f32.vlgmr.msra.gmra.mxu1 %vm4872_vm4, %v6114_v59  ;;  %9193 = vmatprep.subr.mxu0 %v2857_v51 }
 0x85b   : > { %9194 = vmatpush3.msra.mxu0 %v2857_v51  ;;  %9204 = vmatprep.mubr.msk.f32.mxu1 %vm4872_vm4, %v6117_v58  ;;  %v6102_v48 = vpop.permute.xlu1 %6101 }
 0x85c   : > { %9195 = vmatprep.subr.mxu0 %v2856_v45  ;;  %9200 = vmatprep.subr.mxu1 %v2859_v60  ;;  %v6118_v11 = vmul.f32 %v12613_v14, %v6102_v48 }
 0x85d   : > { %9196 = vmatpush3.msra.mxu0 %v2856_v45  ;;  %9201 = vmatpush3.msra.mxu1 %v2859_v60 }
 0x85e   : > { %9198 = vmatmul.mubr.msk.f32.vlgmr.msra.gmra.mxu0 %vm4872_vm4, %v6116_v12  ;;  %9202 = vmatprep.subr.mxu1 %v2858_v49 }
 0x85f   : > { %9203 = vmatpush3.msra.mxu1 %v2858_v49 }
 0x860   : > { %9205 = vmatmul.mubr.msk.f32.vlgmr.msra.gmra.mxu1 %vm4872_vm4, %v6118_v11 }
 0x8de   : > { %v6220_v16 = vpop.f32.mrf.mxu0  ;;  %v6293_v15 = vpop.f32.mrf.mxu1 }
 0x8e0   : > { %v9045_v30 = vpop.f32.mrf.mxu0  ;;  %v9052_v18 = vpop.f32.mrf.mxu1 }
 0x8e2   : > { %v6366_v47 = vpop.f32.mrf.mxu0 }
 0x8e3   : > { %v7968_v17 = vcombine.high %v6220_v16, %v6366_v47  ;;  %v7967_v25 = vcombine.low %v6220_v16, %v6366_v47 }
 0x8e4   : > { %v9059_v53 = vpop.f32.mrf.mxu0 }
 0x8e5   : > { %v12331_v0 = vrot.slane %v7968_v17, %v12326_v54  ;;  %v7975_v41 = vrot.slane %v7967_v25, %v12326_v54 }
 0x8e6   : > { %v6439_v19 = vpop.f32.mrf.mxu1 }
 0x8e7   : > { %v7984_v37 = vcombine.high %v6293_v15, %v6439_v19  ;;  %v12328_v42 = vpop.f32.mrf.mxu0  ;;  %v7983_v10 = vcombine.low %v6293_v15, %v6439_v19 }
 0x8e8   : > { %v9066_v62 = vpop.f32.mrf.mxu1 }
 0x8e9   : > { %v12334_v63 = vrot.slane %v7984_v37, %v12326_v54  ;;  %v9073_v22 = vpop.f32.mrf.mxu0  ;;  %v7991_v20 = vrot.slane %v7983_v10, %v12326_v54 }
 0x8eb   : > { %v8047_v21 = vcombine.low %v12331_v0, %v12334_v63  ;;  %v8048_v55 = vcombine.high %v12331_v0, %v12334_v63  ;;  %v8031_v51 = vcombine.low %v7975_v41, %v7991_v20 }
 0x8ec   : > { %v12340_v28 = vpop.f32.mrf.mxu1 }
 0x8ed   : > { %v12342_v1 = vpop.f32.mrf.mxu0  ;;  %v8039_v15 = vrot.slane %v8031_v51, %v12376_v57 }
 0x8ee   : > { %v9080_v29 = vpop.f32.mrf.mxu1  ;;  %v7999_v6 = vcombine.low %v12328_v42, %v12342_v1 }
 0x8ef   : > { %v9087_v13 = vpop.f32.mrf.mxu0 }
 0x8f0   : > { %v8007_v8 = vrot.slane %v7999_v6, %v12326_v54 }
 0x8f2   : > { %v12344_v33 = vpop.f32.mrf.mxu1 }
 0x8f3   : > { %v12346_v27 = vpop.f32.mrf.mxu0  ;;  %v8015_v39 = vcombine.low %v12340_v28, %v12344_v33  ;;  %v8016_v25 = vcombine.high %v12340_v28, %v12344_v33 }
 0x8f4   : > { %v9094_v31 = vpop.f32.mrf.mxu1 }
 0x8f5   : > { %v9101_v35 = vpop.f32.mrf.mxu0  ;;  %v8023_v38 = vrot.slane %v8015_v39, %v12326_v54  ;;  %v8032_v31 = vcombine.high %v7975_v41, %v7991_v20  ;;  %v8000_v20 = vcombine.high %v12328_v42, %v12342_v1  ;;  %v8030_v41 = vrot.slane %v8016_v25, %v12326_v54 }
 0x8f7   : > { %v8063_v26 = vcombine.low %v8007_v8, %v8023_v38  ;;  %v8064_v29 = vcombine.high %v8007_v8, %v8023_v38  ;;  %v8046_v50 = vrot.slane %v8032_v31, %v12376_v57 }
 0x8f8   : > { %v12348_v36 = vpop.f32.mrf.mxu1 }
 0x8f9   : > { %v12350_v24 = vpop.f32.mrf.mxu0  ;;  %v8071_v14 = vrot.slane %v8063_v26, %v12376_v57  ;;  %v8078_v10 = vrot.slane %v8064_v29, %v12376_v57  ;;  %v8062_v29 = vrot.slane %v8048_v55, %v12376_v57 }
 0x8fa   : > { %v9108_v7 = vpop.f32.mrf.mxu1  ;;  %v8103_v59 = vcombine.low %v12346_v27, %v12350_v24 }
 0x8fb   : > { %v9115_v5 = vpop.f32.mrf.mxu0  ;;  %v8095_v34 = vcombine.low %v8039_v15, %v8071_v14  ;;  %v8096_v13 = vcombine.high %v8039_v15, %v8071_v14 }
 0x8fc   : > { %v8111_v48 = vrot.slane %v8103_v59, %v12326_v54 }
 0x8fe   : > { %v12354_v61 = vpop.f32.mrf.mxu1 }
 0x8ff   : > { %v12358_v43 = vpop.f32.mrf.mxu0  ;;  %v8119_v32 = vcombine.low %v12348_v36, %v12354_v61  ;;  %v8120_v28 = vcombine.high %v12348_v36, %v12354_v61 }
 0x900   : > { %v9122_v3 = vpop.f32.mrf.mxu1 }
 0x901   : > { %v9129_v52 = vpop.f32.mrf.mxu0  ;;  %v8127_v44 = vrot.slane %v8119_v32, %v12326_v54 }
 0x902   : > { %v8097_v52 = vcombine.low %v8046_v50, %v8078_v10 }
 0x903   : > { %v8167_v56 = vcombine.low %v8111_v48, %v8127_v44  ;;  %v8168_v6 = vcombine.high %v8111_v48, %v8127_v44  ;;  %v8104_v44 = vcombine.high %v12346_v27, %v12350_v24  ;;  %v8055_v27 = vrot.slane %v8047_v21, %v12376_v57 }
 0x904   : > { %v12365_v4 = vpop.f32.mrf.mxu1 }
 0x905   : > { %v12370_v40 = vpop.f32.mrf.mxu0  ;;  %v8175_v17 = vrot.slane %v8167_v56, %v12376_v57  ;;  %v8182_v8 = vrot.slane %v8168_v6, %v12376_v57  ;;  %v8118_v36 = vrot.slane %v8104_v44, %v12326_v54 }
 0x906   : > { %v9136_v58 = vpop.f32.mrf.mxu1  ;;  %v8135_v45 = vcombine.low %v12358_v43, %v12370_v40  ;;  %v8136_v33 = vcombine.high %v12358_v43, %v12370_v40 }
 0x907   : > { %v9143_v60 = vpop.f32.mrf.mxu0  ;;  %v8014_v58 = vrot.slane %v8000_v20, %v12326_v54  ;;  %v8292_v20 = vld [vmem:[%s317_s10 + $0x8] sm:$0xff] }
 0x908   : > { %v7315_v12 = vpop.f32.mrf.mxu1  ;;  %v8143_v46 = vrot.slane %v8135_v45, %v12326_v54  ;;  %v8098_v60 = vcombine.high %v8046_v50, %v8078_v10 }
 0x909   : > { %v8151_v49 = vcombine.low %v12365_v4, %v7315_v12  ;;  %v8152_v26 = vcombine.high %v12365_v4, %v7315_v12  ;;  %v8079_v1 = vcombine.low %v8014_v58, %v8030_v41  ;;  %v8134_v4 = vrot.slane %v8120_v28, %v12326_v54 }
 0x90a   : > { %v9150_v11 = vpop.f32.mrf.mxu1  ;;  %v8150_v12 = vrot.slane %v8136_v33, %v12326_v54 }
 0x90b   : > { %v8159_v16 = vrot.slane %v8151_v49, %v12326_v54  ;;  %v8166_v45 = vrot.slane %v8152_v26, %v12326_v54  ;;  %v8087_v40 = vrot.slane %v8079_v1, %v12376_v57  ;;  %v8183_v14 = vcombine.low %v8118_v36, %v8134_v4 }
 0x90c   : > { %v9157_v30 = vpop.f32.mrf.mxu0 }
 0x90d   : > { %v8199_v18 = vcombine.low %v8143_v46, %v8159_v16  ;;  %v8200_v39 = vcombine.high %v8143_v46, %v8159_v16  ;;  %v8215_v61 = vcombine.low %v8150_v12, %v8166_v45  ;;  %v8099_v46 = vcombine.low %v8055_v27, %v8087_v40 }
 0x90e   : > { %v7391_v47 = vpop.f32.mrf.mxu0  ;;  %v9164_v19 = vpop.f32.mrf.mxu1  ;;  %v8191_v16 = vrot.slane %v8183_v14, %v12376_v57 }
 0x90f   : > { %v8207_v53 = vrot.slane %v8199_v18, %v12376_v57  ;;  %v8239_v9 = vadd.f32 %v8095_v34, %v7391_v47  ;;  %v8214_v38 = vrot.slane %v8200_v39, %v12376_v57  ;;  %v8223_v56 = vrot.slane %v8215_v61, %v12376_v57 }
 0x910   : > { %v7472_v22 = vpop.f32.mrf.mxu1  ;;  %v8080_v47 = vcombine.high %v8014_v58, %v8030_v41 }
 0x911   : > { %v8231_v37 = vcombine.low %v8175_v17, %v8207_v53  ;;  %8255 = vxpose.xlu0.b32.start [1/16] (narrow) %v8239_v9, 16  ;;  %v8232_v35 = vcombine.high %v8175_v17, %v8207_v53  ;;  %v8241_v7 = vadd.f32 %v8096_v13, %v7472_v22  ;;  %v8233_v59 = vcombine.low %v8182_v8, %v8214_v38 }
 0x912   : > { %v9171_v5 = vpop.f32.mrf.mxu0  ;;  %v8234_v43 = vcombine.high %v8182_v8, %v8214_v38  ;;  %v8100_v17 = vcombine.high %v8055_v27, %v8087_v40  ;;  %v8236_v21 = vcombine.high %v8191_v16, %v8223_v56 }
 0x913   : > { %v8240_v62 = vadd.f32 %v9157_v30, %v8231_v37  ;;  %v8242_v23 = vadd.f32 %v9164_v19, %v8232_v35  ;;  %v8244_v51 = vadd.f32 %v9171_v5, %v8233_v59  ;;  %v8235_v30 = vcombine.low %v8191_v16, %v8223_v56 }
 0x914   : > { %v7553_v3 = vpop.f32.mrf.mxu0  ;;  %v9178_v2 = vpop.f32.mrf.mxu1  ;;  %v8216_v19 = vcombine.high %v8150_v12, %v8166_v45  ;;  %v8094_v37 = vrot.slane %v8080_v47, %v12376_v57 }
 0x915   : > { %8256 = vxpose.xlu0.b32.cont [2/16] (narrow) %v8240_v62, 16  ;;  %v8243_v32 = vadd.f32 %v8097_v52, %v7553_v3  ;;  %v8246_v11 = vadd.f32 %v9178_v2, %v8234_v43  ;;  %v8184_v62 = vcombine.high %v8118_v36, %v8134_v4  ;;  %v8291_v3 = vld [vmem:[%s317_s10] sm:$0xff]  ;;  %s9679_s10 = smov [#allocation17]  }
 0x916   : > { %v7634_v42 = vpop.f32.mrf.mxu1  ;;  %v8230_v31 = vrot.slane %v8216_v19, %v12376_v57  ;;  %v8101_v35 = vcombine.low %v8062_v29, %v8094_v37  ;;  %v8102_v50 = vcombine.high %v8062_v29, %v8094_v37  ;;  %s9533_s16 = sshll.u32 %s9679_s10, 4  ;;  %s9534_s16 = int_to_ptr.vmem [resolvable:$false] %s9533_s16 }
 0x917   : > { %v8245_v48 = vadd.f32 %v8098_v60, %v7634_v42  ;;  %s9535_s17 = scalar_lea.vmem %s9534_s16, 512  ;;  %p9536_p12 = scmp.lt.s32.totalorder %s12434_s12, %s9534_s16 }
 0x918   : > { %v9185_v49 = vpop.f32.mrf.mxu0  ;;  %p9537_p8 = scmp.lt.s32.totalorder %s9535_s17, %s9529_s11 }
 0x919   : > { %8257 = vxpose.xlu0.b32.cont [3/16] (narrow) %v8241_v7, 16  ;;  %v8248_v18 = vadd.f32 %v9185_v49, %v8235_v30  ;;  %v8198_v7 = vrot.slane %v8184_v62, %v12376_v57  ;;  %v8288_v57 = vstv %s8287_s23 }
 0x91a   : > { %v7715_v24 = vpop.f32.mrf.mxu0  ;;  %v9192_v15 = vpop.f32.mrf.mxu1  ;;  %p9538_p4 = por %p9537_p8, %p9536_p12 }
 0x91b   : > { %v8247_v54 = vadd.f32 %v8099_v46, %v7715_v24  ;;  %v8250_v22 = vadd.f32 %v9192_v15, %v8236_v21  ;;  %v8237_v10 = vcombine.low %v8198_v7, %v8230_v31  ;;  %v8238_v63 = vcombine.high %v8198_v7, %v8230_v31 }
 0x91c   : > { %v7796_v34 = vpop.f32.mrf.mxu1  ;;  %p9539_p7 = pnand %p9538_p4, %p9532_p6 }
 0x91d   : > { %8258 = vxpose.xlu0.b32.cont [4/16] (narrow) %v8242_v23, 16  ;;  %v8249_v53 = vadd.f32 %v8100_v17, %v7796_v34 }
 0x91e   : > { %v9199_v9 = vpop.f32.mrf.mxu0 }
 0x91f   : > { %v8252_v6 = vadd.f32 %v9199_v9, %v8237_v10 }
 0x920   : > { %v7877_v13 = vpop.f32.mrf.mxu0  ;;  %v9206_v39 = vpop.f32.mrf.mxu1 }
 0x921   : > { %8259 = vxpose.xlu0.b32.cont [5/16] (narrow) %v8243_v32, 16  ;;  %v8251_v5 = vadd.f32 %v8101_v35, %v7877_v13  ;;  %v8254_v55 = vadd.f32 %v9206_v39, %v8238_v63 }
 0x922   : > { %v7958_v23 = vpop.f32.mrf.mxu1 }
 0x923   : > { %v8253_v0 = vadd.f32 %v8102_v50, %v7958_v23 }
 0x925   : > { %8260 = vxpose.xlu0.b32.cont [6/16] (narrow) %v8244_v51, 16 }
 0x929   : > { %8261 = vxpose.xlu0.b32.cont [7/16] (narrow) %v8245_v48, 16 }
 0x92d   : > { %8262 = vxpose.xlu0.b32.cont [8/16] (narrow) %v8246_v11, 16 }
 0x931   : > { %8263 = vxpose.xlu0.b32.cont [9/16] (narrow) %v8247_v54, 16 }
 0x935   : > { %8264 = vxpose.xlu0.b32.cont [10/16] (narrow) %v8248_v18, 16 }
 0x939   : > { %8265 = vxpose.xlu0.b32.cont [11/16] (narrow) %v8249_v53, 16 }
 0x93d   : > { %8266 = vxpose.xlu0.b32.cont [12/16] (narrow) %v8250_v22, 16 }
 0x941   : > { %8267 = vxpose.xlu0.b32.cont [13/16] (narrow) %v8251_v5, 16 }
 0x945   : > { %8268 = vxpose.xlu0.b32.cont [14/16] (narrow) %v8252_v6, 16 }
 0x949   : > { %8269 = vxpose.xlu0.b32.cont [15/16] (narrow) %v8253_v0, 16 }
 0x94d   : > { %8270 = vxpose.xlu0.b32.end [16/16] (narrow) %v8254_v55, 16 }
 0x98d   : > { %v8271_v25 = vpop.trf.xlu0 }
 0x98e   : > { %v8289_v38 = vmul.f32 %v8288_v57, %v8271_v25 }
 0x990   : > { %v8293_v52 = vadd.f32 %v8291_v3, %v8289_v38 }
 0x991   : > { %v8272_v8 = vpop.trf.xlu0 }
 0x992   : > { %8295 = vst [vmem:[%s9958_s21] sm:$0xff] %v8293_v52  ;;  %v8290_v32 = vmul.f32 %v8288_v57, %v8272_v8 }
 0x994   : > { %v8294_v2 = vadd.f32 %v8292_v20, %v8290_v32 }
 0x996   : > { %8296 = vst [vmem:[%s9958_s21 + $0x8] sm:$0xff] %v8294_v2 }
 0x997   : > { %9542 = shalt.err (!%p9539_p7)
}
 0x998   : > { %s9543_s13 = scalar_lea.hbm %s12432_s9, 256  ;;  %s9547_s6 = scalar_lea.hbm %s12616_s15, 1024 }
 0x999   : > { %p9544_p9 = scmp.ne.s32.totalorder %s12432_s9, %s9543_s13  ;;  %p9548_p11 = scmp.lt.s32.totalorder %s12432_s9, %s12616_s15 }
 0x99a   : > { %p9549_p1 = scmp.lt.s32.totalorder %s9547_s6, %s9543_s13 }
 0x99b   : > { %p9545_p0 = pnand %p9544_p9, %p12617_p5 }
 0x99c   : > { %p9550_p10 = por %p9549_p1, %p9548_p11 }
 0x99d   : > { %p9546_p2 = pneg %p9545_p0 }
 0x99f   : > { %p9551_p13 = pnand %p9550_p10, %p9546_p2 }
 0x9a1   : > { %9554 = shalt.err (!%p9551_p13)
}
 0x9a2   : > { %s9680_s28 = smov 128   ;;  %s9681_s0 = smov 256  }
 0x9a3   : > { %s9682_s23 = smov 8  }
 0x9a4   : > { %9223 = dma.vmem_to_hbm [thread:$0]  (%p12617_p5), %s12434_s12, 256, %s12432_s9, %s12439_s29, %s9680_s28, %s9681_s0, %s9682_s23  }
 0x9a5 PF: > { %s12618_s25 = sld [smem:[#allocation23_spill]]  ;;  %p9248_p3 = scmp.ge.s32.totalorder %s9661_s8, 2 }
 0x9a6   : > { %s12619_s5 = sld [smem:[#allocation31_spill]] }
 0x9ab   : > { %s8327_s22 = sand.u32 1, %s12618_s25  }
 0x9ac   : > { %p12620_p6 = scmp.ne.s32.totalorder %s12619_s5, 0  ;;  %s8328_s14 = scalar_lea.sflag [#allocation11], %s8327_s22 }
 0x9ae   : > { %p9240_p12 = pnand %p9248_p3, %p12620_p6 }
 0x9b0   : > { %p9241_p8 = pneg %p9240_p12 }
 0x9b2   : > { %9616 = dma.done.wait (%p9241_p8), %s8328_s14, 256  }
 0x9b3   : > { %9618 = vsyncadd (%p9241_p8), %s8328_s14, 4294967040  ;;  %s25_s8 = sadd.s32 1, %s9661_s8   ;;  %s12621_s26 = sld [smem:[#allocation24_spill]] }
 0x9b4   : > { %p22_p4 = scmp.ge.s32.totalorder %s25_s8, 6   ;;  %s12622_s25 = sld [smem:[#allocation30_spill]] }
 0x9b5   : > { %s12623_s18 = sld [smem:[#allocation25_spill]]  ;;  %s12627_s23 = smov %s9625_s24 }
 0x9b6   : > { %s12624_s28 = sld [smem:[#allocation29_spill]]  ;;  %s12631_s29 = smov %s9653_s30 }
 0x9b7   : > { %s12625_s12 = sld [smem:[#allocation27_spill]]  ;;  %s12632_s5 = smov %s9657_s7 }
 0x9b8   : > { %s12626_s9 = sld [smem:[#allocation28_spill]] }
 0x9b9   : > { %s12628_s24 = smov %s12621_s26  ;;  %s12629_s26 = smov %s9637_s27 }
 0x9ba   :  { %24 = sbr.rel (!%p22_p4) target bundleno = 16 (0x10), region = 118 }
 0x9bb   : > { %s12630_s27 = smov %s12623_s18 }
 0x9bd   : > { %s12633_s30 = smov %s12625_s12 }
 0x9be   : > { %s12634_s7 = smov %s12626_s9 }
 0x9bf   :  { %8333 = vsyncpa [#allocation10], 1 }
 0x9c0   :  { %8335 = vsyncpa [#allocation10 + $0x1], 1 }
 0x9c1   :  { %8336 = vsyncpa [#allocation13], 1 }
 0x9c2   :  { %8338 = vsyncpa [#allocation13 + $0x1], 1 }
 0x9c3   :  { %8339 = vsyncpa [#allocation16], 1 }
 0x9c4   :  { %8340 = vsyncpa [#allocation11], 1 }
 0x9c5   :  { %8342 = vsyncpa [#allocation11 + $0x1], 1 }

</bundles_post_ra>
